<compile_context>
chip_gen: v6e
topology: v6e:2x2x1
jax: 0.10.0
libtpu: 0.0.40
codegen_flags: <defaults>
</compile_context>

<pallas_src>
import jax
import jax.numpy as jnp
from jax import lax
from jax.experimental import pallas as pl
from jax.experimental.pallas import tpu as pltpu


def _choose_row_tile(H, W, C):
    """Largest divisor of H whose f32 accumulator (rt*W, C) stays <= 256 KiB."""
    budget = 256 * 1024
    best = 1
    for rt in range(1, H + 1):
        if H % rt == 0 and rt * W * C * 4 <= budget:
            best = rt
    return best


def _make_basic_block_kernel(H, W, C, row_tile):
    """Fused BasicBlock for one batch element per grid step.

    Refs:
      x_ref   : (H, W, C)       f32 input (also the residual identity)
      w1_ref  : (9*C, C)        bf16 im2col conv1 weight
      s1_ref  : (1, C)          f32 bn1 scale  = gamma / sqrt(var + eps)
      b1_ref  : (1, C)          f32 bn1 bias   = beta - mean * scale
      w2_ref  : (9*C, C)        bf16 im2col conv2 weight
      s2_ref  : (1, C)          f32 bn2 scale
      b2_ref  : (1, C)          f32 bn2 bias
      o_ref   : (H, W, C)       f32 output
      xpad    : (H+2, W+2, C)   f32 VMEM scratch, zero-padded conv1 input
      mid     : (H+2, W+2, C)   f32 VMEM scratch, zero-padded relu(bn1(conv1))
    """
    n_tiles = H // row_tile
    M = row_tile * W

    def _im2col(src_ref, r0):
        # (row_tile*W, 9*C) patch; cast to bf16 right before the MXU dot.
        taps = []
        for dy in range(3):
            for dx in range(3):
                taps.append(
                    src_ref[r0 + dy:r0 + dy + row_tile, dx:dx + W, :]
                    .astype(jnp.bfloat16).reshape(M, C))
        return jnp.concatenate(taps, axis=-1)          # (M, 9C) bf16

    def _zero_border(pad_ref):
        # Interior is fully overwritten every step; only the 1-px halo border
        # needs to be (re)zeroed.  ~18x less store traffic than a full clear.
        zero_row = jnp.zeros((1, W + 2, C), jnp.float32)
        zero_col = jnp.zeros((H + 2, 1, C), jnp.float32)
        pad_ref[0:1, :, :] = zero_row
        pad_ref[H + 1:H + 2, :, :] = zero_row
        pad_ref[:, 0:1, :] = zero_col
        pad_ref[:, W + 1:W + 2, :] = zero_col

    def kernel(x_ref, w1_ref, s1_ref, b1_ref, w2_ref, s2_ref, b2_ref,
               o_ref, xpad_ref, mid_ref):
        # Build the 1-pixel halo in VMEM (no host-side pad, border-only clear).
        _zero_border(xpad_ref)
        _zero_border(mid_ref)
        xpad_ref[1:H + 1, 1:W + 1, :] = x_ref[...]

        s1 = s1_ref[...]          # (1, C) f32 -> broadcasts over M rows
        b1 = b1_ref[...]
        s2 = s2_ref[...]
        b2 = b2_ref[...]
        w1 = w1_ref[...]          # (9*C, C) bf16
        w2 = w2_ref[...]

        # ---- conv1 (im2col matmul) + bn1 + relu -> mid (padded) ----
        for t in range(n_tiles):
            r0 = t * row_tile
            patch = _im2col(xpad_ref, r0)                         # (M, 9C) bf16
            acc = jnp.dot(patch, w1,
                          preferred_element_type=jnp.float32)     # (M, C) f32
            out1 = jnp.maximum(acc * s1 + b1, 0.0)
            mid_ref[1 + r0:1 + r0 + row_tile, 1:W + 1, :] = (
                out1.reshape(row_tile, W, C))

        # ---- conv2 (im2col matmul) + bn2 + residual + relu -> out ----
        for t in range(n_tiles):
            r0 = t * row_tile
            patch = _im2col(mid_ref, r0)                          # (M, 9C) bf16
            acc = jnp.dot(patch, w2,
                          preferred_element_type=jnp.float32)     # (M, C) f32
            resid = x_ref[r0:r0 + row_tile, :, :].reshape(M, C)   # f32 identity
            out2 = jnp.maximum(acc * s2 + b2 + resid, 0.0)
            o_ref[r0:r0 + row_tile, :, :] = (
                out2.reshape(row_tile, W, C).astype(o_ref.dtype))

    return kernel


def fold_bn(gamma, beta, mean, var, eps=1e-5):
    scale = gamma / jnp.sqrt(var + eps)
    bias = beta - mean * scale
    return scale, bias


def _im2col_weight(w_hwio):
    """(3, 3, Cin, Cout) HWIO -> (9*Cin, Cout) bf16, row order = (dy, dx, cin)."""
    k, _, cin, cout = w_hwio.shape
    return w_hwio.reshape(k * k * cin, cout).astype(jnp.bfloat16)


def basic_block_forward(x_nchw, params):
    """BasicBlock forward (num_layers<=34, expansion=1, stride=1, no downsample)."""
    N, C, H, W = x_nchw.shape
    x = jnp.transpose(x_nchw, (0, 2, 3, 1)).astype(jnp.float32)   # NCHW -> NHWC

    s1, b1 = fold_bn(*params["bn1"])
    s2, b2 = fold_bn(*params["bn2"])
    w1 = _im2col_weight(params["w1"])
    w2 = _im2col_weight(params["w2"])
    s1 = s1.reshape(1, C).astype(jnp.float32)
    b1 = b1.reshape(1, C).astype(jnp.float32)
    s2 = s2.reshape(1, C).astype(jnp.float32)
    b2 = b2.reshape(1, C).astype(jnp.float32)

    row_tile = _choose_row_tile(H, W, C)
    kernel = _make_basic_block_kernel(H, W, C, row_tile)

    grid_spec = pltpu.PrefetchScalarGridSpec(
        num_scalar_prefetch=0,
        grid=(N,),
        in_specs=[
            pl.BlockSpec((pl.Squeezed(), H, W, C), lambda n: (n, 0, 0, 0)),
            pl.BlockSpec((9 * C, C), lambda n: (0, 0)),
            pl.BlockSpec((1, C), lambda n: (0, 0)),
            pl.BlockSpec((1, C), lambda n: (0, 0)),
            pl.BlockSpec((9 * C, C), lambda n: (0, 0)),
            pl.BlockSpec((1, C), lambda n: (0, 0)),
            pl.BlockSpec((1, C), lambda n: (0, 0)),
        ],
        out_specs=pl.BlockSpec((pl.Squeezed(), H, W, C),
                               lambda n: (n, 0, 0, 0)),
        scratch_shapes=[
            pltpu.VMEM((H + 2, W + 2, C), jnp.float32),   # padded conv1 input
            pltpu.VMEM((H + 2, W + 2, C), jnp.float32),   # padded conv1 output
        ],
    )

    out = pl.pallas_call(
        kernel,
        out_shape=jax.ShapeDtypeStruct((N, H, W, C), jnp.float32),
        grid_spec=grid_spec,
        compiler_params=pltpu.CompilerParams(
            dimension_semantics=("parallel",)),
    )(x, w1, s1, b1, w2, s2, b2)

    return jnp.transpose(out, (0, 3, 1, 2))   # NHWC -> NCHW


# ----------------------- reference (plain JAX, same bf16 quantization) -----------------------
def _ref_forward(x_nchw, params, w1_oihw, w2_oihw):
    s1, b1 = fold_bn(*params["bn1"])
    s2, b2 = fold_bn(*params["bn2"])

    def conv(x, w):
        return lax.conv_general_dilated(
            x.astype(jnp.bfloat16), w.astype(jnp.bfloat16),
            window_strides=(1, 1), padding=((1, 1), (1, 1)),
            dimension_numbers=("NCHW", "OIHW", "NCHW"),
            preferred_element_type=jnp.float32)

    out = conv(x_nchw, w1_oihw)
    out = out * s1[None, :, None, None] + b1[None, :, None, None]
    out = jnp.maximum(out, 0.0)
    out = conv(out, w2_oihw)
    out = out * s2[None, :, None, None] + b2[None, :, None, None]
    out = out + x_nchw
    return jnp.maximum(out, 0.0)


if __name__ == "__main__":
    key = jax.random.PRNGKey(0)
    (kx, kw1, kw2, kg1, kb1, km1, kv1, kg2, kb2, km2, kv2) = jax.random.split(key, 11)

    N, C, H, W = 2, 8, 16, 16   # in_channels == out_channels (downsample=None)
    x = jax.random.normal(kx, (N, C, H, W), jnp.float32)

    # conv weights in PyTorch OIHW layout; kernel consumes HWIO -> (9*Cin, Cout)
    w1_oihw = 0.1 * jax.random.normal(kw1, (C, C, 3, 3), jnp.float32)
    w2_oihw = 0.1 * jax.random.normal(kw2, (C, C, 3, 3), jnp.float32)

    params = {
        "w1": jnp.transpose(w1_oihw, (2, 3, 1, 0)),
        "w2": jnp.transpose(w2_oihw, (2, 3, 1, 0)),
        "bn1": (
            1.0 + 0.1 * jax.random.normal(kg1, (C,), jnp.float32),            # gamma
            0.1 * jax.random.normal(kb1, (C,), jnp.float32),                  # beta
            0.1 * jax.random.normal(km1, (C,), jnp.float32),                  # running_mean
            1.0 + 0.1 * jnp.abs(jax.random.normal(kv1, (C,), jnp.float32)),   # running_var
        ),
        "bn2": (
            1.0 + 0.1 * jax.random.normal(kg2, (C,), jnp.float32),
            0.1 * jax.random.normal(kb2, (C,), jnp.float32),
            0.1 * jax.random.normal(km2, (C,), jnp.float32),
            1.0 + 0.1 * jnp.abs(jax.random.normal(kv2, (C,), jnp.float32)),
        ),
    }

    out = jax.block_until_ready(basic_block_forward(x, params))
    ref = jax.block_until_ready(_ref_forward(x, params, w1_oihw, w2_oihw))

    assert out.shape == (N, C, H, W), out.shape
    max_err = float(jnp.max(jnp.abs(out - ref)))
    assert jnp.allclose(out, ref, atol=1e-2, rtol=1e-2), max_err

    print("KERNEL_OK")
</pallas_src>

<mosaic_0001>
module attributes {stable_mosaic.version = 11 : i64} {
  func.func @kernel(%arg0: i32, %arg1: memref<1x16x16x8xf32, #tpu.memory_space<vmem>>, %arg2: memref<72x8xbf16, #tpu.memory_space<vmem>>, %arg3: memref<1x8xf32, #tpu.memory_space<vmem>>, %arg4: memref<1x8xf32, #tpu.memory_space<vmem>>, %arg5: memref<72x8xbf16, #tpu.memory_space<vmem>>, %arg6: memref<1x8xf32, #tpu.memory_space<vmem>>, %arg7: memref<1x8xf32, #tpu.memory_space<vmem>>, %arg8: memref<1x16x16x8xf32, #tpu.memory_space<vmem>>, %arg9: memref<18x18x8xf32, #tpu.memory_space<vmem>>, %arg10: memref<18x18x8xf32, #tpu.memory_space<vmem>>) attributes {dimension_semantics = [#tpu.dimension_semantics<parallel>], iteration_bounds = array<i64: 2>, scalar_prefetch = 0 : i64, scratch_operands = 2 : i64, tpu.core_type = #tpu.core_type<tc>, window_params = [{transform_indices = @transform_0, window_bounds = array<i64: 1, 16, 16, 8>}, {pipeline_mode = #tpu.pipeline_mode<synchronous>, transform_indices = @transform_1, window_bounds = array<i64: 72, 8>}, {pipeline_mode = #tpu.pipeline_mode<synchronous>, transform_indices = @transform_2, window_bounds = array<i64: 1, 8>}, {pipeline_mode = #tpu.pipeline_mode<synchronous>, transform_indices = @transform_3, window_bounds = array<i64: 1, 8>}, {pipeline_mode = #tpu.pipeline_mode<synchronous>, transform_indices = @transform_4, window_bounds = array<i64: 72, 8>}, {pipeline_mode = #tpu.pipeline_mode<synchronous>, transform_indices = @transform_5, window_bounds = array<i64: 1, 8>}, {pipeline_mode = #tpu.pipeline_mode<synchronous>, transform_indices = @transform_6, window_bounds = array<i64: 1, 8>}, {transform_indices = @transform_7, window_bounds = array<i64: 1, 16, 16, 8>}]} {
    %cst = arith.constant 0.000000e+00 : f32
    %0 = vector.broadcast %cst : f32 to vector<1x18x8xf32>
    %cst_0 = arith.constant 0.000000e+00 : f32
    %1 = vector.broadcast %cst_0 : f32 to vector<18x1x8xf32>
    %c0 = arith.constant 0 : index
    %c0_1 = arith.constant 0 : index
    %c0_2 = arith.constant 0 : index
    %2 = vector.load %arg9[%c0, %c0_1, %c0_2] : memref<18x18x8xf32, #tpu.memory_space<vmem>>, vector<1x18x8xf32>
    tpu.vector_store %arg9[%c0, %c0_1, %c0_2], %0 {strides = array<i32>} : memref<18x18x8xf32, #tpu.memory_space<vmem>>, vector<1x18x8xf32>,
    %c17 = arith.constant 17 : index
    %c0_3 = arith.constant 0 : index
    %c0_4 = arith.constant 0 : index
    %3 = vector.load %arg9[%c17, %c0_3, %c0_4] : memref<18x18x8xf32, #tpu.memory_space<vmem>>, vector<1x18x8xf32>
    tpu.vector_store %arg9[%c17, %c0_3, %c0_4], %0 {strides = array<i32>} : memref<18x18x8xf32, #tpu.memory_space<vmem>>, vector<1x18x8xf32>,
    %c0_5 = arith.constant 0 : index
    %c0_6 = arith.constant 0 : index
    %c0_7 = arith.constant 0 : index
    %4 = vector.load %arg9[%c0_5, %c0_6, %c0_7] : memref<18x18x8xf32, #tpu.memory_space<vmem>>, vector<18x1x8xf32>
    tpu.vector_store %arg9[%c0_5, %c0_6, %c0_7], %1 {strides = array<i32>} : memref<18x18x8xf32, #tpu.memory_space<vmem>>, vector<18x1x8xf32>,
    %c0_8 = arith.constant 0 : index
    %c17_9 = arith.constant 17 : index
    %c0_10 = arith.constant 0 : index
    %5 = vector.load %arg9[%c0_8, %c17_9, %c0_10] : memref<18x18x8xf32, #tpu.memory_space<vmem>>, vector<18x1x8xf32>
    tpu.vector_store %arg9[%c0_8, %c17_9, %c0_10], %1 {strides = array<i32>} : memref<18x18x8xf32, #tpu.memory_space<vmem>>, vector<18x1x8xf32>,
    %cst_11 = arith.constant 0.000000e+00 : f32
    %6 = vector.broadcast %cst_11 : f32 to vector<1x18x8xf32>
    %cst_12 = arith.constant 0.000000e+00 : f32
    %7 = vector.broadcast %cst_12 : f32 to vector<18x1x8xf32>
    %c0_13 = arith.constant 0 : index
    %c0_14 = arith.constant 0 : index
    %c0_15 = arith.constant 0 : index
    %8 = vector.load %arg10[%c0_13, %c0_14, %c0_15] : memref<18x18x8xf32, #tpu.memory_space<vmem>>, vector<1x18x8xf32>
    tpu.vector_store %arg10[%c0_13, %c0_14, %c0_15], %6 {strides = array<i32>} : memref<18x18x8xf32, #tpu.memory_space<vmem>>, vector<1x18x8xf32>,
    %c17_16 = arith.constant 17 : index
    %c0_17 = arith.constant 0 : index
    %c0_18 = arith.constant 0 : index
    %9 = vector.load %arg10[%c17_16, %c0_17, %c0_18] : memref<18x18x8xf32, #tpu.memory_space<vmem>>, vector<1x18x8xf32>
    tpu.vector_store %arg10[%c17_16, %c0_17, %c0_18], %6 {strides = array<i32>} : memref<18x18x8xf32, #tpu.memory_space<vmem>>, vector<1x18x8xf32>,
    %c0_19 = arith.constant 0 : index
    %c0_20 = arith.constant 0 : index
    %c0_21 = arith.constant 0 : index
    %10 = vector.load %arg10[%c0_19, %c0_20, %c0_21] : memref<18x18x8xf32, #tpu.memory_space<vmem>>, vector<18x1x8xf32>
    tpu.vector_store %arg10[%c0_19, %c0_20, %c0_21], %7 {strides = array<i32>} : memref<18x18x8xf32, #tpu.memory_space<vmem>>, vector<18x1x8xf32>,
    %c0_22 = arith.constant 0 : index
    %c17_23 = arith.constant 17 : index
    %c0_24 = arith.constant 0 : index
    %11 = vector.load %arg10[%c0_22, %c17_23, %c0_24] : memref<18x18x8xf32, #tpu.memory_space<vmem>>, vector<18x1x8xf32>
    tpu.vector_store %arg10[%c0_22, %c17_23, %c0_24], %7 {strides = array<i32>} : memref<18x18x8xf32, #tpu.memory_space<vmem>>, vector<18x1x8xf32>,
    %c0_25 = arith.constant 0 : index
    %c0_26 = arith.constant 0 : index
    %c0_27 = arith.constant 0 : index
    %c0_28 = arith.constant 0 : index
    %12 = vector.load %arg1[%c0_25, %c0_26, %c0_27, %c0_28] : memref<1x16x16x8xf32, #tpu.memory_space<vmem>>, vector<1x16x16x8xf32>
    %13 = vector.shape_cast %12 : vector<1x16x16x8xf32> to vector<16x16x8xf32>
    %c1 = arith.constant 1 : index
    %c1_29 = arith.constant 1 : index
    %c0_30 = arith.constant 0 : index
    %14 = vector.load %arg9[%c1, %c1_29, %c0_30] : memref<18x18x8xf32, #tpu.memory_space<vmem>>, vector<16x16x8xf32>
    tpu.vector_store %arg9[%c1, %c1_29, %c0_30], %13 {strides = array<i32>} : memref<18x18x8xf32, #tpu.memory_space<vmem>>, vector<16x16x8xf32>,
    %c0_31 = arith.constant 0 : index
    %c0_32 = arith.constant 0 : index
    %15 = vector.load %arg3[%c0_31, %c0_32] : memref<1x8xf32, #tpu.memory_space<vmem>>, vector<1x8xf32>
    %c0_33 = arith.constant 0 : index
    %c0_34 = arith.constant 0 : index
    %16 = vector.load %arg4[%c0_33, %c0_34] : memref<1x8xf32, #tpu.memory_space<vmem>>, vector<1x8xf32>
    %c0_35 = arith.constant 0 : index
    %c0_36 = arith.constant 0 : index
    %17 = vector.load %arg6[%c0_35, %c0_36] : memref<1x8xf32, #tpu.memory_space<vmem>>, vector<1x8xf32>
    %c0_37 = arith.constant 0 : index
    %c0_38 = arith.constant 0 : index
    %18 = vector.load %arg7[%c0_37, %c0_38] : memref<1x8xf32, #tpu.memory_space<vmem>>, vector<1x8xf32>
    %c0_39 = arith.constant 0 : index
    %c0_40 = arith.constant 0 : index
    %19 = vector.load %arg2[%c0_39, %c0_40] : memref<72x8xbf16, #tpu.memory_space<vmem>>, vector<72x8xbf16>
    %c0_41 = arith.constant 0 : index
    %c0_42 = arith.constant 0 : index
    %20 = vector.load %arg5[%c0_41, %c0_42] : memref<72x8xbf16, #tpu.memory_space<vmem>>, vector<72x8xbf16>
    %c0_43 = arith.constant 0 : index
    %c0_44 = arith.constant 0 : index
    %c0_45 = arith.constant 0 : index
    %21 = vector.load %arg9[%c0_43, %c0_44, %c0_45] : memref<18x18x8xf32, #tpu.memory_space<vmem>>, vector<16x16x8xf32>
    %22 = arith.truncf %21 : vector<16x16x8xf32> to vector<16x16x8xbf16>
    %23 = vector.shape_cast %22 : vector<16x16x8xbf16> to vector<256x8xbf16>
    %c0_46 = arith.constant 0 : index
    %c1_47 = arith.constant 1 : index
    %c0_48 = arith.constant 0 : index
    %24 = vector.load %arg9[%c0_46, %c1_47, %c0_48] : memref<18x18x8xf32, #tpu.memory_space<vmem>>, vector<16x16x8xf32>
    %25 = arith.truncf %24 : vector<16x16x8xf32> to vector<16x16x8xbf16>
    %26 = vector.shape_cast %25 : vector<16x16x8xbf16> to vector<256x8xbf16>
    %c0_49 = arith.constant 0 : index
    %c2 = arith.constant 2 : index
    %c0_50 = arith.constant 0 : index
    %27 = vector.load %arg9[%c0_49, %c2, %c0_50] : memref<18x18x8xf32, #tpu.memory_space<vmem>>, vector<16x16x8xf32>
    %28 = arith.truncf %27 : vector<16x16x8xf32> to vector<16x16x8xbf16>
    %29 = vector.shape_cast %28 : vector<16x16x8xbf16> to vector<256x8xbf16>
    %c1_51 = arith.constant 1 : index
    %c0_52 = arith.constant 0 : index
    %c0_53 = arith.constant 0 : index
    %30 = vector.load %arg9[%c1_51, %c0_52, %c0_53] : memref<18x18x8xf32, #tpu.memory_space<vmem>>, vector<16x16x8xf32>
    %31 = arith.truncf %30 : vector<16x16x8xf32> to vector<16x16x8xbf16>
    %32 = vector.shape_cast %31 : vector<16x16x8xbf16> to vector<256x8xbf16>
    %c1_54 = arith.constant 1 : index
    %c1_55 = arith.constant 1 : index
    %c0_56 = arith.constant 0 : index
    %33 = vector.load %arg9[%c1_54, %c1_55, %c0_56] : memref<18x18x8xf32, #tpu.memory_space<vmem>>, vector<16x16x8xf32>
    %34 = arith.truncf %33 : vector<16x16x8xf32> to vector<16x16x8xbf16>
    %35 = vector.shape_cast %34 : vector<16x16x8xbf16> to vector<256x8xbf16>
    %c1_57 = arith.constant 1 : index
    %c2_58 = arith.constant 2 : index
    %c0_59 = arith.constant 0 : index
    %36 = vector.load %arg9[%c1_57, %c2_58, %c0_59] : memref<18x18x8xf32, #tpu.memory_space<vmem>>, vector<16x16x8xf32>
    %37 = arith.truncf %36 : vector<16x16x8xf32> to vector<16x16x8xbf16>
    %38 = vector.shape_cast %37 : vector<16x16x8xbf16> to vector<256x8xbf16>
    %c2_60 = arith.constant 2 : index
    %c0_61 = arith.constant 0 : index
    %c0_62 = arith.constant 0 : index
    %39 = vector.load %arg9[%c2_60, %c0_61, %c0_62] : memref<18x18x8xf32, #tpu.memory_space<vmem>>, vector<16x16x8xf32>
    %40 = arith.truncf %39 : vector<16x16x8xf32> to vector<16x16x8xbf16>
    %41 = vector.shape_cast %40 : vector<16x16x8xbf16> to vector<256x8xbf16>
    %c2_63 = arith.constant 2 : index
    %c1_64 = arith.constant 1 : index
    %c0_65 = arith.constant 0 : index
    %42 = vector.load %arg9[%c2_63, %c1_64, %c0_65] : memref<18x18x8xf32, #tpu.memory_space<vmem>>, vector<16x16x8xf32>
    %43 = arith.truncf %42 : vector<16x16x8xf32> to vector<16x16x8xbf16>
    %44 = vector.shape_cast %43 : vector<16x16x8xbf16> to vector<256x8xbf16>
    %c2_66 = arith.constant 2 : index
    %c2_67 = arith.constant 2 : index
    %c0_68 = arith.constant 0 : index
    %45 = vector.load %arg9[%c2_66, %c2_67, %c0_68] : memref<18x18x8xf32, #tpu.memory_space<vmem>>, vector<16x16x8xf32>
    %46 = arith.truncf %45 : vector<16x16x8xf32> to vector<16x16x8xbf16>
    %47 = vector.shape_cast %46 : vector<16x16x8xbf16> to vector<256x8xbf16>
    %48 = tpu.concatenate %23, %26, %29, %32, %35, %38, %41, %44, %47 in 1 : vector<256x8xbf16>, vector<256x8xbf16>, vector<256x8xbf16>, vector<256x8xbf16>, vector<256x8xbf16>, vector<256x8xbf16>, vector<256x8xbf16>, vector<256x8xbf16>, vector<256x8xbf16> -> vector<256x72xbf16>
    %cst_69 = arith.constant dense<0.000000e+00> : vector<256x8xf32>
    %49 = tpu.matmul %48, %19, %cst_69 {dimension_numbers = #tpu.dot_dimension_numbers<[1], [0], [0], [1], [0, 0, 1, 1], [], []>} : vector<256x72xbf16>, vector<72x8xbf16>, vector<256x8xf32> -> vector<256x8xf32>
    %50 = vector.broadcast %15 : vector<1x8xf32> to vector<256x8xf32>
    %51 = arith.mulf %49, %50 : vector<256x8xf32>
    %52 = vector.broadcast %16 : vector<1x8xf32> to vector<256x8xf32>
    %53 = arith.addf %51, %52 : vector<256x8xf32>
    %cst_70 = arith.constant 0.000000e+00 : f32
    %54 = vector.broadcast %cst_70 : f32 to vector<256x8xf32>
    %55 = arith.maximumf %53, %54 : vector<256x8xf32>
    %56 = vector.shape_cast %55 : vector<256x8xf32> to vector<16x16x8xf32>
    %c1_71 = arith.constant 1 : index
    %c1_72 = arith.constant 1 : index
    %c0_73 = arith.constant 0 : index
    %57 = vector.load %arg10[%c1_71, %c1_72, %c0_73] : memref<18x18x8xf32, #tpu.memory_space<vmem>>, vector<16x16x8xf32>
    tpu.vector_store %arg10[%c1_71, %c1_72, %c0_73], %56 {strides = array<i32>} : memref<18x18x8xf32, #tpu.memory_space<vmem>>, vector<16x16x8xf32>,
    %c0_74 = arith.constant 0 : index
    %c0_75 = arith.constant 0 : index
    %c0_76 = arith.constant 0 : index
    %58 = vector.load %arg10[%c0_74, %c0_75, %c0_76] : memref<18x18x8xf32, #tpu.memory_space<vmem>>, vector<16x16x8xf32>
    %59 = arith.truncf %58 : vector<16x16x8xf32> to vector<16x16x8xbf16>
    %60 = vector.shape_cast %59 : vector<16x16x8xbf16> to vector<256x8xbf16>
    %c0_77 = arith.constant 0 : index
    %c1_78 = arith.constant 1 : index
    %c0_79 = arith.constant 0 : index
    %61 = vector.load %arg10[%c0_77, %c1_78, %c0_79] : memref<18x18x8xf32, #tpu.memory_space<vmem>>, vector<16x16x8xf32>
    %62 = arith.truncf %61 : vector<16x16x8xf32> to vector<16x16x8xbf16>
    %63 = vector.shape_cast %62 : vector<16x16x8xbf16> to vector<256x8xbf16>
    %c0_80 = arith.constant 0 : index
    %c2_81 = arith.constant 2 : index
    %c0_82 = arith.constant 0 : index
    %64 = vector.load %arg10[%c0_80, %c2_81, %c0_82] : memref<18x18x8xf32, #tpu.memory_space<vmem>>, vector<16x16x8xf32>
    %65 = arith.truncf %64 : vector<16x16x8xf32> to vector<16x16x8xbf16>
    %66 = vector.shape_cast %65 : vector<16x16x8xbf16> to vector<256x8xbf16>
    %c1_83 = arith.constant 1 : index
    %c0_84 = arith.constant 0 : index
    %c0_85 = arith.constant 0 : index
    %67 = vector.load %arg10[%c1_83, %c0_84, %c0_85] : memref<18x18x8xf32, #tpu.memory_space<vmem>>, vector<16x16x8xf32>
    %68 = arith.truncf %67 : vector<16x16x8xf32> to vector<16x16x8xbf16>
    %69 = vector.shape_cast %68 : vector<16x16x8xbf16> to vector<256x8xbf16>
    %c1_86 = arith.constant 1 : index
    %c1_87 = arith.constant 1 : index
    %c0_88 = arith.constant 0 : index
    %70 = vector.load %arg10[%c1_86, %c1_87, %c0_88] : memref<18x18x8xf32, #tpu.memory_space<vmem>>, vector<16x16x8xf32>
    %71 = arith.truncf %70 : vector<16x16x8xf32> to vector<16x16x8xbf16>
    %72 = vector.shape_cast %71 : vector<16x16x8xbf16> to vector<256x8xbf16>
    %c1_89 = arith.constant 1 : index
    %c2_90 = arith.constant 2 : index
    %c0_91 = arith.constant 0 : index
    %73 = vector.load %arg10[%c1_89, %c2_90, %c0_91] : memref<18x18x8xf32, #tpu.memory_space<vmem>>, vector<16x16x8xf32>
    %74 = arith.truncf %73 : vector<16x16x8xf32> to vector<16x16x8xbf16>
    %75 = vector.shape_cast %74 : vector<16x16x8xbf16> to vector<256x8xbf16>
    %c2_92 = arith.constant 2 : index
    %c0_93 = arith.constant 0 : index
    %c0_94 = arith.constant 0 : index
    %76 = vector.load %arg10[%c2_92, %c0_93, %c0_94] : memref<18x18x8xf32, #tpu.memory_space<vmem>>, vector<16x16x8xf32>
    %77 = arith.truncf %76 : vector<16x16x8xf32> to vector<16x16x8xbf16>
    %78 = vector.shape_cast %77 : vector<16x16x8xbf16> to vector<256x8xbf16>
    %c2_95 = arith.constant 2 : index
    %c1_96 = arith.constant 1 : index
    %c0_97 = arith.constant 0 : index
    %79 = vector.load %arg10[%c2_95, %c1_96, %c0_97] : memref<18x18x8xf32, #tpu.memory_space<vmem>>, vector<16x16x8xf32>
    %80 = arith.truncf %79 : vector<16x16x8xf32> to vector<16x16x8xbf16>
    %81 = vector.shape_cast %80 : vector<16x16x8xbf16> to vector<256x8xbf16>
    %c2_98 = arith.constant 2 : index
    %c2_99 = arith.constant 2 : index
    %c0_100 = arith.constant 0 : index
    %82 = vector.load %arg10[%c2_98, %c2_99, %c0_100] : memref<18x18x8xf32, #tpu.memory_space<vmem>>, vector<16x16x8xf32>
    %83 = arith.truncf %82 : vector<16x16x8xf32> to vector<16x16x8xbf16>
    %84 = vector.shape_cast %83 : vector<16x16x8xbf16> to vector<256x8xbf16>
    %85 = tpu.concatenate %60, %63, %66, %69, %72, %75, %78, %81, %84 in 1 : vector<256x8xbf16>, vector<256x8xbf16>, vector<256x8xbf16>, vector<256x8xbf16>, vector<256x8xbf16>, vector<256x8xbf16>, vector<256x8xbf16>, vector<256x8xbf16>, vector<256x8xbf16> -> vector<256x72xbf16>
    %cst_101 = arith.constant dense<0.000000e+00> : vector<256x8xf32>
    %86 = tpu.matmul %85, %20, %cst_101 {dimension_numbers = #tpu.dot_dimension_numbers<[1], [0], [0], [1], [0, 0, 1, 1], [], []>} : vector<256x72xbf16>, vector<72x8xbf16>, vector<256x8xf32> -> vector<256x8xf32>
    %c0_102 = arith.constant 0 : index
    %c0_103 = arith.constant 0 : index
    %c0_104 = arith.constant 0 : index
    %c0_105 = arith.constant 0 : index
    %87 = vector.load %arg1[%c0_102, %c0_103, %c0_104, %c0_105] : memref<1x16x16x8xf32, #tpu.memory_space<vmem>>, vector<1x16x16x8xf32>
    %88 = vector.shape_cast %87 : vector<1x16x16x8xf32> to vector<16x16x8xf32>
    %89 = vector.shape_cast %88 : vector<16x16x8xf32> to vector<256x8xf32>
    %90 = vector.broadcast %17 : vector<1x8xf32> to vector<256x8xf32>
    %91 = arith.mulf %86, %90 : vector<256x8xf32>
    %92 = vector.broadcast %18 : vector<1x8xf32> to vector<256x8xf32>
    %93 = arith.addf %91, %92 : vector<256x8xf32>
    %94 = arith.addf %93, %89 : vector<256x8xf32>
    %cst_106 = arith.constant 0.000000e+00 : f32
    %95 = vector.broadcast %cst_106 : f32 to vector<256x8xf32>
    %96 = arith.maximumf %94, %95 : vector<256x8xf32>
    %97 = vector.shape_cast %96 : vector<256x8xf32> to vector<16x16x8xf32>
    %c0_107 = arith.constant 0 : index
    %c0_108 = arith.constant 0 : index
    %c0_109 = arith.constant 0 : index
    %c0_110 = arith.constant 0 : index
    %98 = vector.load %arg8[%c0_107, %c0_108, %c0_109, %c0_110] : memref<1x16x16x8xf32, #tpu.memory_space<vmem>>, vector<1x16x16x8xf32>
    %99 = vector.shape_cast %98 : vector<1x16x16x8xf32> to vector<16x16x8xf32>
    %100 = vector.shape_cast %97 : vector<16x16x8xf32> to vector<1x16x16x8xf32>
    tpu.vector_store %arg8[%c0_107, %c0_108, %c0_109, %c0_110], %100 {strides = array<i32>} : memref<1x16x16x8xf32, #tpu.memory_space<vmem>>, vector<1x16x16x8xf32>,
    return
  }
  func.func @transform_0(%arg0: i32) -> (i32, i32, i32, i32) {
    %c0_i32 = arith.constant 0 : i32
    %c0_i32_0 = arith.constant 0 : i32
    %c0_i32_1 = arith.constant 0 : i32
    %c0_i32_2 = arith.constant 0 : i32
    return %arg0, %c0_i32, %c0_i32_0, %c0_i32_1 : i32, i32, i32, i32
  }
  func.func @transform_1(%arg0: i32) -> (i32, i32) {
    %c0_i32 = arith.constant 0 : i32
    %c0_i32_0 = arith.constant 0 : i32
    %c0_i32_1 = arith.constant 0 : i32
    return %c0_i32, %c0_i32_0 : i32, i32
  }
  func.func @transform_2(%arg0: i32) -> (i32, i32) {
    %c0_i32 = arith.constant 0 : i32
    %c0_i32_0 = arith.constant 0 : i32
    %c0_i32_1 = arith.constant 0 : i32
    return %c0_i32, %c0_i32_0 : i32, i32
  }
  func.func @transform_3(%arg0: i32) -> (i32, i32) {
    %c0_i32 = arith.constant 0 : i32
    %c0_i32_0 = arith.constant 0 : i32
    %c0_i32_1 = arith.constant 0 : i32
    return %c0_i32, %c0_i32_0 : i32, i32
  }
  func.func @transform_4(%arg0: i32) -> (i32, i32) {
    %c0_i32 = arith.constant 0 : i32
    %c0_i32_0 = arith.constant 0 : i32
    %c0_i32_1 = arith.constant 0 : i32
    return %c0_i32, %c0_i32_0 : i32, i32
  }
  func.func @transform_5(%arg0: i32) -> (i32, i32) {
    %c0_i32 = arith.constant 0 : i32
    %c0_i32_0 = arith.constant 0 : i32
    %c0_i32_1 = arith.constant 0 : i32
    return %c0_i32, %c0_i32_0 : i32, i32
  }
  func.func @transform_6(%arg0: i32) -> (i32, i32) {
    %c0_i32 = arith.constant 0 : i32
    %c0_i32_0 = arith.constant 0 : i32
    %c0_i32_1 = arith.constant 0 : i32
    return %c0_i32, %c0_i32_0 : i32, i32
  }
  func.func @transform_7(%arg0: i32) -> (i32, i32, i32, i32) {
    %c0_i32 = arith.constant 0 : i32
    %c0_i32_0 = arith.constant 0 : i32
    %c0_i32_1 = arith.constant 0 : i32
    %c0_i32_2 = arith.constant 0 : i32
    return %arg0, %c0_i32, %c0_i32_0, %c0_i32_1 : i32, i32, i32, i32
  }
}

</mosaic_0001>

<bundles_post_ra>
// kernel: tpu_custom_call.1
= control target key start
LH: loop header
LB: loop body
LE: loop exit
PB: predicated region body
PF: predicated region fallthrough
CT: control target
= control target key end

     0   :  { %s3762_s24 = smov 0   ;;  %s5107_s0 = inlined_call_operand.vmem [shape: f32[2,16,16,8], index: 0, kind: input, shape index: {}]   ;;  %s5108_s1 = inlined_call_operand.vmem [shape: bf16[72,8], index: 1, kind: input, shape index: {}]   ;;  %s5109_s2 = inlined_call_operand.vmem [shape: f32[1,8], index: 2, kind: input, shape index: {}]   ;;  %s5110_s3 = inlined_call_operand.vmem [shape: f32[1,8], index: 3, kind: input, shape index: {}]   ;;  %s5111_s4 = inlined_call_operand.vmem [shape: bf16[72,8], index: 4, kind: input, shape index: {}]   ;;  %s5112_s5 = inlined_call_operand.vmem [shape: f32[1,8], index: 5, kind: input, shape index: {}]   ;;  %s5113_s6 = inlined_call_operand.vmem [shape: f32[1,8], index: 6, kind: input, shape index: {}]   ;;  %s5114_s7 = inlined_call_operand.vmem [shape: f32[2,16,16,8], index: 7, kind: output, shape index: {}]  }
   0x1 LB: > { %s3489_s25 = sadd.s32 4294967295, %s3711_s24   ;;  %p3493_p0 = scmp.ge.s32.totalorder %s3711_s24, 1  ;;  %s3711_s24 = sphi %s3762_s24, %s17_s24  }
   0x2   : > { %p237_p1 = scmp.lt.s32.totalorder %s3711_s24, 3 }
   0x4   : > { %p238_p2 = pnand %p3493_p0, %p237_p1 }
   0x5   : > { %p269_p3 = scmp.lt.s32.totalorder (!%p238_p2), %s3489_s25, 1  ;;  %s3714_s30 = smov (!%p238_p2), 8  }
   0x6   : > { %241 = sbr.rel (%p238_p2) target bundleno = 1013 (0x3f5), region = 48  ;;  %s3715_s8 = smov (!%p238_p2), 16  }
   0x7   : > { %s3716_s9 = smov (!%p238_p2), 24   ;;  %s3717_s10 = smov (!%p238_p2), 32  }
   0x8   : > { %s3718_s11 = smov (!%p238_p2), 40   ;;  %s3719_s16 = smov (!%p238_p2), 48  }
   0x9   : > { %s3720_s19 = smov (!%p238_p2), 56   ;;  %s3721_s22 = smov (!%p238_p2), 64  }
   0xb   : > { %vm280_vm0 = vcmask 64512   ;;  %vm283_vm1 = vcmask 58368   ;;  %vm289_vm2 = vcmask 57344   ;;  %v3713_v0 = vmov 0.0   ;;  %s5116_s25 = smov (!%p269_p3, %s3489_s25), 1  ;;  %v3694_v49 = vld [vmem:[%s5108_s1 + $0x18] sm:$0xff]  }
   0xc   : > { %281 = vst.msk [vmem:[#allocation2] sm:$0xff] %vm280_vm0, %v3713_v0  ;;  %282 = vst.msk [vmem:[#allocation2 + $0x8] sm:$0xff] %vm280_vm0, %v3713_v0  ;;  %s3546_s26 = sshll.u32 %s5116_s25, 8  ;;  %vm1612_vm3 = vcmask 1043456   ;;  %v3693_v48 = vld [vmem:[%s5108_s1 + $0x20] ss:$0 sps:$4 sm:$0xff]  }
   0xd   : > { %284 = vst.msk [vmem:[#allocation2 + $0x10] sm:$0x3] %vm283_vm1, %v3713_v0  ;;  %288 = vst.msk [vmem:[#allocation2 + $0x1a8] sm:$0x3] %vm283_vm1, %v3713_v0  ;;  %s3950_s29 = scalar_lea.vmem %s5107_s0, %s3546_s26  ;;  %3674 = vmatprep.subr.msk.bf16.mxu0 %vm1612_vm3, %v3693_v48  ;;  %v1614_v51 = vsel %vm1612_vm3, %v3693_v48, 0  ;;  %v3695_v54 = vld [vmem:[%s5108_s1 + $0x10] sm:$0xff]  }
   0xe   : > { %286 = vst.msk [vmem:[#allocation2 + $0x198] sm:$0xff] %vm280_vm0, %v3713_v0  ;;  %287 = vst.msk [vmem:[#allocation2 + $0x1a0] sm:$0xff] %vm280_vm0, %v3713_v0  ;;  %v369_v1 = vld [vmem:[%s3950_s29] sm:$0xff]  ;;  %v370_v2 = vld [vmem:[%s3950_s29 + $0x8] sm:$0xff]  ;;  %3591 = vmatpush3.bf16.msra.mxu0 %v1614_v51  ;;  %vm1321_vm4 = vcmask 130048   ;;  %vm1354_vm5 = vcmask 195584  }
   0xf   : > { %291 = vst.msk [vmem:[#allocation2 + $0x18] sm:$0x1] %vm289_vm2, %v3713_v0  ;;  %292 = vst.msk [vmem:[#allocation2 + $0x30] sm:$0x1] %vm289_vm2, %v3713_v0  ;;  %v371_v3 = vld [vmem:[%s3950_s29 + $0x10] sm:$0xff]  ;;  %v372_v9 = vld [vmem:[%s3950_s29 + $0x18] sm:$0xff]  ;;  %3592 = vmatprep.subr.bf16.mxu0 %v3694_v49 }
  0x10   : > { %293 = vst.msk [vmem:[#allocation2 + $0x48] sm:$0x1] %vm289_vm2, %v3713_v0  ;;  %294 = vst.msk [vmem:[#allocation2 + $0x60] sm:$0x1] %vm289_vm2, %v3713_v0  ;;  %v373_v10 = vld [vmem:[%s3950_s29 + $0x20] sm:$0xff]  ;;  %v374_v12 = vld [vmem:[%s3950_s29 + $0x28] sm:$0xff] }
  0x11   : > { %295 = vst.msk [vmem:[#allocation2 + $0x78] sm:$0x1] %vm289_vm2, %v3713_v0  ;;  %296 = vst.msk [vmem:[#allocation2 + $0x90] sm:$0x1] %vm289_vm2, %v3713_v0  ;;  %v375_v13 = vld [vmem:[%s3950_s29 + $0x30] sm:$0xff]  ;;  %v376_v14 = vld [vmem:[%s3950_s29 + $0x38] sm:$0xff] }
  0x12   : > { %297 = vst.msk [vmem:[#allocation2 + $0xa8] sm:$0x1] %vm289_vm2, %v3713_v0  ;;  %298 = vst.msk [vmem:[#allocation2 + $0xc0] sm:$0x1] %vm289_vm2, %v3713_v0  ;;  %v377_v15 = vld [vmem:[%s3950_s29 + $0x40] sm:$0xff]  ;;  %v378_v16 = vld [vmem:[%s3950_s29 + $0x48] sm:$0xff]  ;;  %3593 = vmatpush3.bf16.msra.mxu0 %v3694_v49 }
  0x13   : > { %299 = vst.msk [vmem:[#allocation2 + $0xd8] sm:$0x1] %vm289_vm2, %v3713_v0  ;;  %300 = vst.msk [vmem:[#allocation2 + $0xf0] sm:$0x1] %vm289_vm2, %v3713_v0  ;;  %v552_v4 = vld [vmem:[#allocation2 + $0x2] sm:$0xff]  ;;  %v379_v17 = vld [vmem:[%s3950_s29 + $0x50] sm:$0xff]  ;;  %3594 = vmatprep.subr.bf16.mxu0 %v3695_v54 }
  0x14   : > { %301 = vst.msk [vmem:[#allocation2 + $0x108] sm:$0x1] %vm289_vm2, %v3713_v0  ;;  %302 = vst.msk [vmem:[#allocation2 + $0x120] sm:$0x1] %vm289_vm2, %v3713_v0  ;;  %v504_v5 = vld [vmem:[#allocation2 + $0x1] sm:$0xff]  ;;  %v505_v6 = vld [vmem:[#allocation2 + $0x9] sm:$0xff] }
  0x15   : > { %303 = vst.msk [vmem:[#allocation2 + $0x138] sm:$0x1] %vm289_vm2, %v3713_v0  ;;  %304 = vst.msk [vmem:[#allocation2 + $0x150] sm:$0x1] %vm289_vm2, %v3713_v0  ;;  %v536_v8 = vpack.c.bf16 %v505_v6, %v504_v5  ;;  %v380_v18 = vld [vmem:[%s3950_s29 + $0x58] sm:$0xff]  ;;  %v381_v19 = vld [vmem:[%s3950_s29 + $0x60] sm:$0xff] }
  0x16   : > { %305 = vst.msk [vmem:[#allocation2 + $0x168] sm:$0x1] %vm289_vm2, %v3713_v0  ;;  %306 = vst.msk [vmem:[#allocation2 + $0x180] sm:$0x1] %vm289_vm2, %v3713_v0  ;;  %v382_v20 = vld [vmem:[%s3950_s29 + $0x68] sm:$0xff]  ;;  %v383_v21 = vld [vmem:[%s3950_s29 + $0x70] sm:$0xff]  ;;  %3595 = vmatpush3.bf16.msra.mxu0 %v3695_v54 }
  0x17   : > { %309 = vst.msk [vmem:[#allocation2 + $0x29] sm:$0x1] %vm289_vm2, %v3713_v0  ;;  %310 = vst.msk [vmem:[#allocation2 + $0x41] sm:$0x1] %vm289_vm2, %v3713_v0  ;;  %905 = vrot.lane.b32.xlu0 %v536_v8, %s3714_s30  ;;  %v384_v22 = vld [vmem:[%s3950_s29 + $0x78] sm:$0xff]  ;;  %v385_v23 = vld [vmem:[%s3950_s29 + $0x80] sm:$0xff] }
  0x18   : > { %311 = vst.msk [vmem:[#allocation2 + $0x59] sm:$0x1] %vm289_vm2, %v3713_v0  ;;  %312 = vst.msk [vmem:[#allocation2 + $0x71] sm:$0x1] %vm289_vm2, %v3713_v0  ;;  %v386_v24 = vld [vmem:[%s3950_s29 + $0x88] sm:$0xff]  ;;  %v387_v52 = vld [vmem:[%s3950_s29 + $0x90] sm:$0xff] }
  0x19   : > { %313 = vst.msk [vmem:[#allocation2 + $0x89] sm:$0x1] %vm289_vm2, %v3713_v0  ;;  %314 = vst.msk [vmem:[#allocation2 + $0xa1] sm:$0x1] %vm289_vm2, %v3713_v0  ;;  %v388_v53 = vld [vmem:[%s3950_s29 + $0x98] sm:$0xff]  ;;  %v389_v55 = vld [vmem:[%s3950_s29 + $0xa0] sm:$0xff] }
  0x1a   : > { %315 = vst.msk [vmem:[#allocation2 + $0xb9] sm:$0x1] %vm289_vm2, %v3713_v0  ;;  %316 = vst.msk [vmem:[#allocation2 + $0xd1] sm:$0x1] %vm289_vm2, %v3713_v0  ;;  %v390_v56 = vld [vmem:[%s3950_s29 + $0xa8] sm:$0xff]  ;;  %v3697_v61 = vld [vmem:[%s5108_s1] sm:$0xff]  }
  0x1b   : > { %317 = vst.msk [vmem:[#allocation2 + $0xe9] sm:$0x1] %vm289_vm2, %v3713_v0  ;;  %318 = vst.msk [vmem:[#allocation2 + $0x101] sm:$0x1] %vm289_vm2, %v3713_v0  ;;  %v3696_v59 = vld [vmem:[%s5108_s1 + $0x8] sm:$0xff]   ;;  %v391_v62 = vld [vmem:[%s3950_s29 + $0xb0] sm:$0xff] }
  0x1c   : > { %319 = vst.msk [vmem:[#allocation2 + $0x119] sm:$0x1] %vm289_vm2, %v3713_v0  ;;  %320 = vst.msk [vmem:[#allocation2 + $0x131] sm:$0x1] %vm289_vm2, %v3713_v0  ;;  %3596 = vmatprep.subr.bf16.mxu0 %v3696_v59  ;;  %v392_v63 = vld [vmem:[%s3950_s29 + $0xb8] sm:$0xff]  ;;  %v393_v8 = vld [vmem:[%s3950_s29 + $0xc0] sm:$0xff] }
  0x1d   : > { %321 = vst.msk [vmem:[#allocation2 + $0x149] sm:$0x1] %vm289_vm2, %v3713_v0  ;;  %322 = vst.msk [vmem:[#allocation2 + $0x161] sm:$0x1] %vm289_vm2, %v3713_v0  ;;  %3597 = vmatpush3.bf16.msra.mxu0 %v3696_v59  ;;  %vm1387_vm6 = vcmask 261120   ;;  %vm1420_vm7 = vcmask 326656  }
  0x1e   : > { %323 = vst.msk [vmem:[#allocation2 + $0x179] sm:$0x1] %vm289_vm2, %v3713_v0  ;;  %324 = vst.msk [vmem:[#allocation2 + $0x191] sm:$0x1] %vm289_vm2, %v3713_v0  ;;  %3598 = vmatprep.subr.bf16.mxu0 %v3697_v61  ;;  %vm1453_vm8 = vcmask 392192   ;;  %vm1486_vm9 = vcmask 457728  }
  0x1f   : > { %326 = vst.msk [vmem:[#allocation3] sm:$0xff] %vm280_vm0, %v3713_v0  ;;  %327 = vst.msk [vmem:[#allocation3 + $0x8] sm:$0xff] %vm280_vm0, %v3713_v0  ;;  %vm1519_vm10 = vcmask 523264   ;;  %vm1579_vm11 = vcmask 588800  }
  0x20   : > { %328 = vst.msk [vmem:[#allocation3 + $0x10] sm:$0x3] %vm283_vm1, %v3713_v0  ;;  %332 = vst.msk [vmem:[#allocation3 + $0x1a8] sm:$0x3] %vm283_vm1, %v3713_v0 }
  0x21   : > { %330 = vst.msk [vmem:[#allocation3 + $0x198] sm:$0xff] %vm280_vm0, %v3713_v0  ;;  %331 = vst.msk [vmem:[#allocation3 + $0x1a0] sm:$0xff] %vm280_vm0, %v3713_v0  ;;  %3599 = vmatpush3.bf16.msra.mxu0 %v3697_v61 }
  0x22   : > { %334 = vst.msk [vmem:[#allocation3 + $0x18] sm:$0x1] %vm289_vm2, %v3713_v0  ;;  %335 = vst.msk [vmem:[#allocation3 + $0x30] sm:$0x1] %vm289_vm2, %v3713_v0 }
  0x23   : > { %336 = vst.msk [vmem:[#allocation3 + $0x48] sm:$0x1] %vm289_vm2, %v3713_v0  ;;  %337 = vst.msk [vmem:[#allocation3 + $0x60] sm:$0x1] %vm289_vm2, %v3713_v0 }
  0x24   : > { %338 = vst.msk [vmem:[#allocation3 + $0x78] sm:$0x1] %vm289_vm2, %v3713_v0  ;;  %339 = vst.msk [vmem:[#allocation3 + $0x90] sm:$0x1] %vm289_vm2, %v3713_v0 }
  0x25   : > { %340 = vst.msk [vmem:[#allocation3 + $0xa8] sm:$0x1] %vm289_vm2, %v3713_v0  ;;  %341 = vst.msk [vmem:[#allocation3 + $0xc0] sm:$0x1] %vm289_vm2, %v3713_v0 }
  0x26   : > { %342 = vst.msk [vmem:[#allocation3 + $0xd8] sm:$0x1] %vm289_vm2, %v3713_v0  ;;  %343 = vst.msk [vmem:[#allocation3 + $0xf0] sm:$0x1] %vm289_vm2, %v3713_v0 }
  0x27   : > { %344 = vst.msk [vmem:[#allocation3 + $0x108] sm:$0x1] %vm289_vm2, %v3713_v0  ;;  %345 = vst.msk [vmem:[#allocation3 + $0x120] sm:$0x1] %vm289_vm2, %v3713_v0 }
  0x28   : > { %346 = vst.msk [vmem:[#allocation3 + $0x138] sm:$0x1] %vm289_vm2, %v3713_v0  ;;  %347 = vst.msk [vmem:[#allocation3 + $0x150] sm:$0x1] %vm289_vm2, %v3713_v0 }
  0x29   : > { %348 = vst.msk [vmem:[#allocation3 + $0x168] sm:$0x1] %vm289_vm2, %v3713_v0  ;;  %349 = vst.msk [vmem:[#allocation3 + $0x180] sm:$0x1] %vm289_vm2, %v3713_v0 }
  0x2a   : > { %352 = vst.msk [vmem:[#allocation3 + $0x29] sm:$0x1] %vm289_vm2, %v3713_v0  ;;  %353 = vst.msk [vmem:[#allocation3 + $0x41] sm:$0x1] %vm289_vm2, %v3713_v0 }
  0x2b   : > { %354 = vst.msk [vmem:[#allocation3 + $0x59] sm:$0x1] %vm289_vm2, %v3713_v0  ;;  %355 = vst.msk [vmem:[#allocation3 + $0x71] sm:$0x1] %vm289_vm2, %v3713_v0 }
  0x2c   : > { %356 = vst.msk [vmem:[#allocation3 + $0x89] sm:$0x1] %vm289_vm2, %v3713_v0  ;;  %357 = vst.msk [vmem:[#allocation3 + $0xa1] sm:$0x1] %vm289_vm2, %v3713_v0 }
  0x2d   : > { %358 = vst.msk [vmem:[#allocation3 + $0xb9] sm:$0x1] %vm289_vm2, %v3713_v0  ;;  %359 = vst.msk [vmem:[#allocation3 + $0xd1] sm:$0x1] %vm289_vm2, %v3713_v0 }
  0x2e   : > { %360 = vst.msk [vmem:[#allocation3 + $0xe9] sm:$0x1] %vm289_vm2, %v3713_v0  ;;  %361 = vst.msk [vmem:[#allocation3 + $0x101] sm:$0x1] %vm289_vm2, %v3713_v0 }
  0x2f   : > { %362 = vst.msk [vmem:[#allocation3 + $0x119] sm:$0x1] %vm289_vm2, %v3713_v0  ;;  %363 = vst.msk [vmem:[#allocation3 + $0x131] sm:$0x1] %vm289_vm2, %v3713_v0 }
  0x30   : > { %364 = vst.msk [vmem:[#allocation3 + $0x149] sm:$0x1] %vm289_vm2, %v3713_v0  ;;  %365 = vst.msk [vmem:[#allocation3 + $0x161] sm:$0x1] %vm289_vm2, %v3713_v0 }
  0x31   : > { %366 = vst.msk [vmem:[#allocation3 + $0x179] sm:$0x1] %vm289_vm2, %v3713_v0  ;;  %367 = vst.msk [vmem:[#allocation3 + $0x191] sm:$0x1] %vm289_vm2, %v3713_v0 }
  0x32   : > { %308 = vst.msk [vmem:[#allocation2 + $0x11] sm:$0x1] %vm289_vm2, %v3713_v0  ;;  %290 = vst.msk [vmem:[#allocation2] sm:$0x1] %vm289_vm2, %v3713_v0 }
  0x33   : > { %307 = vst.msk [vmem:[#allocation2 + $0x198] sm:$0x1] %vm289_vm2, %v3713_v0  ;;  %325 = vst.msk [vmem:[#allocation2 + $0x1a9] sm:$0x1] %vm289_vm2, %v3713_v0 }
  0x34   : > { %333 = vst.msk [vmem:[#allocation3] sm:$0x1] %vm289_vm2, %v3713_v0  ;;  %350 = vst.msk [vmem:[#allocation3 + $0x198] sm:$0x1] %vm289_vm2, %v3713_v0 }
  0x35   : > { %351 = vst.msk [vmem:[#allocation3 + $0x11] sm:$0x1] %vm289_vm2, %v3713_v0  ;;  %368 = vst.msk [vmem:[#allocation3 + $0x1a9] sm:$0x1] %vm289_vm2, %v3713_v0 }
  0x36   : > { %402 = vst.msk [vmem:[#allocation2 + $0x19] sm:$0xff] %vm280_vm0, %v369_v1  ;;  %403 = vst.msk [vmem:[#allocation2 + $0x21] sm:$0xff] %vm280_vm0, %v370_v2 }
  0x37   : > { %404 = vst.msk [vmem:[#allocation2 + $0x31] sm:$0xff] %vm280_vm0, %v371_v3  ;;  %405 = vst.msk [vmem:[#allocation2 + $0x39] sm:$0xff] %vm280_vm0, %v372_v9  ;;  %v394_v9 = vld [vmem:[%s3950_s29 + $0xc8] sm:$0xff] }
  0x38   : > { %406 = vst.msk [vmem:[#allocation2 + $0x49] sm:$0xff] %vm280_vm0, %v373_v10  ;;  %407 = vst.msk [vmem:[#allocation2 + $0x51] sm:$0xff] %vm280_vm0, %v374_v12 }
  0x39   : > { %v553_v7 = vld [vmem:[#allocation2 + $0xa] sm:$0xff]  ;;  %408 = vst.msk [vmem:[#allocation2 + $0x61] sm:$0xff] %vm280_vm0, %v375_v13  ;;  %409 = vst.msk [vmem:[#allocation2 + $0x69] sm:$0xff] %vm280_vm0, %v376_v14 }
  0x3a   : > { %v584_v11 = vpack.c.bf16 %v553_v7, %v552_v4  ;;  %410 = vst.msk [vmem:[#allocation2 + $0x79] sm:$0xff] %vm280_vm0, %v377_v15  ;;  %411 = vst.msk [vmem:[#allocation2 + $0x81] sm:$0xff] %vm280_vm0, %v378_v16 }
  0x3b   : > { %412 = vst.msk [vmem:[#allocation2 + $0x91] sm:$0xff] %vm280_vm0, %v379_v17  ;;  %413 = vst.msk [vmem:[#allocation2 + $0x99] sm:$0xff] %vm280_vm0, %v380_v18 }
  0x3c   : > { %953 = vrot.lane.b32.xlu1 %v584_v11, %s3715_s8  ;;  %414 = vst.msk [vmem:[#allocation2 + $0xa9] sm:$0xff] %vm280_vm0, %v381_v19  ;;  %415 = vst.msk [vmem:[#allocation2 + $0xb1] sm:$0xff] %vm280_vm0, %v382_v20  ;;  %v395_v20 = vld [vmem:[%s3950_s29 + $0xd0] sm:$0xff] }
  0x3d   : > { %416 = vst.msk [vmem:[#allocation2 + $0xc1] sm:$0xff] %vm280_vm0, %v383_v21  ;;  %417 = vst.msk [vmem:[#allocation2 + $0xc9] sm:$0xff] %vm280_vm0, %v384_v22  ;;  %v554_v25 = vld [vmem:[#allocation2 + $0x1a] sm:$0xff]  ;;  %v555_v26 = vld [vmem:[#allocation2 + $0x22] sm:$0xff] }
  0x3e   : > { %v506_v27 = vld [vmem:[#allocation2 + $0x19] sm:$0xff]  ;;  %418 = vst.msk [vmem:[#allocation2 + $0xd9] sm:$0xff] %vm280_vm0, %v385_v23  ;;  %419 = vst.msk [vmem:[#allocation2 + $0xe1] sm:$0xff] %vm280_vm0, %v386_v24  ;;  %v585_v28 = vpack.c.bf16 %v555_v26, %v554_v25  ;;  %v507_v29 = vld [vmem:[#allocation2 + $0x21] sm:$0xff] }
  0x3f   : > { %v602_v30 = vld [vmem:[#allocation2 + $0x30] sm:$0xff]  ;;  %v600_v31 = vld [vmem:[#allocation2 + $0x18] sm:$0xff]  ;;  %v537_v32 = vpack.c.bf16 %v507_v29, %v506_v27  ;;  %v601_v34 = vld [vmem:[#allocation2 + $0x20] sm:$0xff]  ;;  %420 = vst.msk [vmem:[#allocation2 + $0xf1] sm:$0xff] %vm280_vm0, %v387_v52 }
  0x40   : > { %v603_v33 = vld [vmem:[#allocation2 + $0x38] sm:$0xff]  ;;  %955 = vrot.lane.b32.xlu1 %v585_v28, %s3715_s8  ;;  %v3994_v36 = vpack.c.bf16 %v601_v34, %v600_v31  ;;  %v747_v43 = vld [vmem:[#allocation2 + $0x48] sm:$0xff]  ;;  %v748_v44 = vld [vmem:[#allocation2 + $0x50] sm:$0xff]  ;;  %421 = vst.msk [vmem:[#allocation2 + $0xf9] sm:$0xff] %vm280_vm0, %v388_v53 }
  0x41   : > { %v3991_v35 = vpack.c.bf16 %v603_v33, %v602_v30  ;;  %907 = vrot.lane.b32.xlu0 %v537_v32, %s3714_s30  ;;  %v650_v37 = vld [vmem:[#allocation2 + $0x31] sm:$0xff]  ;;  %v651_v38 = vld [vmem:[#allocation2 + $0x39] sm:$0xff]  ;;  %v4003_v45 = vpack.c.bf16 %v748_v44, %v747_v43  ;;  %v795_v46 = vld [vmem:[#allocation2 + $0x49] sm:$0xff]  ;;  %422 = vst.msk [vmem:[#allocation2 + $0x109] sm:$0xff] %vm280_vm0, %v389_v55 }
  0x42   : > { %v681_v39 = vpack.c.bf16 %v651_v38, %v650_v37  ;;  %v698_v40 = vld [vmem:[#allocation2 + $0x32] sm:$0xff]  ;;  %v699_v41 = vld [vmem:[#allocation2 + $0x3a] sm:$0xff]  ;;  %423 = vst.msk [vmem:[#allocation2 + $0x111] sm:$0xff] %vm280_vm0, %v390_v56  ;;  %v843_v57 = vld [vmem:[#allocation2 + $0x4a] sm:$0xff] }
  0x43   : > { %v729_v42 = vpack.c.bf16 %v699_v41, %v698_v40  ;;  %v796_v47 = vld [vmem:[#allocation2 + $0x51] sm:$0xff]  ;;  %v606_v0 = vld [vmem:[#allocation2 + $0x60] sm:$0xff]  ;;  %v607_v1 = vld [vmem:[#allocation2 + $0x68] sm:$0xff]  ;;  %424 = vst.msk [vmem:[#allocation2 + $0x121] sm:$0xff] %vm280_vm0, %v391_v62 }
  0x44   : > { %1003 = vrot.lane.b32.xlu1 %v3991_v35, %s3716_s9  ;;  %v826_v50 = vpack.c.bf16 %v796_v47, %v795_v46  ;;  %v844_v58 = vld [vmem:[#allocation2 + $0x52] sm:$0xff]  ;;  %425 = vst.msk [vmem:[#allocation2 + $0x129] sm:$0xff] %vm280_vm0, %v392_v63  ;;  %v4046_v2 = vpack.c.bf16 %v607_v1, %v606_v0  ;;  %v654_v3 = vld [vmem:[#allocation2 + $0x61] sm:$0xff]  ;;  %v655_v4 = vld [vmem:[#allocation2 + $0x69] sm:$0xff] }
  0x45   : > { %1001 = vrot.lane.b32.xlu0 %v3994_v36, %s3716_s9  ;;  %v874_v60 = vpack.c.bf16 %v844_v58, %v843_v57  ;;  %v683_v5 = vpack.c.bf16 %v655_v4, %v654_v3  ;;  %v702_v6 = vld [vmem:[#allocation2 + $0x62] sm:$0xff]  ;;  %v703_v7 = vld [vmem:[#allocation2 + $0x6a] sm:$0xff]  ;;  %426 = vst.msk [vmem:[#allocation2 + $0x139] sm:$0xff] %vm280_vm0, %v393_v8  ;;  %427 = vst.msk [vmem:[#allocation2 + $0x141] sm:$0xff] %vm280_vm0, %v394_v9 }
  0x46   : > { %v731_v10 = vpack.c.bf16 %v703_v7, %v702_v6  ;;  %v751_v11 = vld [vmem:[#allocation2 + $0x78] sm:$0xff]  ;;  %v752_v12 = vld [vmem:[#allocation2 + $0x80] sm:$0xff]  ;;  %428 = vst.msk [vmem:[#allocation2 + $0x151] sm:$0xff] %vm280_vm0, %v395_v20  ;;  %v610_v22 = vld [vmem:[#allocation2 + $0x90] sm:$0xff] }
  0x47   : > { %v4060_v13 = vpack.c.bf16 %v752_v12, %v751_v11  ;;  %v799_v14 = vld [vmem:[#allocation2 + $0x79] sm:$0xff]  ;;  %v800_v15 = vld [vmem:[#allocation2 + $0x81] sm:$0xff]  ;;  %v658_v25 = vld [vmem:[#allocation2 + $0x91] sm:$0xff] }
  0x48   : > { %1051 = vrot.lane.b32.xlu1 %v681_v39, %s3717_s10  ;;  %v828_v16 = vpack.c.bf16 %v800_v15, %v799_v14  ;;  %v847_v17 = vld [vmem:[#allocation2 + $0x7a] sm:$0xff]  ;;  %v848_v18 = vld [vmem:[#allocation2 + $0x82] sm:$0xff]  ;;  %v756_v34 = vld [vmem:[#allocation2 + $0xb0] sm:$0xff] }
  0x49   : > { %1049 = vrot.lane.b32.xlu0 %v537_v32, %s3717_s10  ;;  %v876_v19 = vpack.c.bf16 %v848_v18, %v847_v17  ;;  %v396_v21 = vld [vmem:[%s3950_s29 + $0xd8] sm:$0xff]  ;;  %v397_v30 = vld [vmem:[%s3950_s29 + $0xe0] sm:$0xff]  ;;  %v398_v31 = vld [vmem:[%s3950_s29 + $0xe8] sm:$0xff] }
  0x4a   : > { %429 = vst.msk [vmem:[#allocation2 + $0x159] sm:$0xff] %vm280_vm0, %v396_v21  ;;  %v611_v23 = vld [vmem:[#allocation2 + $0x98] sm:$0xff]  ;;  %430 = vst.msk [vmem:[#allocation2 + $0x169] sm:$0xff] %vm280_vm0, %v397_v30  ;;  %v755_v33 = vld [vmem:[#allocation2 + $0xa8] sm:$0xff] }
  0x4b   : > { %v4078_v24 = vpack.c.bf16 %v611_v23, %v610_v22  ;;  %v659_v26 = vld [vmem:[#allocation2 + $0x99] sm:$0xff]  ;;  %431 = vst.msk [vmem:[#allocation2 + $0x171] sm:$0xff] %vm280_vm0, %v398_v31  ;;  %v4092_v37 = vpack.c.bf16 %v756_v34, %v755_v33  ;;  %v803_v38 = vld [vmem:[#allocation2 + $0xa9] sm:$0xff]  ;;  %v808_v62 = vld [vmem:[#allocation2 + $0xe1] sm:$0xff] }
  0x4c   : > { %1099 = vrot.lane.b32.xlu1 %v729_v42, %s3718_s11  ;;  %v685_v27 = vpack.c.bf16 %v659_v26, %v658_v25  ;;  %v707_v29 = vld [vmem:[#allocation2 + $0x9a] sm:$0xff]  ;;  %v851_v41 = vld [vmem:[#allocation2 + $0xaa] sm:$0xff]  ;;  %v710_v53 = vld [vmem:[#allocation2 + $0xc2] sm:$0xff] }
  0x4d   : > { %1097 = vrot.lane.b32.xlu0 %v585_v28, %s3718_s11  ;;  %v706_v28 = vld [vmem:[#allocation2 + $0x92] sm:$0xff]  ;;  %v614_v47 = vld [vmem:[#allocation2 + $0xc0] sm:$0xff]  ;;  %v615_v48 = vld [vmem:[#allocation2 + $0xc8] sm:$0xff] }
  0x4e   : > { %v733_v32 = vpack.c.bf16 %v707_v29, %v706_v28  ;;  %v399_v44 = vld [vmem:[%s3950_s29 + $0xf0] sm:$0xff]  ;;  %v400_v46 = vld [vmem:[%s3950_s29 + $0xf8] sm:$0xff]  ;;  %v4110_v49 = vpack.c.bf16 %v615_v48, %v614_v47  ;;  %v760_v57 = vld [vmem:[#allocation2 + $0xe0] sm:$0xff] }
  0x4f   : > { %432 = vst.msk [vmem:[#allocation2 + $0x181] sm:$0xff] %vm280_vm0, %v399_v44  ;;  %433 = vst.msk [vmem:[#allocation2 + $0x189] sm:$0xff] %vm280_vm0, %v400_v46  ;;  %v663_v51 = vld [vmem:[#allocation2 + $0xc9] sm:$0xff]  ;;  %v759_v56 = vld [vmem:[#allocation2 + $0xd8] sm:$0xff] }
  0x50   : > { %1147 = vrot.lane.b32.xlu1 %v4003_v45, %s3719_s16  ;;  %v711_v54 = vld [vmem:[#allocation2 + $0xca] sm:$0xff]  ;;  %v4120_v59 = vpack.c.bf16 %v760_v57, %v759_v56  ;;  %v807_v61 = vld [vmem:[#allocation2 + $0xd9] sm:$0xff] }
  0x51   : > { %1145 = vrot.lane.b32.xlu0 %v3991_v35, %s3719_s16  ;;  %v735_v55 = vpack.c.bf16 %v711_v54, %v710_v53  ;;  %v832_v63 = vpack.c.bf16 %v808_v62, %v807_v61  ;;  %v855_v4 = vld [vmem:[#allocation2 + $0xda] sm:$0xff]  ;;  %v618_v12 = vld [vmem:[#allocation2 + $0xf0] sm:$0xff] }
  0x52   : > { %v456_v11 = vld [vmem:[#allocation2] sm:$0xff]  ;;  %v619_v14 = vld [vmem:[#allocation2 + $0xf8] sm:$0xff] }
  0x53   : > { %v4134_v18 = vpack.c.bf16 %v619_v14, %v618_v12  ;;  %v667_v20 = vld [vmem:[#allocation2 + $0xf9] sm:$0xff]  ;;  %v812_v53 = vld [vmem:[#allocation2 + $0x111] sm:$0xff]  ;;  %v670_v12 = vld [vmem:[#allocation2 + $0x121] sm:$0xff] }
  0x54   : > { %1195 = vrot.lane.b32.xlu1 %v826_v50, %s3720_s19  ;;  %v714_v26 = vld [vmem:[#allocation2 + $0xf2] sm:$0xff]  ;;  %v671_v14 = vld [vmem:[#allocation2 + $0x129] sm:$0xff] }
  0x55   : > { %1193 = vrot.lane.b32.xlu0 %v681_v39, %s3720_s19 }
  0x58   : > { %909 = vrot.lane.b32.xlu1 %v681_v39, %s3714_s30  ;;  %v804_v39 = vld [vmem:[#allocation2 + $0xb1] sm:$0xff] }
  0x59   : > { %1241 = vrot.lane.b32.xlu0 %v729_v42, %s3721_s22  ;;  %v830_v40 = vpack.c.bf16 %v804_v39, %v803_v38  ;;  %v763_v39 = vld [vmem:[#allocation2 + $0x108] sm:$0xff] }
  0x5c   : > { %911 = vrot.lane.b32.xlu1 %v826_v50, %s3714_s30 }
  0x5d   : > { %1243 = vrot.lane.b32.xlu0 %v874_v60, %s3721_s22 }
  0x60   : > { %959 = vrot.lane.b32.xlu1 %v874_v60, %s3715_s8 }
  0x61   : > { %957 = vrot.lane.b32.xlu0 %v729_v42, %s3715_s8  ;;  %v852_v42 = vld [vmem:[#allocation2 + $0xb2] sm:$0xff] }
  0x62   : > { %v878_v43 = vpack.c.bf16 %v852_v42, %v851_v41 }
  0x64   : > { %1007 = vrot.lane.b32.xlu1 %v4046_v2, %s3716_s9 }
  0x65   : > { %1005 = vrot.lane.b32.xlu0 %v4003_v45, %s3716_s9 }
  0x68   : > { %1055 = vrot.lane.b32.xlu1 %v683_v5, %s3717_s10 }
  0x69   : > { %1053 = vrot.lane.b32.xlu0 %v826_v50, %s3717_s10  ;;  %v662_v50 = vld [vmem:[#allocation2 + $0xc1] sm:$0xff] }
  0x6a   : > { %v687_v52 = vpack.c.bf16 %v663_v51, %v662_v50 }
  0x6c   : > { %1103 = vrot.lane.b32.xlu1 %v731_v10, %s3718_s11 }
  0x6d   : > { %1101 = vrot.lane.b32.xlu0 %v874_v60, %s3718_s11 }
  0x70   : > { %1151 = vrot.lane.b32.xlu1 %v4060_v13, %s3719_s16 }
  0x71   : > { %1149 = vrot.lane.b32.xlu0 %v4046_v2, %s3719_s16 }
  0x74   : > { %1199 = vrot.lane.b32.xlu1 %v828_v16, %s3720_s19 }
  0x75   : > { %1197 = vrot.lane.b32.xlu0 %v683_v5, %s3720_s19 }
  0x78   : > { %913 = vrot.lane.b32.xlu1 %v683_v5, %s3714_s30  ;;  %v856_v5 = vld [vmem:[#allocation2 + $0xe2] sm:$0xff] }
  0x79   : > { %1245 = vrot.lane.b32.xlu0 %v731_v10, %s3721_s22  ;;  %v880_v7 = vpack.c.bf16 %v856_v5, %v855_v4 }
  0x7c   : > { %915 = vrot.lane.b32.xlu1 %v828_v16, %s3714_s30 }
  0x7d   : > { %1247 = vrot.lane.b32.xlu0 %v876_v19, %s3721_s22 }
  0x80   : > { %963 = vrot.lane.b32.xlu1 %v876_v19, %s3715_s8 }
  0x81   : > { %961 = vrot.lane.b32.xlu0 %v731_v10, %s3715_s8  ;;  %v457_v10 = vld [vmem:[#allocation2 + $0x8] sm:$0xff] }
  0x84   : > { %1011 = vrot.lane.b32.xlu1 %v4078_v24, %s3716_s9 }
  0x85   : > { %1009 = vrot.lane.b32.xlu0 %v4060_v13, %s3716_s9 }
  0x88   : > { %1059 = vrot.lane.b32.xlu1 %v685_v27, %s3717_s10 }
  0x89   : > { %1057 = vrot.lane.b32.xlu0 %v828_v16, %s3717_s10  ;;  %v906_v60 = vpop.permute.xlu0 %905  ;;  %v488_v16 = vpack.c.bf16 %v457_v10, %v456_v11 }
  0x8b   : > { %v1275_v22 = vsel %vm280_vm0, %v488_v16, %v906_v60 }
  0x8c   : > { %1107 = vrot.lane.b32.xlu1 %v733_v32, %s3718_s11 }
  0x8d   : > { %1105 = vrot.lane.b32.xlu0 %v876_v19, %s3718_s11  ;;  %v666_v19 = vld [vmem:[#allocation2 + $0xf1] sm:$0xff] }
  0x8e   : > { %v689_v25 = vpack.c.bf16 %v667_v20, %v666_v19  ;;  %v718_v20 = vld [vmem:[#allocation2 + $0x122] sm:$0xff] }
  0x90   : > { %1155 = vrot.lane.b32.xlu1 %v4092_v37, %s3719_s16 }
  0x91   : > { %1153 = vrot.lane.b32.xlu0 %v4078_v24, %s3719_s16 }
  0x94   : > { %1203 = vrot.lane.b32.xlu1 %v830_v40, %s3720_s19 }
  0x95   : > { %1201 = vrot.lane.b32.xlu0 %v685_v27, %s3720_s19 }
  0x98   : > { %917 = vrot.lane.b32.xlu1 %v685_v27, %s3714_s30  ;;  %v715_v27 = vld [vmem:[#allocation2 + $0xfa] sm:$0xff] }
  0x99   : > { %1249 = vrot.lane.b32.xlu0 %v733_v32, %s3721_s22  ;;  %v737_v34 = vpack.c.bf16 %v715_v27, %v714_v26 }
  0x9c   : > { %919 = vrot.lane.b32.xlu1 %v830_v40, %s3714_s30 }
  0x9d   : > { %1251 = vrot.lane.b32.xlu0 %v878_v43, %s3721_s22 }
  0xa0   : > { %967 = vrot.lane.b32.xlu1 %v878_v43, %s3715_s8 }
  0xa1   : > { %965 = vrot.lane.b32.xlu0 %v733_v32, %s3715_s8 }
  0xa4   : > { %1015 = vrot.lane.b32.xlu1 %v4110_v49, %s3716_s9 }
  0xa5   : > { %1013 = vrot.lane.b32.xlu0 %v4092_v37, %s3716_s9 }
  0xa8   : > { %1063 = vrot.lane.b32.xlu1 %v687_v52, %s3717_s10 }
  0xa9   : > { %1061 = vrot.lane.b32.xlu0 %v830_v40, %s3717_s10  ;;  %v764_v40 = vld [vmem:[#allocation2 + $0x110] sm:$0xff] }
  0xaa   : > { %v4157_v50 = vpack.c.bf16 %v764_v40, %v763_v39 }
  0xac   : > { %1111 = vrot.lane.b32.xlu1 %v735_v55, %s3718_s11 }
  0xad   : > { %1109 = vrot.lane.b32.xlu0 %v878_v43, %s3718_s11 }
  0xae   : > { %v954_v58 = vpop.permute.xlu1 %953 }
  0xaf   : > { %v1323_v28 = vsel %vm1321_vm4, %v1275_v22, %v954_v58 }
  0xb0   : > { %1159 = vrot.lane.b32.xlu1 %v4120_v59, %s3719_s16 }
  0xb1   : > { %1157 = vrot.lane.b32.xlu0 %v4110_v49, %s3719_s16 }
  0xb2   : > { %v956_v0 = vpop.permute.xlu1 %955 }
  0xb3   : > { %v908_v1 = vpop.permute.xlu0 %907 }
  0xb4   : > { %1207 = vrot.lane.b32.xlu1 %v832_v63, %s3720_s19  ;;  %v1278_v30 = vsel %vm280_vm0, %v3994_v36, %v908_v1  ;;  %v860_v1 = vld [vmem:[#allocation2 + $0x112] sm:$0xff] }
  0xb5   : > { %1205 = vrot.lane.b32.xlu0 %v687_v52, %s3720_s19  ;;  %v1325_v41 = vsel %vm1321_vm4, %v1278_v30, %v956_v0  ;;  %v859_v0 = vld [vmem:[#allocation2 + $0x10a] sm:$0xff]  ;;  %v767_v30 = vld [vmem:[#allocation2 + $0x138] sm:$0xff] }
  0xb6   : > { %v1004_v3 = vpop.permute.xlu1 %1003  ;;  %v882_v4 = vpack.c.bf16 %v860_v1, %v859_v0  ;;  %v626_v0 = vld [vmem:[#allocation2 + $0x150] sm:$0xff]  ;;  %v627_v1 = vld [vmem:[#allocation2 + $0x158] sm:$0xff] }
  0xb7   : > { %v1002_v6 = vpop.permute.xlu0 %1001  ;;  %v1358_v43 = vsel %vm1354_vm5, %v1325_v41, %v1004_v3 }
  0xb8   : > { %921 = vrot.lane.b32.xlu1 %v687_v52, %s3714_s30  ;;  %v1356_v31 = vsel %vm1354_vm5, %v1323_v28, %v1002_v6  ;;  %v811_v52 = vld [vmem:[#allocation2 + $0x109] sm:$0xff] }
  0xb9   : > { %1253 = vrot.lane.b32.xlu0 %v735_v55, %s3721_s22  ;;  %v834_v60 = vpack.c.bf16 %v812_v53, %v811_v52 }
  0xba   : > { %v1052_v8 = vpop.permute.xlu1 %1051 }
  0xbb   : > { %v1050_v9 = vpop.permute.xlu0 %1049  ;;  %v1391_v47 = vsel %vm1387_vm6, %v1358_v43, %v1052_v8  ;;  %v623_v8 = vld [vmem:[#allocation2 + $0x128] sm:$0xff]  ;;  %v815_v43 = vld [vmem:[#allocation2 + $0x139] sm:$0xff] }
  0xbc   : > { %923 = vrot.lane.b32.xlu1 %v832_v63, %s3714_s30  ;;  %v1389_v33 = vsel %vm1387_vm6, %v1356_v31, %v1050_v9  ;;  %v768_v31 = vld [vmem:[#allocation2 + $0x140] sm:$0xff] }
  0xbd   : > { %1255 = vrot.lane.b32.xlu0 %v880_v7, %s3721_s22 }
  0xbe   : > { %v1100_v15 = vpop.permute.xlu1 %1099 }
  0xbf   : > { %v1098_v17 = vpop.permute.xlu0 %1097  ;;  %v1424_v51 = vsel %vm1420_vm7, %v1391_v47, %v1100_v15 }
  0xc0   : > { %971 = vrot.lane.b32.xlu1 %v880_v7, %s3715_s8  ;;  %v1422_v38 = vsel %vm1420_vm7, %v1389_v33, %v1098_v17  ;;  %v691_v17 = vpack.c.bf16 %v671_v14, %v670_v12  ;;  %v722_v14 = vld [vmem:[#allocation2 + $0x152] sm:$0xff] }
  0xc1   : > { %969 = vrot.lane.b32.xlu0 %v735_v55, %s3715_s8 }
  0xc2   : > { %v1148_v21 = vpop.permute.xlu1 %1147 }
  0xc3   : > { %v1146_v23 = vpop.permute.xlu0 %1145  ;;  %v1457_v54 = vsel %vm1453_vm8, %v1424_v51, %v1148_v21  ;;  %v719_v21 = vld [vmem:[#allocation2 + $0x12a] sm:$0xff] }
  0xc4   : > { %1019 = vrot.lane.b32.xlu1 %v4134_v18, %s3716_s9  ;;  %v1455_v36 = vsel %vm1453_vm8, %v1422_v38, %v1146_v23 }
  0xc5   : > { %1017 = vrot.lane.b32.xlu0 %v4120_v59, %s3716_s9 }
  0xc6   : > { %v1196_v29 = vpop.permute.xlu1 %1195 }
  0xc7   : > { %v1194_v32 = vpop.permute.xlu0 %1193  ;;  %v1490_v56 = vsel %vm1486_vm9, %v1457_v54, %v1196_v29  ;;  %v739_v29 = vpack.c.bf16 %v719_v21, %v718_v20 }
  0xc8   : > { %1067 = vrot.lane.b32.xlu1 %v689_v25, %s3717_s10  ;;  %v1488_v44 = vsel %vm1486_vm9, %v1455_v36, %v1194_v32  ;;  %v4201_v36 = vpack.c.bf16 %v768_v31, %v767_v30 }
  0xc9   : > { %1065 = vrot.lane.b32.xlu0 %v832_v63, %s3717_s10 }
  0xca   : > { %v910_v42 = vpop.permute.xlu1 %909 }
  0xcb   : > { %v1242_v46 = vpop.permute.xlu0 %1241  ;;  %v1281_v19 = vsel %vm280_vm0, %v3991_v35, %v910_v42 }
  0xcc   : > { %1115 = vrot.lane.b32.xlu1 %v737_v34, %s3718_s11  ;;  %v1521_v48 = vsel %vm1519_vm10, %v1488_v44, %v1242_v46  ;;  %v816_v44 = vld [vmem:[#allocation2 + $0x141] sm:$0xff] }
  0xcd   : > { %1113 = vrot.lane.b32.xlu0 %v880_v7, %s3718_s11  ;;  %3600 = vmatprep.mubr.msk.bf16.mxu0 %vm1579_vm11, %v1521_v48  ;;  %v622_v7 = vld [vmem:[#allocation2 + $0x120] sm:$0xff]  ;;  %v836_v53 = vpack.c.bf16 %v816_v44, %v815_v43 }
  0xce   : > { %v912_v55 = vpop.permute.xlu1 %911  ;;  %v4177_v11 = vpack.c.bf16 %v623_v8, %v622_v7  ;;  %v675_v7 = vld [vmem:[#allocation2 + $0x159] sm:$0xff] }
  0xcf   : > { %v1244_v57 = vpop.permute.xlu0 %1243 }
  0xd0   : > { %v1523_v58 = vsel %vm1519_vm10, %v1490_v56, %v1244_v57  ;;  %1163 = vrot.lane.b32.xlu1 %v4157_v50, %s3719_s16  ;;  %v863_v57 = vld [vmem:[#allocation2 + $0x13a] sm:$0xff] }
  0xd1   : > { %1161 = vrot.lane.b32.xlu0 %v4134_v18, %s3719_s16  ;;  %3601 = vmatmul.mubr.msk.bf16.vlgmr.msra.gmra.mxu0 %vm1579_vm11, %v1523_v58  ;;  %v864_v58 = vld [vmem:[#allocation2 + $0x142] sm:$0xff] }
  0xd2   : > { %v960_v61 = vpop.permute.xlu1 %959 }
  0xd3   : > { %v958_v62 = vpop.permute.xlu0 %957 }
  0xd4   : > { %1211 = vrot.lane.b32.xlu1 %v834_v60, %s3720_s19  ;;  %v1327_v22 = vsel %vm1321_vm4, %v1281_v19, %v958_v62 }
  0xd5   : > { %1209 = vrot.lane.b32.xlu0 %v689_v25, %s3720_s19 }
  0xd6   : > { %v1008_v63 = vpop.permute.xlu1 %1007 }
  0xd7   : > { %v1006_v3 = vpop.permute.xlu0 %1005 }
  0xd8   : > { %925 = vrot.lane.b32.xlu1 %v689_v25, %s3714_s30  ;;  %v1284_v25 = vsel %vm280_vm0, %v4003_v45, %v912_v55  ;;  %v1360_v26 = vsel %vm1354_vm5, %v1327_v22, %v1006_v3 }
  0xd9   : > { %1257 = vrot.lane.b32.xlu0 %v737_v34, %s3721_s22  ;;  %v1329_v32 = vsel %vm1321_vm4, %v1284_v25, %v960_v61  ;;  %v884_v61 = vpack.c.bf16 %v864_v58, %v863_v57  ;;  %v771_v25 = vld [vmem:[#allocation2 + $0x168] sm:$0xff]  ;;  %v630_v57 = vld [vmem:[#allocation2 + $0x180] sm:$0xff] }
  0xda   : > { %v1056_v5 = vpop.permute.xlu1 %1055  ;;  %v1362_v45 = vsel %vm1354_vm5, %v1329_v32, %v1008_v63  ;;  %v631_v58 = vld [vmem:[#allocation2 + $0x188] sm:$0xff] }
  0xdb   : > { %v1054_v6 = vpop.permute.xlu0 %1053  ;;  %v1395_v40 = vsel %vm1387_vm6, %v1362_v45, %v1056_v5  ;;  %v4221_v5 = vpack.c.bf16 %v627_v1, %v626_v0  ;;  %v819_v45 = vld [vmem:[#allocation2 + $0x169] sm:$0xff] }
  0xdc   : > { %927 = vrot.lane.b32.xlu1 %v834_v60, %s3714_s30  ;;  %v1393_v28 = vsel %vm1387_vm6, %v1360_v26, %v1054_v6  ;;  %v674_v6 = vld [vmem:[#allocation2 + $0x151] sm:$0xff]  ;;  %v679_v0 = vld [vmem:[#allocation2 + $0x189] sm:$0xff] }
  0xdd   : > { %1259 = vrot.lane.b32.xlu0 %v882_v4, %s3721_s22  ;;  %v772_v26 = vld [vmem:[#allocation2 + $0x170] sm:$0xff] }
  0xde   : > { %v1104_v9 = vpop.permute.xlu1 %1103 }
  0xdf   : > { %v1102_v10 = vpop.permute.xlu0 %1101  ;;  %v1428_v42 = vsel %vm1420_vm7, %v1395_v40, %v1104_v9 }
  0xe0   : > { %975 = vrot.lane.b32.xlu1 %v882_v4, %s3715_s8  ;;  %v1426_v35 = vsel %vm1420_vm7, %v1393_v28, %v1102_v10  ;;  %v693_v10 = vpack.c.bf16 %v675_v7, %v674_v6  ;;  %v726_v7 = vld [vmem:[#allocation2 + $0x182] sm:$0xff] }
  0xe1   : > { %973 = vrot.lane.b32.xlu0 %v737_v34, %s3715_s8 }
  0xe2   : > { %v1152_v15 = vpop.permute.xlu1 %1151 }
  0xe3   : > { %v1150_v16 = vpop.permute.xlu0 %1149  ;;  %v1461_v46 = vsel %vm1453_vm8, %v1428_v42, %v1152_v15  ;;  %v723_v15 = vld [vmem:[#allocation2 + $0x15a] sm:$0xff] }
  0xe4   : > { %1023 = vrot.lane.b32.xlu1 %v4177_v11, %s3716_s9  ;;  %v1459_v33 = vsel %vm1453_vm8, %v1426_v35, %v1150_v16 }
  0xe5   : > { %1021 = vrot.lane.b32.xlu0 %v4157_v50, %s3716_s9 }
  0xe6   : > { %v1200_v23 = vpop.permute.xlu1 %1199 }
  0xe7   : > { %v1198_v27 = vpop.permute.xlu0 %1197  ;;  %v1494_v48 = vsel %vm1486_vm9, %v1461_v46, %v1200_v23  ;;  %v741_v23 = vpack.c.bf16 %v723_v15, %v722_v14 }
  0xe8   : > { %1071 = vrot.lane.b32.xlu1 %v691_v17, %s3717_s10  ;;  %v1492_v38 = vsel %vm1486_vm9, %v1459_v33, %v1198_v27  ;;  %v4245_v33 = vpack.c.bf16 %v772_v26, %v771_v25 }
  0xe9   : > { %1069 = vrot.lane.b32.xlu0 %v834_v60, %s3717_s10 }
  0xea   : > { %v914_v34 = vpop.permute.xlu1 %913 }
  0xeb   : > { %v1246_v39 = vpop.permute.xlu0 %1245  ;;  %v1287_v12 = vsel %vm280_vm0, %v4046_v2, %v914_v34 }
  0xec   : > { %v1525_v41 = vsel %vm1519_vm10, %v1492_v38, %v1246_v39  ;;  %1119 = vrot.lane.b32.xlu1 %v739_v29, %s3718_s11  ;;  %v820_v38 = vld [vmem:[#allocation2 + $0x171] sm:$0xff] }
  0xed   : > { %1117 = vrot.lane.b32.xlu0 %v882_v4, %s3718_s11  ;;  %3604 = vmatprep.mubr.msk.bf16.mxu0 %vm1579_vm11, %v1525_v41  ;;  %v838_v44 = vpack.c.bf16 %v820_v38, %v819_v45 }
  0xee   : > { %v916_v47 = vpop.permute.xlu1 %915 }
  0xef   : > { %v1248_v51 = vpop.permute.xlu0 %1247  ;;  %v1290_v19 = vsel %vm280_vm0, %v4060_v13, %v916_v47 }
  0xf0   : > { %v1527_v52 = vsel %vm1519_vm10, %v1494_v48, %v1248_v51  ;;  %1167 = vrot.lane.b32.xlu1 %v4201_v36, %s3719_s16  ;;  %v867_v51 = vld [vmem:[#allocation2 + $0x16a] sm:$0xff] }
  0xf1   : > { %1165 = vrot.lane.b32.xlu0 %v4177_v11, %s3719_s16  ;;  %3605 = vmatmul.mubr.msk.bf16.gmra.mxu0 %vm1579_vm11, %v1527_v52  ;;  %v868_v52 = vld [vmem:[#allocation2 + $0x172] sm:$0xff] }
  0xf2   : > { %v964_v54 = vpop.permute.xlu1 %963 }
  0xf3   : > { %v962_v55 = vpop.permute.xlu0 %961  ;;  %v1333_v27 = vsel %vm1321_vm4, %v1290_v19, %v964_v54  ;;  %v886_v54 = vpack.c.bf16 %v868_v52, %v867_v51  ;;  %v775_v19 = vld [vmem:[#allocation2 + $0x198] sm:$0xff] }
  0xf4   : > { %1215 = vrot.lane.b32.xlu1 %v836_v53, %s3720_s19  ;;  %v1331_v16 = vsel %vm1321_vm4, %v1287_v12, %v962_v55 }
  0xf5   : > { %1213 = vrot.lane.b32.xlu0 %v691_v17, %s3720_s19 }
  0xf6   : > { %v1012_v56 = vpop.permute.xlu1 %1011 }
  0xf7   : > { %v1010_v60 = vpop.permute.xlu0 %1009  ;;  %v1366_v13 = vsel %vm1354_vm5, %v1333_v27, %v1012_v56 }
  0xf8   : > { %929 = vrot.lane.b32.xlu1 %v691_v17, %s3714_s30  ;;  %v1364_v20 = vsel %vm1354_vm5, %v1331_v16, %v1010_v60 }
  0xf9   : > { %1261 = vrot.lane.b32.xlu0 %v739_v29, %s3721_s22 }
  0xfa   : > { %v1060_v62 = vpop.permute.xlu1 %1059 }
  0xfb   : > { %v1058_v63 = vpop.permute.xlu0 %1057  ;;  %v1399_v31 = vsel %vm1387_vm6, %v1366_v13, %v1060_v62  ;;  %v647_v62 = vpack.c.bf16 %v631_v58, %v630_v57  ;;  %v823_v13 = vld [vmem:[#allocation2 + $0x199] sm:$0xff] }
  0xfc   : > { %931 = vrot.lane.b32.xlu1 %v836_v53, %s3714_s30  ;;  %v1397_v22 = vsel %vm1387_vm6, %v1364_v20, %v1058_v63  ;;  %v678_v63 = vld [vmem:[#allocation2 + $0x181] sm:$0xff] }
  0xfd   : > { %1263 = vrot.lane.b32.xlu0 %v884_v61, %s3721_s22  ;;  %v776_v20 = vld [vmem:[#allocation2 + $0x1a0] sm:$0xff] }
  0xfe   : > { %v1108_v3 = vpop.permute.xlu1 %1107 }
  0xff   : > { %v1106_v4 = vpop.permute.xlu0 %1105  ;;  %v1432_v34 = vsel %vm1420_vm7, %v1399_v31, %v1108_v3 }
 0x100   : > { %979 = vrot.lane.b32.xlu1 %v884_v61, %s3715_s8  ;;  %v1430_v2 = vsel %vm1420_vm7, %v1397_v22, %v1106_v4  ;;  %v695_v4 = vpack.c.bf16 %v679_v0, %v678_v63 }
 0x101   : > { %977 = vrot.lane.b32.xlu0 %v739_v29, %s3715_s8 }
 0x102   : > { %v1156_v8 = vpop.permute.xlu1 %1155 }
 0x103   : > { %v1154_v9 = vpop.permute.xlu0 %1153  ;;  %v1465_v39 = vsel %vm1453_vm8, %v1432_v34, %v1156_v8  ;;  %v727_v8 = vld [vmem:[#allocation2 + $0x18a] sm:$0xff] }
 0x104   : > { %1027 = vrot.lane.b32.xlu1 %v4221_v5, %s3716_s9  ;;  %v1463_v28 = vsel %vm1453_vm8, %v1430_v2, %v1154_v9 }
 0x105   : > { %1025 = vrot.lane.b32.xlu0 %v4201_v36, %s3716_s9 }
 0x106   : > { %v1204_v17 = vpop.permute.xlu1 %1203 }
 0x107   : > { %v1202_v21 = vpop.permute.xlu0 %1201  ;;  %v1498_v41 = vsel %vm1486_vm9, %v1465_v39, %v1204_v17  ;;  %v743_v17 = vpack.c.bf16 %v727_v8, %v726_v7  ;;  %v871_v39 = vld [vmem:[#allocation2 + $0x19a] sm:$0xff] }
 0x108   : > { %1075 = vrot.lane.b32.xlu1 %v693_v10, %s3717_s10  ;;  %v1496_v35 = vsel %vm1486_vm9, %v1463_v28, %v1202_v21  ;;  %v792_v28 = vpack.c.bf16 %v776_v20, %v775_v19 }
 0x109   : > { %1073 = vrot.lane.b32.xlu0 %v836_v53, %s3717_s10 }
 0x10a   : > { %v918_v29 = vpop.permute.xlu1 %917 }
 0x10b   : > { %v1250_v30 = vpop.permute.xlu0 %1249  ;;  %v1293_v6 = vsel %vm280_vm0, %v4078_v24, %v918_v29 }
 0x10c   : > { %v1529_v32 = vsel %vm1519_vm10, %v1496_v35, %v1250_v30  ;;  %1123 = vrot.lane.b32.xlu1 %v741_v23, %s3718_s11  ;;  %v824_v35 = vld [vmem:[#allocation2 + $0x1a1] sm:$0xff] }
 0x10d   : > { %1121 = vrot.lane.b32.xlu0 %v884_v61, %s3718_s11  ;;  %3608 = vmatprep.mubr.msk.bf16.mxu0 %vm1579_vm11, %v1529_v32  ;;  %v840_v38 = vpack.c.bf16 %v824_v35, %v823_v13 }
 0x10e   : > { %v920_v40 = vpop.permute.xlu1 %919 }
 0x10f   : > { %v1252_v42 = vpop.permute.xlu0 %1251  ;;  %v1296_v12 = vsel %vm280_vm0, %v4092_v37, %v920_v40  ;;  %v872_v40 = vld [vmem:[#allocation2 + $0x1a2] sm:$0xff] }
 0x110   : > { %v1531_v43 = vsel %vm1519_vm10, %v1498_v41, %v1252_v42  ;;  %1171 = vrot.lane.b32.xlu1 %v4245_v33, %s3719_s16 }
 0x111   : > { %1169 = vrot.lane.b32.xlu0 %v4221_v5, %s3719_s16  ;;  %3609 = vmatmul.mubr.msk.bf16.gmra.mxu0 %vm1579_vm11, %v1531_v43  ;;  %v888_v43 = vpack.c.bf16 %v872_v40, %v871_v39 }
 0x112   : > { %v968_v46 = vpop.permute.xlu1 %967 }
 0x113   : > { %v966_v47 = vpop.permute.xlu0 %965  ;;  %v1337_v21 = vsel %vm1321_vm4, %v1296_v12, %v968_v46  ;;  %v1966_v46 = vld [vmem:[#allocation3 + $0x1] sm:$0xff] }
 0x114   : > { %1219 = vrot.lane.b32.xlu1 %v838_v44, %s3720_s19  ;;  %v1335_v9 = vsel %vm1321_vm4, %v1293_v6, %v966_v47  ;;  %v1967_v47 = vld [vmem:[#allocation3 + $0x9] sm:$0xff] }
 0x115   : > { %1217 = vrot.lane.b32.xlu0 %v693_v10, %s3720_s19  ;;  %v1998_v51 = vpack.c.bf16 %v1967_v47, %v1966_v46 }
 0x116   : > { %v1016_v48 = vpop.permute.xlu1 %1015 }
 0x117   : > { %v1014_v53 = vpop.permute.xlu0 %1013  ;;  %v1370_v37 = vsel %vm1354_vm5, %v1337_v21, %v1016_v48 }
 0x118   : > { %933 = vrot.lane.b32.xlu1 %v693_v10, %s3714_s30  ;;  %v1368_v14 = vsel %vm1354_vm5, %v1335_v9, %v1014_v53  ;;  %v2014_v53 = vld [vmem:[#allocation3 + $0x2] sm:$0xff] }
 0x119   : > { %1265 = vrot.lane.b32.xlu0 %v741_v23, %s3721_s22 }
 0x11a   : > { %v1064_v55 = vpop.permute.xlu1 %1063 }
 0x11b   : > { %v1062_v56 = vpop.permute.xlu0 %1061  ;;  %v1403_v26 = vsel %vm1387_vm6, %v1370_v37, %v1064_v55 }
 0x11c   : > { %935 = vrot.lane.b32.xlu1 %v838_v44, %s3714_s30  ;;  %v1401_v16 = vsel %vm1387_vm6, %v1368_v14, %v1062_v56 }
 0x11d   : > { %1267 = vrot.lane.b32.xlu0 %v886_v54, %s3721_s22 }
 0x11e   : > { %v1112_v60 = vpop.permute.xlu1 %1111 }
 0x11f   : > { %v1110_v61 = vpop.permute.xlu0 %1109  ;;  %v1436_v29 = vsel %vm1420_vm7, %v1403_v26, %v1112_v60 }
 0x120   : > { %983 = vrot.lane.b32.xlu1 %v886_v54, %s3715_s8  ;;  %v1434_v24 = vsel %vm1420_vm7, %v1401_v16, %v1110_v61 }
 0x121   : > { %981 = vrot.lane.b32.xlu0 %v741_v23, %s3715_s8 }
 0x122   : > { %v1160_v1 = vpop.permute.xlu1 %1159 }
 0x123   : > { %v1158_v3 = vpop.permute.xlu0 %1157  ;;  %v1469_v30 = vsel %vm1453_vm8, %v1436_v29, %v1160_v1 }
 0x124   : > { %1031 = vrot.lane.b32.xlu1 %v647_v62, %s3716_s9  ;;  %v1467_v22 = vsel %vm1453_vm8, %v1434_v24, %v1158_v3 }
 0x125   : > { %1029 = vrot.lane.b32.xlu0 %v4245_v33, %s3716_s9 }
 0x126   : > { %v1208_v10 = vpop.permute.xlu1 %1207 }
 0x127   : > { %v1206_v15 = vpop.permute.xlu0 %1205  ;;  %v1502_v32 = vsel %vm1486_vm9, %v1469_v30, %v1208_v10 }
 0x128   : > { %1079 = vrot.lane.b32.xlu1 %v695_v4, %s3717_s10  ;;  %v1500_v2 = vsel %vm1486_vm9, %v1467_v22, %v1206_v15 }
 0x129   : > { %1077 = vrot.lane.b32.xlu0 %v838_v44, %s3717_s10 }
 0x12a   : > { %v922_v23 = vpop.permute.xlu1 %921 }
 0x12b   : > { %v1254_v25 = vpop.permute.xlu0 %1253 }
 0x12c   : > { %v1533_v27 = vsel %vm1519_vm10, %v1500_v2, %v1254_v25  ;;  %1127 = vrot.lane.b32.xlu1 %v743_v17, %s3718_s11 }
 0x12d   : > { %1125 = vrot.lane.b32.xlu0 %v886_v54, %s3718_s11  ;;  %3612 = vmatprep.mubr.msk.bf16.mxu0 %vm1579_vm11, %v1533_v27  ;;  %v2015_v54 = vld [vmem:[#allocation3 + $0xa] sm:$0xff] }
 0x12e   : > { %v924_v31 = vpop.permute.xlu1 %923  ;;  %v2046_v56 = vpack.c.bf16 %v2015_v54, %v2014_v53 }
 0x12f   : > { %v1256_v34 = vpop.permute.xlu0 %1255  ;;  %v1302_v1 = vsel %vm280_vm0, %v4120_v59, %v924_v31 }
 0x130   : > { %v1535_v45 = vsel %vm1519_vm10, %v1502_v32, %v1256_v34  ;;  %1175 = vrot.lane.b32.xlu1 %v792_v28, %s3719_s16 }
 0x131   : > { %1173 = vrot.lane.b32.xlu0 %v647_v62, %s3719_s16  ;;  %3613 = vmatmul.mubr.msk.bf16.gmra.mxu0 %vm1579_vm11, %v1535_v45  ;;  %v1299_v62 = vsel %vm280_vm0, %v4110_v49, %v922_v23 }
 0x132   : > { %v972_v41 = vpop.permute.xlu1 %971 }
 0x133   : > { %v970_v42 = vpop.permute.xlu0 %969  ;;  %v1341_v8 = vsel %vm1321_vm4, %v1302_v1, %v972_v41 }
 0x134   : > { %1223 = vrot.lane.b32.xlu1 %v840_v38, %s3720_s19  ;;  %v1339_v63 = vsel %vm1321_vm4, %v1299_v62, %v970_v42 }
 0x135   : > { %1221 = vrot.lane.b32.xlu0 %v695_v4, %s3720_s19 }
 0x136   : > { %v1020_v44 = vpop.permute.xlu1 %1019 }
 0x137   : > { %v1018_v48 = vpop.permute.xlu0 %1017  ;;  %v1374_v49 = vsel %vm1354_vm5, %v1341_v8, %v1020_v44 }
 0x138   : > { %1271 = vrot.lane.b32.xlu1 %v888_v43, %s3721_s22  ;;  %v1372_v3 = vsel %vm1354_vm5, %v1339_v63, %v1018_v48 }
 0x139   : > { %1269 = vrot.lane.b32.xlu0 %v743_v17, %s3721_s22 }
 0x13a   : > { %v1068_v52 = vpop.permute.xlu1 %1067 }
 0x13b   : > { %v1066_v55 = vpop.permute.xlu0 %1065  ;;  %v1407_v15 = vsel %vm1387_vm6, %v1374_v49, %v1068_v52 }
 0x13c   : > { %v1405_v6 = vsel %vm1387_vm6, %v1372_v3, %v1066_v55 }
 0x13d   : > { %2367 = vrot.lane.b32.xlu0 %v1998_v51, %s3714_s30 }
 0x13e   : > { %v1116_v57 = vpop.permute.xlu1 %1115 }
 0x13f   : > { %v1114_v58 = vpop.permute.xlu0 %1113  ;;  %v1440_v16 = vsel %vm1420_vm7, %v1407_v15, %v1116_v57 }
 0x140   : > { %v1438_v7 = vsel %vm1420_vm7, %v1405_v6, %v1114_v58 }
 0x141   : > { %2415 = vrot.lane.b32.xlu0 %v2046_v56, %s3715_s8 }
 0x142   : > { %v1164_v60 = vpop.permute.xlu1 %1163 }
 0x143   : > { %v1162_v61 = vpop.permute.xlu0 %1161  ;;  %v1473_v17 = vsel %vm1453_vm8, %v1440_v16, %v1164_v60 }
 0x144   : > { %v1471_v9 = vsel %vm1453_vm8, %v1438_v7, %v1162_v61 }
 0x146   : > { %v1212_v0 = vpop.permute.xlu1 %1211 }
 0x147   : > { %v1210_v4 = vpop.permute.xlu0 %1209  ;;  %v1506_v19 = vsel %vm1486_vm9, %v1473_v17, %v1212_v0 }
 0x148   : > { %v1504_v12 = vsel %vm1486_vm9, %v1471_v9, %v1210_v4 }
 0x14a   : > { %v926_v10 = vpop.permute.xlu1 %925 }
 0x14b   : > { %v1258_v14 = vpop.permute.xlu0 %1257  ;;  %v1305_v35 = vsel %vm280_vm0, %v4134_v18, %v926_v10 }
 0x14c   : > { %v1537_v59 = vsel %vm1519_vm10, %v1504_v12, %v1258_v14 }
 0x14d   : > { %3616 = vmatprep.mubr.msk.bf16.mxu0 %vm1579_vm11, %v1537_v59 }
 0x14e   : > { %v928_v24 = vpop.permute.xlu1 %927 }
 0x14f   : > { %v1260_v20 = vpop.permute.xlu0 %1259  ;;  %v1308_v32 = vsel %vm280_vm0, %v4157_v50, %v928_v24 }
 0x150   : > { %v1539_v21 = vsel %vm1519_vm10, %v1506_v19, %v1260_v20 }
 0x151   : > { %3617 = vmatmul.mubr.msk.bf16.gmra.mxu0 %vm1579_vm11, %v1539_v21 }
 0x152   : > { %v976_v22 = vpop.permute.xlu1 %975 }
 0x153   : > { %v974_v23 = vpop.permute.xlu0 %973  ;;  %v1345_v40 = vsel %vm1321_vm4, %v1308_v32, %v976_v22 }
 0x154   : > { %v1343_v30 = vsel %vm1321_vm4, %v1305_v35, %v974_v23  ;;  %v4362_v23 = vld [vmem:[%s5109_s2] ss:$0 sm:$0xff] }
 0x156   : > { %v1024_v37 = vpop.permute.xlu1 %1023 }
 0x157   : > { %v1022_v2 = vpop.permute.xlu0 %1021  ;;  %v1378_v18 = vsel %vm1354_vm5, %v1345_v40, %v1024_v37 }
 0x158   : > { %v1376_v34 = vsel %vm1354_vm5, %v1343_v30, %v1022_v2  ;;  %v4368_v2 = vld [vmem:[%s5110_s3] ss:$0 sm:$0xff] }
 0x15a   : > { %v1072_v25 = vpop.permute.xlu1 %1071 }
 0x15b   : > { %v1070_v26 = vpop.permute.xlu0 %1069  ;;  %v1411_v46 = vsel %vm1387_vm6, %v1378_v18, %v1072_v25 }
 0x15c   : > { %v1409_v38 = vsel %vm1387_vm6, %v1376_v34, %v1070_v26 }
 0x15e   : > { %v1120_v27 = vpop.permute.xlu1 %1119 }
 0x15f   : > { %v1118_v28 = vpop.permute.xlu0 %1117  ;;  %v1444_v47 = vsel %vm1420_vm7, %v1411_v46, %v1120_v27 }
 0x160   : > { %v1442_v39 = vsel %vm1420_vm7, %v1409_v38, %v1118_v28 }
 0x162   : > { %v1168_v29 = vpop.permute.xlu1 %1167 }
 0x163   : > { %v1166_v13 = vpop.permute.xlu0 %1165  ;;  %v1477_v48 = vsel %vm1453_vm8, %v1444_v47, %v1168_v29 }
 0x164   : > { %v1475_v41 = vsel %vm1453_vm8, %v1442_v39, %v1166_v13 }
 0x166   : > { %v1216_v31 = vpop.permute.xlu1 %1215 }
 0x167   : > { %v1214_v45 = vpop.permute.xlu0 %1213  ;;  %v1510_v52 = vsel %vm1486_vm9, %v1477_v48, %v1216_v31 }
 0x168   : > { %v1508_v43 = vsel %vm1486_vm9, %v1475_v41, %v1214_v45 }
 0x16a   : > { %v930_v42 = vpop.permute.xlu1 %929 }
 0x16b   : > { %v1262_v44 = vpop.permute.xlu0 %1261  ;;  %v1311_v3 = vsel %vm280_vm0, %v4177_v11, %v930_v42 }
 0x16c   : > { %v1541_v50 = vsel %vm1519_vm10, %v1508_v43, %v1262_v44 }
 0x16d   : > { %3620 = vmatprep.mubr.msk.bf16.mxu0 %vm1579_vm11, %v1541_v50 }
 0x16e   : > { %v932_v51 = vpop.permute.xlu1 %931 }
 0x16f   : > { %v1264_v53 = vpop.permute.xlu0 %1263  ;;  %v1314_v7 = vsel %vm280_vm0, %v4201_v36, %v932_v51 }
 0x170   : > { %v1543_v54 = vsel %vm1519_vm10, %v1510_v52, %v1264_v53 }
 0x171   : > { %3621 = vmatmul.mubr.msk.bf16.gmra.mxu0 %vm1579_vm11, %v1543_v54 }
 0x172   : > { %v980_v55 = vpop.permute.xlu1 %979 }
 0x173   : > { %v978_v56 = vpop.permute.xlu0 %977  ;;  %v1349_v12 = vsel %vm1321_vm4, %v1314_v7, %v980_v55 }
 0x174   : > { %v1347_v4 = vsel %vm1321_vm4, %v1311_v3, %v978_v56 }
 0x176   : > { %v1028_v57 = vpop.permute.xlu1 %1027 }
 0x177   : > { %v1026_v58 = vpop.permute.xlu0 %1025  ;;  %v1382_v11 = vsel %vm1354_vm5, %v1349_v12, %v1028_v57 }
 0x178   : > { %v1380_v8 = vsel %vm1354_vm5, %v1347_v4, %v1026_v58 }
 0x17a   : > { %v1076_v60 = vpop.permute.xlu1 %1075 }
 0x17b   : > { %v1074_v61 = vpop.permute.xlu0 %1073  ;;  %v1415_v17 = vsel %vm1387_vm6, %v1382_v11, %v1076_v60 }
 0x17c   : > { %v1413_v10 = vsel %vm1387_vm6, %v1380_v8, %v1074_v61 }
 0x17e   : > { %v1124_v62 = vpop.permute.xlu1 %1123 }
 0x17f   : > { %v1122_v63 = vpop.permute.xlu0 %1121  ;;  %v1448_v24 = vsel %vm1420_vm7, %v1415_v17, %v1124_v62 }
 0x180   : > { %v1446_v49 = vsel %vm1420_vm7, %v1413_v10, %v1122_v63 }
 0x182   : > { %v1172_v0 = vpop.permute.xlu1 %1171 }
 0x183   : > { %v1170_v1 = vpop.permute.xlu0 %1169  ;;  %v1481_v19 = vsel %vm1453_vm8, %v1448_v24, %v1172_v0 }
 0x184   : > { %v1479_v14 = vsel %vm1453_vm8, %v1446_v49, %v1170_v1 }
 0x186   : > { %v1220_v6 = vpop.permute.xlu1 %1219 }
 0x187   : > { %v1218_v9 = vpop.permute.xlu0 %1217  ;;  %v1514_v21 = vsel %vm1486_vm9, %v1481_v19, %v1220_v6 }
 0x188   : > { %v1512_v59 = vsel %vm1486_vm9, %v1479_v14, %v1218_v9 }
 0x18a   : > { %v934_v15 = vpop.permute.xlu1 %933 }
 0x18b   : > { %v1266_v16 = vpop.permute.xlu0 %1265  ;;  %v1317_v57 = vsel %vm280_vm0, %v4221_v5, %v934_v15 }
 0x18c   : > { %v1545_v36 = vsel %vm1519_vm10, %v1512_v59, %v1266_v16 }
 0x18d   : > { %3624 = vmatprep.mubr.msk.bf16.mxu0 %vm1579_vm11, %v1545_v36 }
 0x18e   : > { %v936_v20 = vpop.permute.xlu1 %935 }
 0x18f   : > { %v1268_v22 = vpop.permute.xlu0 %1267  ;;  %v1320_v51 = vsel %vm280_vm0, %v4245_v33, %v936_v20 }
 0x190   : > { %v1547_v37 = vsel %vm1519_vm10, %v1514_v21, %v1268_v22 }
 0x191   : > { %v3602_v25 = vpop.f32.mrf.mxu0  ;;  %3625 = vmatmul.mubr.msk.bf16.gmra.mxu0 %vm1579_vm11, %v1547_v37 }
 0x192   : > { %v1785_v26 = vmul.f32 %v3602_v25, %v4362_v23  ;;  %v984_v27 = vpop.permute.xlu1 %983 }
 0x193   : > { %v982_v28 = vpop.permute.xlu0 %981  ;;  %v1650_v29 = vpop.f32.mrf.mxu0  ;;  %v1353_v58 = vsel %vm1321_vm4, %v1320_v51, %v984_v27 }
 0x194   : > { %v1823_v13 = vadd.f32 %v4368_v2, %v1785_v26  ;;  %v1783_v35 = vmul.f32 %v4362_v23, %v1650_v29  ;;  %v1351_v61 = vsel %vm1321_vm4, %v1317_v57, %v982_v28 }
 0x195   : > { %v3603_v30 = vpop.f32.mrf.mxu0 }
 0x196   : > { %v1855_v31 = vmax.f32 %v1823_v13, 0.0  ;;  %v1821_v32 = vadd.f32 %v4368_v2, %v1783_v35  ;;  %v1786_v34 = vmul.f32 %v3603_v30, %v4362_v23  ;;  %v1032_v45 = vpop.permute.xlu1 %1031 }
 0x197   : > { %v1030_v38 = vpop.permute.xlu0 %1029  ;;  %v1653_v39 = vpop.f32.mrf.mxu0  ;;  %v1386_v62 = vsel %vm1354_vm5, %v1353_v58, %v1032_v45 }
 0x198   : > { %1888 = vst.msk [vmem:[#allocation3 + $0x31] sm:$0xff] %vm280_vm0, %v1855_v31  ;;  %v1853_v40 = vmax.f32 %v1821_v32, 0.0  ;;  %v1824_v41 = vadd.f32 %v4368_v2, %v1786_v34  ;;  %v1784_v42 = vmul.f32 %v4362_v23, %v1653_v39  ;;  %v1384_v63 = vsel %vm1354_vm5, %v1351_v61, %v1030_v38 }
 0x19a   : > { %1886 = vst.msk [vmem:[#allocation3 + $0x19] sm:$0xff] %vm280_vm0, %v1853_v40  ;;  %v1856_v18 = vmax.f32 %v1824_v41, 0.0  ;;  %v1822_v43 = vadd.f32 %v4368_v2, %v1784_v42  ;;  %v1080_v44 = vpop.permute.xlu1 %1079 }
 0x19b   : > { %v1078_v46 = vpop.permute.xlu0 %1077  ;;  %v1419_v0 = vsel %vm1387_vm6, %v1386_v62, %v1080_v44 }
 0x19c   : > { %1889 = vst.msk [vmem:[#allocation3 + $0x39] sm:$0xff] %vm280_vm0, %v1856_v18  ;;  %v1854_v50 = vmax.f32 %v1822_v43, 0.0  ;;  %v1417_v3 = vsel %vm1387_vm6, %v1384_v63, %v1078_v46  ;;  %v3698_v18 = vld [vmem:[%s5111_s4 + $0x20] ss:$0 sps:$4 sm:$0xff]   ;;  %v3699_v46 = vld [vmem:[%s5111_s4 + $0x18] sm:$0xff]  }
 0x19d   : > { %3675 = vmatprep.subr.msk.bf16.mxu1 %vm1612_vm3, %v3698_v18  ;;  %v3067_v44 = vsel %vm1612_vm3, %v3698_v18, 0 }
 0x19e   : > { %1887 = vst.msk [vmem:[#allocation3 + $0x21] sm:$0xff] %vm280_vm0, %v1854_v50  ;;  %v1128_v47 = vpop.permute.xlu1 %1127  ;;  %3633 = vmatpush3.bf16.msra.mxu1 %v3067_v44  ;;  %v3700_v50 = vld [vmem:[%s5111_s4 + $0x10] sm:$0xff]  }
 0x19f   : > { %v1126_v48 = vpop.permute.xlu0 %1125  ;;  %v2207_v54 = vld [vmem:[#allocation3 + $0x30] sm:$0xff]  ;;  %v1452_v4 = vsel %vm1420_vm7, %v1419_v0, %v1128_v47  ;;  %3634 = vmatprep.subr.bf16.mxu1 %v3699_v46 }
 0x1a0   : > { %v2255_v5 = vld [vmem:[#allocation3 + $0x31] sm:$0xff]  ;;  %v1450_v7 = vsel %vm1420_vm7, %v1417_v3, %v1126_v48 }
 0x1a1   : > { %v2062_v22 = vld [vmem:[#allocation3 + $0x18] sm:$0xff] }
 0x1a2   : > { %v1176_v52 = vpop.permute.xlu1 %1175  ;;  %v1968_v27 = vld [vmem:[#allocation3 + $0x19] sm:$0xff]  ;;  %3635 = vmatpush3.bf16.msra.mxu1 %v3699_v46 }
 0x1a3   : > { %v1174_v53 = vpop.permute.xlu0 %1173  ;;  %v2208_v55 = vld [vmem:[#allocation3 + $0x38] sm:$0xff]  ;;  %v1485_v8 = vsel %vm1453_vm8, %v1452_v4, %v1176_v52  ;;  %3636 = vmatprep.subr.bf16.mxu1 %v3700_v50 }
 0x1a4   : > { %v4385_v56 = vpack.c.bf16 %v2208_v55, %v2207_v54  ;;  %v2256_v60 = vld [vmem:[#allocation3 + $0x39] sm:$0xff]  ;;  %v1483_v49 = vsel %vm1453_vm8, %v1450_v7, %v1174_v53 }
 0x1a5   : > { %v2287_v6 = vpack.c.bf16 %v2256_v60, %v2255_v5  ;;  %v2303_v9 = vld [vmem:[#allocation3 + $0x32] sm:$0xff]  ;;  %v2304_v10 = vld [vmem:[#allocation3 + $0x3a] sm:$0xff]  ;;  %v2017_v32 = vld [vmem:[#allocation3 + $0x22] sm:$0xff] }
 0x1a6   : > { %2607 = vrot.lane.b32.xlu0 %v4385_v56, %s3719_s16  ;;  %2465 = vrot.lane.b32.xlu1 %v4385_v56, %s3716_s9  ;;  %v1224_v33 = vpop.permute.xlu1 %1223  ;;  %v2335_v17 = vpack.c.bf16 %v2304_v10, %v2303_v9  ;;  %v2063_v24 = vld [vmem:[#allocation3 + $0x20] sm:$0xff]  ;;  %v3701_v53 = vld [vmem:[%s5111_s4 + $0x8] sm:$0xff]   ;;  %v3702_v60 = vld [vmem:[%s5111_s4] sm:$0xff]  }
 0x1a7   : > { %v1222_v1 = vpop.permute.xlu0 %1221  ;;  %v1518_v12 = vsel %vm1486_vm9, %v1485_v8, %v1224_v33  ;;  %v1969_v20 = vld [vmem:[#allocation3 + $0x21] sm:$0xff]  ;;  %v4418_v26 = vpack.c.bf16 %v2063_v24, %v2062_v22  ;;  %3637 = vmatpush3.bf16.msra.mxu1 %v3700_v50 }
 0x1a8   : > { %v1516_v15 = vsel %vm1486_vm9, %v1483_v49, %v1222_v1  ;;  %v1999_v29 = vpack.c.bf16 %v1969_v20, %v1968_v27  ;;  %v2016_v31 = vld [vmem:[#allocation3 + $0x1a] sm:$0xff]  ;;  %3638 = vmatprep.subr.bf16.mxu1 %v3701_v53 }
 0x1a9   : > { %v2047_v40 = vpack.c.bf16 %v2017_v32, %v2016_v31 }
 0x1aa   : > { %2655 = vrot.lane.b32.xlu0 %v2287_v6, %s3720_s19  ;;  %2513 = vrot.lane.b32.xlu1 %v2287_v6, %s3717_s10  ;;  %v1272_v14 = vpop.permute.xlu1 %1271 }
 0x1ab   : > { %v1551_v11 = vsel %vm1519_vm10, %v1518_v12, %v1272_v14  ;;  %v1270_v59 = vpop.permute.xlu0 %1269  ;;  %3639 = vmatpush3.bf16.msra.mxu1 %v3701_v53 }
 0x1ac   : > { %v1549_v16 = vsel %vm1519_vm10, %v1516_v15, %v1270_v59  ;;  %3640 = vmatprep.subr.bf16.mxu1 %v3702_v60 }
 0x1ad   : > { %3628 = vmatprep.mubr.msk.bf16.mxu0 %vm1579_vm11, %v1549_v16 }
 0x1ae   : > { %3629 = vmatmul.mubr.msk.bf16.gmra.mxu0 %vm1579_vm11, %v1551_v11  ;;  %2703 = vrot.lane.b32.xlu0 %v2335_v17, %s3721_s22 }
 0x1af   : > { %2561 = vrot.lane.b32.xlu1 %v2335_v17, %s3718_s11  ;;  %3641 = vmatpush3.bf16.msra.mxu1 %v3702_v60 }
 0x1b1   : > { %v3606_v36 = vpop.f32.mrf.mxu0 }
 0x1b2   : > { %v1789_v19 = vmul.f32 %v3606_v36, %v4362_v23  ;;  %2419 = vrot.lane.b32.xlu0 %v2335_v17, %s3715_s8 }
 0x1b3   : > { %2371 = vrot.lane.b32.xlu1 %v2287_v6, %s3714_s30  ;;  %v1666_v21 = vpop.f32.mrf.mxu0 }
 0x1b4   : > { %v1827_v37 = vadd.f32 %v4368_v2, %v1789_v19  ;;  %v1787_v25 = vmul.f32 %v4362_v23, %v1666_v21 }
 0x1b5   : > { %v3607_v28 = vpop.f32.mrf.mxu0 }
 0x1b6   : > { %v1859_v13 = vmax.f32 %v1827_v37, 0.0  ;;  %v1825_v35 = vadd.f32 %v4368_v2, %v1787_v25  ;;  %v1790_v30 = vmul.f32 %v3607_v28, %v4362_v23  ;;  %2463 = vrot.lane.b32.xlu0 %v4418_v26, %s3716_s9 }
 0x1b7   : > { %2369 = vrot.lane.b32.xlu1 %v1999_v29, %s3714_s30  ;;  %v1669_v34 = vpop.f32.mrf.mxu0 }
 0x1b8   : > { %1892 = vst.msk [vmem:[#allocation3 + $0x61] sm:$0xff] %vm280_vm0, %v1859_v13  ;;  %v1857_v45 = vmax.f32 %v1825_v35, 0.0  ;;  %v1828_v38 = vadd.f32 %v4368_v2, %v1790_v30  ;;  %v1788_v39 = vmul.f32 %v4362_v23, %v1669_v34 }
 0x1ba   : > { %1890 = vst.msk [vmem:[#allocation3 + $0x49] sm:$0xff] %vm280_vm0, %v1857_v45  ;;  %v1860_v41 = vmax.f32 %v1828_v38, 0.0  ;;  %v1826_v42 = vadd.f32 %v4368_v2, %v1788_v39  ;;  %2511 = vrot.lane.b32.xlu0 %v1999_v29, %s3717_s10 }
 0x1bb   : > { %2417 = vrot.lane.b32.xlu1 %v2047_v40, %s3715_s8 }
 0x1bc   : > { %1893 = vst.msk [vmem:[#allocation3 + $0x69] sm:$0xff] %vm280_vm0, %v1860_v41  ;;  %v1858_v43 = vmax.f32 %v1826_v42, 0.0 }
 0x1be   : > { %1891 = vst.msk [vmem:[#allocation3 + $0x51] sm:$0xff] %vm280_vm0, %v1858_v43  ;;  %2559 = vrot.lane.b32.xlu0 %v2047_v40, %s3718_s11 }
 0x1bf   : > { %v2211_v47 = vld [vmem:[#allocation3 + $0x60] sm:$0xff] }
 0x1c0   : > { %v2259_v54 = vld [vmem:[#allocation3 + $0x61] sm:$0xff] }
 0x1c1   : > { %v2209_v3 = vld [vmem:[#allocation3 + $0x48] sm:$0xff] }
 0x1c2   : > { %v2257_v11 = vld [vmem:[#allocation3 + $0x49] sm:$0xff] }
 0x1c3   : > { %v2212_v48 = vld [vmem:[#allocation3 + $0x68] sm:$0xff] }
 0x1c4   : > { %v4446_v51 = vpack.c.bf16 %v2212_v48, %v2211_v47  ;;  %v2260_v52 = vld [vmem:[#allocation3 + $0x69] sm:$0xff] }
 0x1c5   : > { %v2289_v55 = vpack.c.bf16 %v2260_v52, %v2259_v54  ;;  %v2307_v57 = vld [vmem:[#allocation3 + $0x62] sm:$0xff]  ;;  %v2308_v58 = vld [vmem:[#allocation3 + $0x6a] sm:$0xff]  ;;  %v2306_v63 = vld [vmem:[#allocation3 + $0x52] sm:$0xff] }
 0x1c6   : > { %2611 = vrot.lane.b32.xlu0 %v4446_v51, %s3719_s16  ;;  %2469 = vrot.lane.b32.xlu1 %v4446_v51, %s3716_s9  ;;  %v2337_v61 = vpack.c.bf16 %v2308_v58, %v2307_v57  ;;  %v2305_v33 = vld [vmem:[#allocation3 + $0x4a] sm:$0xff] }
 0x1c7   : > { %v2210_v0 = vld [vmem:[#allocation3 + $0x50] sm:$0xff]  ;;  %v2336_v7 = vpack.c.bf16 %v2306_v63, %v2305_v33 }
 0x1c8   : > { %v4467_v8 = vpack.c.bf16 %v2210_v0, %v2209_v3  ;;  %v2258_v10 = vld [vmem:[#allocation3 + $0x51] sm:$0xff] }
 0x1c9   : > { %v2288_v36 = vpack.c.bf16 %v2258_v10, %v2257_v11 }
 0x1ca   : > { %2659 = vrot.lane.b32.xlu0 %v2289_v55, %s3720_s19  ;;  %2517 = vrot.lane.b32.xlu1 %v2289_v55, %s3717_s10 }
 0x1ce   : > { %2707 = vrot.lane.b32.xlu0 %v2337_v61, %s3721_s22  ;;  %2565 = vrot.lane.b32.xlu1 %v2337_v61, %s3718_s11 }
 0x1d1   : > { %v3610_v62 = vpop.f32.mrf.mxu0 }
 0x1d2   : > { %v1793_v1 = vmul.f32 %v3610_v62, %v4362_v23  ;;  %2423 = vrot.lane.b32.xlu0 %v2337_v61, %s3715_s8  ;;  %2375 = vrot.lane.b32.xlu1 %v2289_v55, %s3714_s30 }
 0x1d3   : > { %v1682_v5 = vpop.f32.mrf.mxu0 }
 0x1d4   : > { %v1831_v4 = vadd.f32 %v4368_v2, %v1793_v1  ;;  %v1791_v6 = vmul.f32 %v4362_v23, %v1682_v5 }
 0x1d5   : > { %v3611_v9 = vpop.f32.mrf.mxu0 }
 0x1d6   : > { %v1863_v49 = vmax.f32 %v1831_v4, 0.0  ;;  %v1829_v12 = vadd.f32 %v4368_v2, %v1791_v6  ;;  %v1794_v14 = vmul.f32 %v3611_v9, %v4362_v23  ;;  %2705 = vrot.lane.b32.xlu0 %v2336_v7, %s3721_s22  ;;  %2609 = vrot.lane.b32.xlu1 %v4467_v8, %s3719_s16 }
 0x1d7   : > { %v1685_v15 = vpop.f32.mrf.mxu0 }
 0x1d8   : > { %1896 = vst.msk [vmem:[#allocation3 + $0x91] sm:$0xff] %vm280_vm0, %v1863_v49  ;;  %v1861_v59 = vmax.f32 %v1829_v12, 0.0  ;;  %v1832_v16 = vadd.f32 %v4368_v2, %v1794_v14  ;;  %v1792_v17 = vmul.f32 %v4362_v23, %v1685_v15  ;;  %v2368_v49 = vpop.permute.xlu0 %2367 }
 0x1da   : > { %1894 = vst.msk [vmem:[#allocation3 + $0x79] sm:$0xff] %vm280_vm0, %v1861_v59  ;;  %v1864_v24 = vmax.f32 %v1832_v16, 0.0  ;;  %v1830_v19 = vadd.f32 %v4368_v2, %v1792_v17  ;;  %2657 = vrot.lane.b32.xlu1 %v2288_v36, %s3720_s19  ;;  %2467 = vrot.lane.b32.xlu0 %v4467_v8, %s3716_s9 }
 0x1dc   : > { %1897 = vst.msk [vmem:[#allocation3 + $0x99] sm:$0xff] %vm280_vm0, %v1864_v24  ;;  %v1862_v20 = vmax.f32 %v1830_v19, 0.0  ;;  %v2416_v17 = vpop.permute.xlu0 %2415 }
 0x1de   : > { %1895 = vst.msk [vmem:[#allocation3 + $0x81] sm:$0xff] %vm280_vm0, %v1862_v20  ;;  %2515 = vrot.lane.b32.xlu0 %v2288_v36, %s3717_s10  ;;  %2373 = vrot.lane.b32.xlu1 %v2288_v36, %s3714_s30 }
 0x1df   : > { %v2215_v21 = vld [vmem:[#allocation3 + $0x90] sm:$0xff] }
 0x1e0   : > { %v2263_v27 = vld [vmem:[#allocation3 + $0x91] sm:$0xff] }
 0x1e1   : > { %v2213_v39 = vld [vmem:[#allocation3 + $0x78] sm:$0xff] }
 0x1e2   : > { %2563 = vrot.lane.b32.xlu0 %v2336_v7, %s3718_s11  ;;  %2421 = vrot.lane.b32.xlu1 %v2336_v7, %s3715_s8  ;;  %v2261_v52 = vld [vmem:[#allocation3 + $0x79] sm:$0xff] }
 0x1e3   : > { %v2216_v22 = vld [vmem:[#allocation3 + $0x98] sm:$0xff] }
 0x1e4   : > { %v4488_v37 = vpack.c.bf16 %v2216_v22, %v2215_v21  ;;  %v2264_v25 = vld [vmem:[#allocation3 + $0x99] sm:$0xff] }
 0x1e5   : > { %v2291_v28 = vpack.c.bf16 %v2264_v25, %v2263_v27  ;;  %v2311_v29 = vld [vmem:[#allocation3 + $0x92] sm:$0xff]  ;;  %v2312_v13 = vld [vmem:[#allocation3 + $0x9a] sm:$0xff]  ;;  %v2310_v32 = vld [vmem:[#allocation3 + $0x82] sm:$0xff] }
 0x1e6   : > { %2615 = vrot.lane.b32.xlu0 %v4488_v37, %s3719_s16  ;;  %2473 = vrot.lane.b32.xlu1 %v4488_v37, %s3716_s9  ;;  %v2339_v35 = vpack.c.bf16 %v2312_v13, %v2311_v29  ;;  %v2309_v31 = vld [vmem:[#allocation3 + $0x7a] sm:$0xff] }
 0x1e7   : > { %v2214_v34 = vld [vmem:[#allocation3 + $0x80] sm:$0xff]  ;;  %v2338_v42 = vpack.c.bf16 %v2310_v32, %v2309_v31 }
 0x1e8   : > { %v4503_v18 = vpack.c.bf16 %v2214_v34, %v2213_v39  ;;  %v2262_v44 = vld [vmem:[#allocation3 + $0x81] sm:$0xff] }
 0x1e9   : > { %v2290_v57 = vpack.c.bf16 %v2262_v44, %v2261_v52 }
 0x1ea   : > { %2663 = vrot.lane.b32.xlu0 %v2291_v28, %s3720_s19  ;;  %2521 = vrot.lane.b32.xlu1 %v2291_v28, %s3717_s10 }
 0x1ee   : > { %2711 = vrot.lane.b32.xlu0 %v2339_v35, %s3721_s22  ;;  %2569 = vrot.lane.b32.xlu1 %v2339_v35, %s3718_s11 }
 0x1f1   : > { %v3614_v30 = vpop.f32.mrf.mxu0 }
 0x1f2   : > { %v1797_v45 = vmul.f32 %v3614_v30, %v4362_v23  ;;  %2427 = vrot.lane.b32.xlu0 %v2339_v35, %s3715_s8  ;;  %2379 = vrot.lane.b32.xlu1 %v2291_v28, %s3714_s30 }
 0x1f3   : > { %v1698_v38 = vpop.f32.mrf.mxu0 }
 0x1f4   : > { %v1835_v40 = vadd.f32 %v4368_v2, %v1797_v45  ;;  %v1795_v41 = vmul.f32 %v4362_v23, %v1698_v38 }
 0x1f5   : > { %v3615_v43 = vpop.f32.mrf.mxu0 }
 0x1f6   : > { %v1867_v46 = vmax.f32 %v1835_v40, 0.0  ;;  %v1833_v50 = vadd.f32 %v4368_v2, %v1795_v41  ;;  %v1798_v47 = vmul.f32 %v3615_v43, %v4362_v23  ;;  %2709 = vrot.lane.b32.xlu0 %v2338_v42, %s3721_s22  ;;  %2613 = vrot.lane.b32.xlu1 %v4503_v18, %s3719_s16  ;;  %v1919_v43 = vld [vmem:[#allocation3 + $0x8] sm:$0xff] }
 0x1f7   : > { %v1701_v48 = vpop.f32.mrf.mxu0 }
 0x1f8   : > { %1900 = vst.msk [vmem:[#allocation3 + $0xc1] sm:$0xff] %vm280_vm0, %v1867_v46  ;;  %v1865_v53 = vmax.f32 %v1833_v50, 0.0  ;;  %v1836_v54 = vadd.f32 %v4368_v2, %v1798_v47  ;;  %v1796_v55 = vmul.f32 %v4362_v23, %v1701_v48 }
 0x1fa   : > { %1898 = vst.msk [vmem:[#allocation3 + $0xa9] sm:$0xff] %vm280_vm0, %v1865_v53  ;;  %v1868_v58 = vmax.f32 %v1836_v54, 0.0  ;;  %v1834_v60 = vadd.f32 %v4368_v2, %v1796_v55  ;;  %2661 = vrot.lane.b32.xlu1 %v2290_v57, %s3720_s19  ;;  %2471 = vrot.lane.b32.xlu0 %v4503_v18, %s3716_s9 }
 0x1fc   : > { %1901 = vst.msk [vmem:[#allocation3 + $0xc9] sm:$0xff] %vm280_vm0, %v1868_v58  ;;  %v1866_v61 = vmax.f32 %v1834_v60, 0.0 }
 0x1fe   : > { %1899 = vst.msk [vmem:[#allocation3 + $0xb1] sm:$0xff] %vm280_vm0, %v1866_v61  ;;  %2519 = vrot.lane.b32.xlu0 %v2290_v57, %s3717_s10  ;;  %2377 = vrot.lane.b32.xlu1 %v2290_v57, %s3714_s30 }
 0x1ff   : > { %v2219_v62 = vld [vmem:[#allocation3 + $0xc0] sm:$0xff] }
 0x200   : > { %v2267_v1 = vld [vmem:[#allocation3 + $0xc1] sm:$0xff] }
 0x201   : > { %v2217_v14 = vld [vmem:[#allocation3 + $0xa8] sm:$0xff] }
 0x202   : > { %2567 = vrot.lane.b32.xlu0 %v2338_v42, %s3718_s11  ;;  %2425 = vrot.lane.b32.xlu1 %v2338_v42, %s3715_s8  ;;  %v2265_v24 = vld [vmem:[#allocation3 + $0xa9] sm:$0xff]  ;;  %v1918_v42 = vld [vmem:[#allocation3] sm:$0xff] }
 0x203   : > { %v2220_v33 = vld [vmem:[#allocation3 + $0xc8] sm:$0xff]  ;;  %v1950_v47 = vpack.c.bf16 %v1919_v43, %v1918_v42 }
 0x204   : > { %v2245_v63 = vpack.c.bf16 %v2220_v33, %v2219_v62  ;;  %v2268_v0 = vld [vmem:[#allocation3 + $0xc9] sm:$0xff] }
 0x205   : > { %v2293_v5 = vpack.c.bf16 %v2268_v0, %v2267_v1  ;;  %v2172_v3 = vld [vmem:[#allocation3 + $0xc2] sm:$0xff]  ;;  %v2173_v4 = vld [vmem:[#allocation3 + $0xca] sm:$0xff]  ;;  %v2314_v7 = vld [vmem:[#allocation3 + $0xb2] sm:$0xff]  ;;  %v2737_v61 = vsel %vm280_vm0, %v1950_v47, %v2368_v49 }
 0x206   : > { %2619 = vrot.lane.b32.xlu0 %v2245_v63, %s3719_s16  ;;  %2477 = vrot.lane.b32.xlu1 %v2245_v63, %s3716_s9  ;;  %v2313_v6 = vld [vmem:[#allocation3 + $0xaa] sm:$0xff]  ;;  %v4528_v9 = vpack.c.bf16 %v2173_v4, %v2172_v3  ;;  %v2784_v63 = vsel %vm1321_vm4, %v2737_v61, %v2416_v17 }
 0x207   : > { %v2340_v10 = vpack.c.bf16 %v2314_v7, %v2313_v6  ;;  %v2218_v12 = vld [vmem:[#allocation3 + $0xb0] sm:$0xff] }
 0x208   : > { %v4533_v15 = vpack.c.bf16 %v2218_v12, %v2217_v14  ;;  %v2266_v59 = vld [vmem:[#allocation3 + $0xb1] sm:$0xff] }
 0x209   : > { %v2292_v21 = vpack.c.bf16 %v2266_v59, %v2265_v24 }
 0x20a   : > { %2667 = vrot.lane.b32.xlu0 %v2293_v5, %s3720_s19  ;;  %2525 = vrot.lane.b32.xlu1 %v2293_v5, %s3717_s10 }
 0x20e   : > { %2573 = vrot.lane.b32.xlu1 %v4528_v9, %s3718_s11  ;;  %2713 = vrot.lane.b32.xlu0 %v2340_v10, %s3721_s22 }
 0x211   : > { %v3618_v11 = vpop.f32.mrf.mxu0 }
 0x212   : > { %v1801_v16 = vmul.f32 %v3618_v11, %v4362_v23  ;;  %2617 = vrot.lane.b32.xlu1 %v4533_v15, %s3719_s16  ;;  %2475 = vrot.lane.b32.xlu0 %v4533_v15, %s3716_s9 }
 0x213   : > { %v1714_v36 = vpop.f32.mrf.mxu0 }
 0x214   : > { %v1839_v19 = vadd.f32 %v4368_v2, %v1801_v16  ;;  %v1799_v20 = vmul.f32 %v4362_v23, %v1714_v36 }
 0x215   : > { %v3619_v22 = vpop.f32.mrf.mxu0 }
 0x216   : > { %v1871_v25 = vmax.f32 %v1839_v19, 0.0  ;;  %v1837_v27 = vadd.f32 %v4368_v2, %v1799_v20  ;;  %v1802_v28 = vmul.f32 %v3619_v22, %v4362_v23  ;;  %2665 = vrot.lane.b32.xlu1 %v2292_v21, %s3720_s19  ;;  %2523 = vrot.lane.b32.xlu0 %v2292_v21, %s3717_s10 }
 0x217   : > { %v1717_v29 = vpop.f32.mrf.mxu0 }
 0x218   : > { %1904 = vst.msk [vmem:[#allocation3 + $0xf1] sm:$0xff] %vm280_vm0, %v1871_v25  ;;  %v1869_v13 = vmax.f32 %v1837_v27, 0.0  ;;  %v1840_v35 = vadd.f32 %v4368_v2, %v1802_v28  ;;  %v1800_v30 = vmul.f32 %v4362_v23, %v1717_v29  ;;  %v2608_v31 = vpop.permute.xlu0 %2607  ;;  %v4549_v32 = vpop.permute.xlu1 %2465 }
 0x21a   : > { %1902 = vst.msk [vmem:[#allocation3 + $0xd9] sm:$0xff] %vm280_vm0, %v1869_v13  ;;  %v1872_v34 = vmax.f32 %v1840_v35, 0.0  ;;  %v1838_v45 = vadd.f32 %v4368_v2, %v1800_v30  ;;  %2571 = vrot.lane.b32.xlu0 %v2340_v10, %s3718_s11  ;;  %2381 = vrot.lane.b32.xlu1 %v2292_v21, %s3714_s30 }
 0x21c   : > { %1905 = vst.msk [vmem:[#allocation3 + $0xf9] sm:$0xff] %vm280_vm0, %v1872_v34  ;;  %v1870_v38 = vmax.f32 %v1838_v45, 0.0  ;;  %v2656_v39 = vpop.permute.xlu0 %2655  ;;  %v4556_v40 = vpop.permute.xlu1 %2513 }
 0x21e   : > { %1903 = vst.msk [vmem:[#allocation3 + $0xe1] sm:$0xff] %vm280_vm0, %v1870_v38  ;;  %2715 = vrot.lane.b32.xlu0 %v4528_v9, %s3721_s22  ;;  %2429 = vrot.lane.b32.xlu1 %v2340_v10, %s3715_s8 }
 0x21f   : > { %v2080_v24 = vld [vmem:[#allocation3 + $0xf0] sm:$0xff] }
 0x220   : > { %v2704_v41 = vpop.permute.xlu0 %2703 }
 0x221   : > { %v4562_v44 = vpop.permute.xlu1 %2561  ;;  %v2221_v50 = vld [vmem:[#allocation3 + $0xd8] sm:$0xff] }
 0x222   : > { %2383 = vrot.lane.b32.xlu1 %v2293_v5, %s3714_s30  ;;  %v2269_v62 = vld [vmem:[#allocation3 + $0xd9] sm:$0xff] }
 0x223   : > { %v2081_v14 = vld [vmem:[#allocation3 + $0xf8] sm:$0xff] }
 0x224   : > { %v4565_v46 = vpop.permute.xlu0 %2419  ;;  %v4596_v22 = vpack.c.bf16 %v2081_v14, %v2080_v24  ;;  %v2129_v27 = vld [vmem:[#allocation3 + $0xf9] sm:$0xff] }
 0x225   : > { %v2317_v48 = vld [vmem:[#allocation3 + $0xda] sm:$0xff]  ;;  %v2318_v52 = vld [vmem:[#allocation3 + $0xe2] sm:$0xff]  ;;  %v4569_v58 = vpop.permute.xlu1 %2371 }
 0x226   : > { %v2222_v53 = vld [vmem:[#allocation3 + $0xe0] sm:$0xff]  ;;  %v2342_v54 = vpack.c.bf16 %v2318_v52, %v2317_v48 }
 0x227   : > { %v4567_v55 = vpack.c.bf16 %v2222_v53, %v2221_v50  ;;  %v2270_v57 = vld [vmem:[#allocation3 + $0xe1] sm:$0xff] }
 0x228   : > { %v2464_v60 = vpop.permute.xlu0 %2463  ;;  %2717 = vrot.lane.b32.xlu0 %v2342_v54, %s3721_s22  ;;  %v2294_v33 = vpack.c.bf16 %v2270_v57, %v2269_v62 }
 0x229   : > { %2621 = vrot.lane.b32.xlu1 %v4567_v55, %s3719_s16  ;;  %v2370_v1 = vpop.permute.xlu1 %2369  ;;  %v2816_v5 = vsel %vm1354_vm5, %v2784_v63, %v2464_v60 }
 0x22a   : > { %v2740_v53 = vsel %vm280_vm0, %v4418_v26, %v2370_v1 }
 0x22c   : > { %v2512_v0 = vpop.permute.xlu0 %2511  ;;  %2431 = vrot.lane.b32.xlu0 %v4528_v9, %s3715_s8 }
 0x22d   : > { %2669 = vrot.lane.b32.xlu1 %v2294_v33, %s3720_s19  ;;  %v2848_v3 = vsel %vm1387_vm6, %v2816_v5, %v2512_v0  ;;  %v2418_v11 = vpop.permute.xlu1 %2417 }
 0x230   : > { %v2560_v4 = vpop.permute.xlu0 %2559  ;;  %2479 = vrot.lane.b32.xlu0 %v4567_v55, %s3716_s9 }
 0x231   : > { %2385 = vrot.lane.b32.xlu1 %v2294_v33, %s3714_s30  ;;  %v2880_v6 = vsel %vm1420_vm7, %v2848_v3, %v2560_v4  ;;  %v3622_v7 = vpop.f32.mrf.mxu0 }
 0x232   : > { %v2912_v10 = vsel %vm1453_vm8, %v2880_v6, %v2608_v31  ;;  %v1805_v9 = vmul.f32 %v3622_v7, %v4362_v23  ;;  %v2128_v31 = vld [vmem:[#allocation3 + $0xf1] sm:$0xff] }
 0x233   : > { %v1730_v49 = vpop.f32.mrf.mxu0  ;;  %v2944_v12 = vsel %vm1486_vm9, %v2912_v10, %v2656_v39  ;;  %v2151_v38 = vpack.c.bf16 %v2129_v27, %v2128_v31  ;;  %v2176_v39 = vld [vmem:[#allocation3 + $0xf2] sm:$0xff] }
 0x234   : > { %v1843_v59 = vadd.f32 %v4368_v2, %v1805_v9  ;;  %v1803_v16 = vmul.f32 %v4362_v23, %v1730_v49  ;;  %2527 = vrot.lane.b32.xlu0 %v2294_v33, %s3717_s10  ;;  %v2976_v17 = vsel %vm1519_vm10, %v2944_v12, %v2704_v41  ;;  %v2177_v41 = vld [vmem:[#allocation3 + $0xfa] sm:$0xff] }
 0x235   : > { %2433 = vrot.lane.b32.xlu1 %v2342_v54, %s3715_s8  ;;  %v3623_v36 = vpop.f32.mrf.mxu0  ;;  %3642 = vmatprep.mubr.msk.bf16.mxu1 %vm1579_vm11, %v2976_v17  ;;  %v2199_v47 = vpack.c.bf16 %v2177_v41, %v2176_v39 }
 0x236   : > { %v1875_v19 = vmax.f32 %v1843_v59, 0.0  ;;  %v1841_v20 = vadd.f32 %v4368_v2, %v1803_v16  ;;  %v1806_v21 = vmul.f32 %v3623_v36, %v4362_v23 }
 0x237   : > { %v1733_v25 = vpop.f32.mrf.mxu0 }
 0x238   : > { %1908 = vst.msk [vmem:[#allocation3 + $0x121] sm:$0xff] %vm280_vm0, %v1875_v19  ;;  %v1873_v28 = vmax.f32 %v1841_v20, 0.0  ;;  %v1844_v29 = vadd.f32 %v4368_v2, %v1806_v21  ;;  %v1804_v13 = vmul.f32 %v4362_v23, %v1733_v25  ;;  %v4601_v35 = vpop.permute.xlu0 %2611  ;;  %v4603_v30 = vpop.permute.xlu1 %2469  ;;  %2575 = vrot.lane.b32.xlu0 %v2342_v54, %s3718_s11  ;;  %v2786_v54 = vsel %vm1321_vm4, %v2740_v53, %v2418_v11 }
 0x239   : > { %2481 = vrot.lane.b32.xlu1 %v4596_v22, %s3716_s9  ;;  %v2818_v62 = vsel %vm1354_vm5, %v2786_v54, %v4549_v32  ;;  %v2743_v11 = vsel %vm280_vm0, %v4385_v56, %v4569_v58 }
 0x23a   : > { %1906 = vst.msk [vmem:[#allocation3 + $0x109] sm:$0xff] %vm280_vm0, %v1873_v28  ;;  %v1876_v34 = vmax.f32 %v1844_v29, 0.0  ;;  %v1842_v45 = vadd.f32 %v4368_v2, %v1804_v13  ;;  %v2850_v1 = vsel %vm1387_vm6, %v2818_v62, %v4556_v40  ;;  %v2788_v17 = vsel %vm1321_vm4, %v2743_v11, %v4565_v46 }
 0x23b   : > { %v2882_v32 = vsel %vm1420_vm7, %v2850_v1, %v4562_v44 }
 0x23c   : > { %1909 = vst.msk [vmem:[#allocation3 + $0x129] sm:$0xff] %vm280_vm0, %v1876_v34  ;;  %v1874_v42 = vmax.f32 %v1842_v45, 0.0  ;;  %v4611_v43 = vpop.permute.xlu0 %2659  ;;  %v4613_v50 = vpop.permute.xlu1 %2517  ;;  %2623 = vrot.lane.b32.xlu0 %v4596_v22, %s3719_s16 }
 0x23d   : > { %2529 = vrot.lane.b32.xlu1 %v2151_v38, %s3717_s10 }
 0x23e   : > { %1907 = vst.msk [vmem:[#allocation3 + $0x111] sm:$0xff] %vm280_vm0, %v1874_v42 }
 0x240   : > { %v4619_v48 = vpop.permute.xlu0 %2707  ;;  %v4621_v52 = vpop.permute.xlu1 %2565  ;;  %2671 = vrot.lane.b32.xlu0 %v2151_v38, %s3720_s19 }
 0x241   : > { %2577 = vrot.lane.b32.xlu1 %v2199_v47, %s3718_s11  ;;  %v2225_v61 = vld [vmem:[#allocation3 + $0x108] sm:$0xff] }
 0x242   : > { %v2273_v7 = vld [vmem:[#allocation3 + $0x109] sm:$0xff] }
 0x243   : > { %v2324_v1 = vld [vmem:[#allocation3 + $0x12a] sm:$0xff] }
 0x244   : > { %v4628_v57 = vpop.permute.xlu0 %2423  ;;  %v4630_v60 = vpop.permute.xlu1 %2375  ;;  %2719 = vrot.lane.b32.xlu0 %v2199_v47, %s3721_s22 }
 0x245   : > { %v2321_v33 = vld [vmem:[#allocation3 + $0x10a] sm:$0xff]  ;;  %v2322_v63 = vld [vmem:[#allocation3 + $0x112] sm:$0xff] }
 0x246   : > { %v2226_v0 = vld [vmem:[#allocation3 + $0x110] sm:$0xff]  ;;  %v2344_v5 = vpack.c.bf16 %v2322_v63, %v2321_v33 }
 0x247   : > { %v4635_v3 = vpack.c.bf16 %v2226_v0, %v2225_v61  ;;  %v2274_v4 = vld [vmem:[#allocation3 + $0x111] sm:$0xff]  ;;  %v2276_v33 = vld [vmem:[#allocation3 + $0x129] sm:$0xff] }
 0x248   : > { %v2706_v26 = vpop.permute.xlu0 %2705  ;;  %v2610_v6 = vpop.permute.xlu1 %2609  ;;  %2721 = vrot.lane.b32.xlu0 %v2344_v5, %s3721_s22  ;;  %v2296_v10 = vpack.c.bf16 %v2274_v4, %v2273_v7 }
 0x249   : > { %2625 = vrot.lane.b32.xlu1 %v4635_v3, %s3719_s16  ;;  %v2914_v9 = vsel %vm1453_vm8, %v2882_v32, %v2610_v6 }
 0x24c   : > { %v2658_v49 = vpop.permute.xlu1 %2657  ;;  %v2468_v12 = vpop.permute.xlu0 %2467  ;;  %2435 = vrot.lane.b32.xlu0 %v2199_v47, %s3715_s8 }
 0x24d   : > { %2673 = vrot.lane.b32.xlu1 %v2296_v10, %s3720_s19  ;;  %v2946_v40 = vsel %vm1486_vm9, %v2914_v9, %v2658_v49  ;;  %v2820_v24 = vsel %vm1354_vm5, %v2788_v17, %v2468_v12 }
 0x24e   : > { %v2978_v14 = vsel %vm1519_vm10, %v2946_v40, %v2706_v26  ;;  %v2323_v26 = vld [vmem:[#allocation3 + $0x122] sm:$0xff] }
 0x24f   : > { %3643 = vmatmul.mubr.msk.bf16.vlgmr.msra.gmra.mxu1 %vm1579_vm11, %v2978_v14  ;;  %v2345_v9 = vpack.c.bf16 %v2324_v1, %v2323_v26 }
 0x250   : > { %v2516_v59 = vpop.permute.xlu0 %2515  ;;  %v2374_v44 = vpop.permute.xlu1 %2373  ;;  %2483 = vrot.lane.b32.xlu0 %v4635_v3, %s3716_s9 }
 0x251   : > { %2387 = vrot.lane.b32.xlu1 %v2151_v38, %s3714_s30  ;;  %v3626_v16 = vpop.f32.mrf.mxu0  ;;  %v2852_v56 = vsel %vm1387_vm6, %v2820_v24, %v2516_v59  ;;  %v2228_v38 = vld [vmem:[#allocation3 + $0x128] sm:$0xff] }
 0x252   : > { %v1809_v36 = vmul.f32 %v3626_v16, %v4362_v23 }
 0x253   : > { %v1746_v19 = vpop.f32.mrf.mxu0 }
 0x254   : > { %v1847_v58 = vadd.f32 %v4368_v2, %v1809_v36  ;;  %v1807_v20 = vmul.f32 %v4362_v23, %v1746_v19  ;;  %v2564_v21 = vpop.permute.xlu0 %2563  ;;  %v2422_v25 = vpop.permute.xlu1 %2421  ;;  %2531 = vrot.lane.b32.xlu0 %v2296_v10, %s3717_s10 }
 0x255   : > { %2389 = vrot.lane.b32.xlu1 %v2296_v10, %s3714_s30  ;;  %v2884_v27 = vsel %vm1420_vm7, %v2852_v56, %v2564_v21  ;;  %v3627_v46 = vpop.f32.mrf.mxu0  ;;  %v2746_v10 = vsel %vm280_vm0, %v4467_v8, %v2374_v44 }
 0x256   : > { %v1879_v28 = vmax.f32 %v1847_v58, 0.0  ;;  %v1845_v29 = vadd.f32 %v4368_v2, %v1807_v20  ;;  %v2916_v13 = vsel %vm1453_vm8, %v2884_v27, %v4601_v35  ;;  %v1810_v31 = vmul.f32 %v3627_v46, %v4362_v23 }
 0x257   : > { %v1749_v34 = vpop.f32.mrf.mxu0  ;;  %v2948_v45 = vsel %vm1486_vm9, %v2916_v13, %v4611_v43  ;;  %v2227_v43 = vld [vmem:[#allocation3 + $0x120] sm:$0xff]  ;;  %v2790_v32 = vsel %vm1321_vm4, %v2746_v10, %v2422_v25 }
 0x258   : > { %1912 = vst.msk [vmem:[#allocation3 + $0x151] sm:$0xff] %vm280_vm0, %v1879_v28  ;;  %v1877_v39 = vmax.f32 %v1845_v29, 0.0  ;;  %v1808_v41 = vmul.f32 %v4362_v23, %v1749_v34  ;;  %v4674_v42 = vpop.permute.xlu0 %2615  ;;  %v4676_v47 = vpop.permute.xlu1 %2473  ;;  %2579 = vrot.lane.b32.xlu0 %v2344_v5, %s3718_s11  ;;  %v2980_v35 = vsel %vm1519_vm10, %v2948_v45, %v4619_v48  ;;  %v1848_v53 = vadd.f32 %v4368_v2, %v1810_v31  ;;  %v2275_v48 = vld [vmem:[#allocation3 + $0x121] sm:$0xff] }
 0x259   : > { %2437 = vrot.lane.b32.xlu1 %v2344_v5, %s3715_s8  ;;  %3646 = vmatprep.mubr.msk.bf16.mxu1 %vm1579_vm11, %v2980_v35  ;;  %v4686_v61 = vpack.c.bf16 %v2228_v38, %v2227_v43  ;;  %v2297_v4 = vpack.c.bf16 %v2276_v33, %v2275_v48  ;;  %v2822_v14 = vsel %vm1354_vm5, %v2790_v32, %v4603_v30 }
 0x25a   : > { %1910 = vst.msk [vmem:[#allocation3 + $0x139] sm:$0xff] %vm280_vm0, %v1877_v39  ;;  %v1846_v54 = vadd.f32 %v4368_v2, %v1808_v41  ;;  %v1880_v62 = vmax.f32 %v1848_v53, 0.0  ;;  %v2854_v24 = vsel %vm1387_vm6, %v2822_v14, %v4613_v50  ;;  %v2749_v28 = vsel %vm280_vm0, %v4446_v51, %v4630_v60 }
 0x25b   : > { %v2886_v30 = vsel %vm1420_vm7, %v2854_v24, %v4621_v52  ;;  %v2792_v45 = vsel %vm1321_vm4, %v2749_v28, %v4628_v57 }
 0x25c   : > { %v1878_v63 = vmax.f32 %v1846_v54, 0.0  ;;  %v4688_v0 = vpop.permute.xlu0 %2663  ;;  %v4690_v5 = vpop.permute.xlu1 %2521  ;;  %2627 = vrot.lane.b32.xlu0 %v4686_v61, %s3719_s16  ;;  %1913 = vst.msk [vmem:[#allocation3 + $0x159] sm:$0xff] %vm280_vm0, %v1880_v62 }
 0x25d   : > { %2485 = vrot.lane.b32.xlu1 %v4686_v61, %s3716_s9 }
 0x25e   : > { %1911 = vst.msk [vmem:[#allocation3 + $0x141] sm:$0xff] %vm280_vm0, %v1878_v63 }
 0x260   : > { %v4698_v6 = vpop.permute.xlu0 %2711  ;;  %v4700_v7 = vpop.permute.xlu1 %2569  ;;  %2675 = vrot.lane.b32.xlu0 %v2297_v4, %s3720_s19 }
 0x261   : > { %2533 = vrot.lane.b32.xlu1 %v2297_v4, %s3717_s10  ;;  %v2229_v40 = vld [vmem:[#allocation3 + $0x138] sm:$0xff] }
 0x262   : > { %v2277_v56 = vld [vmem:[#allocation3 + $0x139] sm:$0xff] }
 0x263   : > { %v2232_v1 = vld [vmem:[#allocation3 + $0x158] sm:$0xff] }
 0x264   : > { %v4707_v49 = vpop.permute.xlu0 %2427  ;;  %v4709_v12 = vpop.permute.xlu1 %2379  ;;  %2723 = vrot.lane.b32.xlu0 %v2345_v9, %s3721_s22 }
 0x265   : > { %2581 = vrot.lane.b32.xlu1 %v2345_v9, %s3718_s11  ;;  %v2325_v11 = vld [vmem:[#allocation3 + $0x13a] sm:$0xff]  ;;  %v2326_v59 = vld [vmem:[#allocation3 + $0x142] sm:$0xff] }
 0x266   : > { %v2230_v16 = vld [vmem:[#allocation3 + $0x140] sm:$0xff]  ;;  %v2346_v17 = vpack.c.bf16 %v2326_v59, %v2325_v11 }
 0x267   : > { %v4715_v8 = vpack.c.bf16 %v2230_v16, %v2229_v40  ;;  %v2278_v44 = vld [vmem:[#allocation3 + $0x141] sm:$0xff]  ;;  %v2231_v40 = vld [vmem:[#allocation3 + $0x150] sm:$0xff]  ;;  %v2280_v59 = vld [vmem:[#allocation3 + $0x159] sm:$0xff] }
 0x268   : > { %v2710_v36 = vpop.permute.xlu0 %2709  ;;  %v2614_v19 = vpop.permute.xlu1 %2613  ;;  %2725 = vrot.lane.b32.xlu0 %v2346_v17, %s3721_s22  ;;  %v2298_v58 = vpack.c.bf16 %v2278_v44, %v2277_v56  ;;  %v4771_v14 = vpack.c.bf16 %v2232_v1, %v2231_v40  ;;  %v2328_v56 = vld [vmem:[#allocation3 + $0x15a] sm:$0xff] }
 0x269   : > { %2629 = vrot.lane.b32.xlu1 %v4715_v8, %s3719_s16  ;;  %v2918_v20 = vsel %vm1453_vm8, %v2886_v30, %v2614_v19  ;;  %v2327_v19 = vld [vmem:[#allocation3 + $0x152] sm:$0xff] }
 0x26c   : > { %v2662_v21 = vpop.permute.xlu1 %2661  ;;  %v2472_v25 = vpop.permute.xlu0 %2471  ;;  %2439 = vrot.lane.b32.xlu0 %v2345_v9, %s3715_s8 }
 0x26d   : > { %2677 = vrot.lane.b32.xlu1 %v2298_v58, %s3720_s19  ;;  %v2950_v50 = vsel %vm1486_vm9, %v2918_v20, %v2662_v21  ;;  %v2824_v51 = vsel %vm1354_vm5, %v2792_v45, %v2472_v25  ;;  %v2347_v21 = vpack.c.bf16 %v2328_v56, %v2327_v19  ;;  %v2238_v19 = vld [vmem:[#allocation3 + $0x1a0] sm:$0xff] }
 0x26e   : > { %v3630_v27 = vpop.f32.mrf.mxu0  ;;  %v2982_v46 = vsel %vm1519_vm10, %v2950_v50, %v2710_v36 }
 0x26f   : > { %v1813_v29 = vmul.f32 %v3630_v27, %v4362_v23  ;;  %3647 = vmatmul.mubr.msk.bf16.gmra.mxu1 %vm1579_vm11, %v2982_v46 }
 0x270   : > { %v2520_v52 = vpop.permute.xlu0 %2519  ;;  %v2378_v13 = vpop.permute.xlu1 %2377  ;;  %2487 = vrot.lane.b32.xlu0 %v4715_v8, %s3716_s9 }
 0x271   : > { %2391 = vrot.lane.b32.xlu1 %v2297_v4, %s3714_s30  ;;  %v1851_v31 = vadd.f32 %v4368_v2, %v1813_v29  ;;  %v1762_v34 = vpop.f32.mrf.mxu0  ;;  %v2856_v41 = vsel %vm1387_vm6, %v2824_v51, %v2520_v52 }
 0x272   : > { %v1811_v38 = vmul.f32 %v4362_v23, %v1762_v34 }
 0x273   : > { %v1883_v60 = vmax.f32 %v1851_v31, 0.0  ;;  %v3631_v39 = vpop.f32.mrf.mxu0 }
 0x274   : > { %v1849_v35 = vadd.f32 %v4368_v2, %v1811_v38  ;;  %v1814_v53 = vmul.f32 %v3631_v39, %v4362_v23  ;;  %v2568_v43 = vpop.permute.xlu0 %2567  ;;  %v2426_v54 = vpop.permute.xlu1 %2425  ;;  %2535 = vrot.lane.b32.xlu0 %v2298_v58, %s3717_s10  ;;  %v3703_v23 = vld [vmem:[%s5109_s2] ss:$0 sm:$0xff] }
 0x275   : > { %2393 = vrot.lane.b32.xlu1 %v2298_v58, %s3714_s30  ;;  %1916 = vst.msk [vmem:[#allocation3 + $0x181] sm:$0xff] %vm280_vm0, %v1883_v60  ;;  %v2888_v57 = vsel %vm1420_vm7, %v2856_v41, %v2568_v43  ;;  %v1765_v62 = vpop.f32.mrf.mxu0 }
 0x276   : > { %v1881_v33 = vmax.f32 %v1849_v35, 0.0  ;;  %v1852_v63 = vadd.f32 %v4368_v2, %v1814_v53  ;;  %v2920_v48 = vsel %vm1453_vm8, %v2888_v57, %v4674_v42  ;;  %v1812_v4 = vmul.f32 %v3703_v23, %v1765_v62  ;;  %v3704_v42 = vld [vmem:[%s5110_s3] ss:$0 sm:$0xff] }
 0x277   : > { %v2952_v26 = vsel %vm1486_vm9, %v2920_v48, %v4688_v0 }
 0x278   : > { %1914 = vst.msk [vmem:[#allocation3 + $0x169] sm:$0xff] %vm280_vm0, %v1881_v33  ;;  %v1884_v10 = vmax.f32 %v1852_v63, 0.0  ;;  %v4758_v32 = vpop.permute.xlu0 %2619  ;;  %v4760_v9 = vpop.permute.xlu1 %2477  ;;  %2583 = vrot.lane.b32.xlu0 %v2346_v17, %s3718_s11  ;;  %v2984_v2 = vsel %vm1519_vm10, %v2952_v26, %v4698_v6  ;;  %v1850_v0 = vadd.f32 %v3704_v42, %v1812_v4  ;;  %v2752_v6 = vsel %vm280_vm0, %v4503_v18, %v2378_v13 }
 0x279   : > { %2441 = vrot.lane.b32.xlu1 %v2346_v17, %s3715_s8  ;;  %3650 = vmatprep.mubr.msk.bf16.mxu1 %vm1579_vm11, %v2984_v2  ;;  %v2279_v17 = vld [vmem:[#allocation3 + $0x151] sm:$0xff]  ;;  %v2794_v36 = vsel %vm1321_vm4, %v2752_v6, %v2426_v54 }
 0x27a   : > { %1917 = vst.msk [vmem:[#allocation3 + $0x189] sm:$0xff] %vm280_vm0, %v1884_v10  ;;  %v1882_v11 = vmax.f32 %v1850_v0, 0.0  ;;  %v2299_v24 = vpack.c.bf16 %v2280_v59, %v2279_v17  ;;  %v2826_v20 = vsel %vm1354_vm5, %v2794_v36, %v4676_v47  ;;  %v2755_v47 = vsel %vm280_vm0, %v4488_v37, %v4709_v12 }
 0x27b   : > { %v2858_v18 = vsel %vm1387_vm6, %v2826_v20, %v4690_v5  ;;  %v2796_v39 = vsel %vm1321_vm4, %v2755_v47, %v4707_v49  ;;  %v1935_v47 = vld [vmem:[#allocation3 + $0xc8] sm:$0xff] }
 0x27c   : > { %v2668_v16 = vpop.permute.xlu0 %2667  ;;  %v4773_v44 = vpop.permute.xlu1 %2525  ;;  %2631 = vrot.lane.b32.xlu0 %v4771_v14, %s3719_s16  ;;  %1915 = vst.msk [vmem:[#allocation3 + $0x171] sm:$0xff] %vm280_vm0, %v1882_v11  ;;  %v2890_v5 = vsel %vm1420_vm7, %v2858_v18, %v4700_v7  ;;  %v2235_v1 = vld [vmem:[#allocation3 + $0x180] sm:$0xff] }
 0x27d   : > { %2489 = vrot.lane.b32.xlu1 %v4771_v14, %s3716_s9  ;;  %v2283_v0 = vld [vmem:[#allocation3 + $0x181] sm:$0xff] }
 0x27e   : > { %v2286_v18 = vld [vmem:[#allocation3 + $0x1a1] sm:$0xff] }
 0x27f   : > { %v2233_v29 = vld [vmem:[#allocation3 + $0x168] sm:$0xff] }
 0x280   : > { %v4783_v58 = vpop.permute.xlu1 %2573  ;;  %v2714_v30 = vpop.permute.xlu0 %2713  ;;  %2679 = vrot.lane.b32.xlu0 %v2299_v24, %s3720_s19  ;;  %v2281_v60 = vld [vmem:[#allocation3 + $0x169] sm:$0xff] }
 0x281   : > { %2537 = vrot.lane.b32.xlu1 %v2299_v24, %s3717_s10  ;;  %v2236_v26 = vld [vmem:[#allocation3 + $0x188] sm:$0xff] }
 0x282   : > { %v2253_v2 = vpack.c.bf16 %v2236_v26, %v2235_v1  ;;  %v2284_v42 = vld [vmem:[#allocation3 + $0x189] sm:$0xff] }
 0x283   : > { %v2329_v27 = vld [vmem:[#allocation3 + $0x16a] sm:$0xff]  ;;  %v2330_v46 = vld [vmem:[#allocation3 + $0x172] sm:$0xff]  ;;  %v2331_v17 = vld [vmem:[#allocation3 + $0x182] sm:$0xff] }
 0x284   : > { %v2618_v25 = vpop.permute.xlu1 %2617  ;;  %v2476_v50 = vpop.permute.xlu0 %2475  ;;  %2727 = vrot.lane.b32.xlu0 %v2347_v21, %s3721_s22  ;;  %v2234_v28 = vld [vmem:[#allocation3 + $0x170] sm:$0xff]  ;;  %v2348_v52 = vpack.c.bf16 %v2330_v46, %v2329_v27  ;;  %v2333_v46 = vld [vmem:[#allocation3 + $0x19a] sm:$0xff] }
 0x285   : > { %2585 = vrot.lane.b32.xlu1 %v2347_v21, %s3718_s11  ;;  %v4793_v13 = vpack.c.bf16 %v2234_v28, %v2233_v29  ;;  %v2282_v31 = vld [vmem:[#allocation3 + $0x171] sm:$0xff]  ;;  %v2922_v34 = vsel %vm1453_vm8, %v2890_v5, %v2618_v25  ;;  %v2828_v7 = vsel %vm1354_vm5, %v2796_v39, %v2476_v50  ;;  %v2334_v28 = vld [vmem:[#allocation3 + $0x1a2] sm:$0xff] }
 0x286   : > { %v2300_v12 = vpack.c.bf16 %v2282_v31, %v2281_v60  ;;  %v2350_v5 = vpack.c.bf16 %v2334_v28, %v2333_v46  ;;  %v1934_v31 = vld [vmem:[#allocation3 + $0xc0] sm:$0xff] }
 0x288   : > { %v2666_v45 = vpop.permute.xlu1 %2665  ;;  %v2524_v38 = vpop.permute.xlu0 %2523  ;;  %2729 = vrot.lane.b32.xlu0 %v2348_v52, %s3721_s22 }
 0x289   : > { %2633 = vrot.lane.b32.xlu1 %v4793_v13, %s3719_s16  ;;  %v2954_v51 = vsel %vm1486_vm9, %v2922_v34, %v2666_v45  ;;  %v2860_v41 = vsel %vm1387_vm6, %v2828_v7, %v2524_v38  ;;  %v1958_v34 = vpack.c.bf16 %v1935_v47, %v1934_v31 }
 0x28a   : > { %v2986_v37 = vsel %vm1519_vm10, %v2954_v51, %v2714_v30 }
 0x28b   : > { %3651 = vmatmul.mubr.msk.bf16.gmra.mxu1 %vm1579_vm11, %v2986_v37 }
 0x28c   : > { %v2572_v35 = vpop.permute.xlu0 %2571  ;;  %v2382_v53 = vpop.permute.xlu1 %2381  ;;  %2443 = vrot.lane.b32.xlu0 %v2347_v21, %s3715_s8  ;;  %v2285_v21 = vld [vmem:[#allocation3 + $0x199] sm:$0xff] }
 0x28d   : > { %2681 = vrot.lane.b32.xlu1 %v2300_v12, %s3720_s19  ;;  %v2892_v43 = vsel %vm1420_vm7, %v2860_v41, %v2572_v35  ;;  %v2758_v63 = vsel %vm280_vm0, %v4533_v15, %v2382_v53  ;;  %v2302_v27 = vpack.c.bf16 %v2286_v18, %v2285_v21 }
 0x28e   : > { %v2924_v49 = vsel %vm1453_vm8, %v2892_v43, %v4758_v32 }
 0x28f   : > { %v2956_v54 = vsel %vm1486_vm9, %v2924_v49, %v2668_v16  ;;  %v2301_v16 = vpack.c.bf16 %v2284_v42, %v2283_v0 }
 0x290   : > { %v2716_v57 = vpop.permute.xlu0 %2715  ;;  %v2430_v62 = vpop.permute.xlu1 %2429  ;;  %2491 = vrot.lane.b32.xlu0 %v4793_v13, %s3716_s9 }
 0x291   : > { %2395 = vrot.lane.b32.xlu1 %v2299_v24, %s3714_s30  ;;  %v2988_v33 = vsel %vm1519_vm10, %v2956_v54, %v2716_v57  ;;  %v2798_v48 = vsel %vm1321_vm4, %v2758_v63, %v2430_v62  ;;  %v2237_v24 = vld [vmem:[#allocation3 + $0x198] sm:$0xff] }
 0x292   : > { %3654 = vmatprep.mubr.msk.bf16.mxu1 %vm1579_vm11, %v2988_v33  ;;  %v2830_v4 = vsel %vm1354_vm5, %v2798_v48, %v4760_v9  ;;  %v2254_v20 = vpack.c.bf16 %v2238_v19, %v2237_v24 }
 0x293   : > { %v2862_v15 = vsel %vm1387_vm6, %v2830_v4, %v4773_v44  ;;  %v2332_v44 = vld [vmem:[#allocation3 + $0x18a] sm:$0xff] }
 0x294   : > { %2539 = vrot.lane.b32.xlu0 %v2300_v12, %s3717_s10  ;;  %v2384_v23 = vpop.permute.xlu1 %2383  ;;  %v2894_v9 = vsel %vm1420_vm7, %v2862_v15, %v4783_v58  ;;  %v2349_v30 = vpack.c.bf16 %v2332_v44, %v2331_v17 }
 0x295   : > { %2397 = vrot.lane.b32.xlu1 %v2300_v12, %s3714_s30  ;;  %v2761_v38 = vsel %vm280_vm0, %v1958_v34, %v2384_v23 }
 0x298   : > { %2587 = vrot.lane.b32.xlu0 %v2348_v52, %s3718_s11 }
 0x299   : > { %2445 = vrot.lane.b32.xlu1 %v2348_v52, %s3715_s8 }
 0x29a   : > { %v2718_v10 = vpop.permute.xlu0 %2717 }
 0x29b   : > { %v2622_v32 = vpop.permute.xlu1 %2621 }
 0x29c   : > { %2635 = vrot.lane.b32.xlu0 %v2253_v2, %s3719_s16  ;;  %v2926_v40 = vsel %vm1453_vm8, %v2894_v9, %v2622_v32 }
 0x29d   : > { %2493 = vrot.lane.b32.xlu1 %v2253_v2, %s3716_s9 }
 0x29e   : > { %v2432_v11 = vpop.permute.xlu0 %2431 }
 0x29f   : > { %v2670_v59 = vpop.permute.xlu1 %2669  ;;  %v2800_v60 = vsel %vm1321_vm4, %v2761_v38, %v2432_v11 }
 0x2a0   : > { %v2958_v6 = vsel %vm1486_vm9, %v2926_v40, %v2670_v59  ;;  %2683 = vrot.lane.b32.xlu0 %v2301_v16, %s3720_s19 }
 0x2a1   : > { %2541 = vrot.lane.b32.xlu1 %v2301_v16, %s3717_s10  ;;  %v2990_v36 = vsel %vm1519_vm10, %v2958_v6, %v2718_v10 }
 0x2a2   : > { %3655 = vmatmul.mubr.msk.bf16.gmra.mxu1 %vm1579_vm11, %v2990_v36  ;;  %v2480_v56 = vpop.permute.xlu0 %2479 }
 0x2a3   : > { %v2386_v58 = vpop.permute.xlu1 %2385  ;;  %v2832_v39 = vsel %vm1354_vm5, %v2800_v60, %v2480_v56 }
 0x2a4   : > { %2731 = vrot.lane.b32.xlu0 %v2349_v30, %s3721_s22  ;;  %v2764_v54 = vsel %vm280_vm0, %v4567_v55, %v2386_v58 }
 0x2a5   : > { %2589 = vrot.lane.b32.xlu1 %v2349_v30, %s3718_s11 }
 0x2a6   : > { %v2528_v25 = vpop.permute.xlu0 %2527 }
 0x2a7   : > { %v2434_v50 = vpop.permute.xlu1 %2433  ;;  %v2864_v12 = vsel %vm1387_vm6, %v2832_v39, %v2528_v25 }
 0x2a8   : > { %v2802_v57 = vsel %vm1321_vm4, %v2764_v54, %v2434_v50 }
 0x2a9   : > { %2637 = vrot.lane.b32.xlu1 %v2254_v20, %s3719_s16 }
 0x2aa   : > { %v2576_v29 = vpop.permute.xlu0 %2575 }
 0x2ab   : > { %v2482_v52 = vpop.permute.xlu1 %2481  ;;  %v2896_v7 = vsel %vm1420_vm7, %v2864_v12, %v2576_v29 }
 0x2ac   : > { %v2834_v63 = vsel %vm1354_vm5, %v2802_v57, %v2482_v52 }
 0x2ad   : > { %2685 = vrot.lane.b32.xlu1 %v2302_v27, %s3720_s19  ;;  %s4936_s19 = scalar_lea.vmem %s5114_s7, %s3546_s26 }
 0x2ae   : > { %v2624_v45 = vpop.permute.xlu0 %2623 }
 0x2af   : > { %v2530_v51 = vpop.permute.xlu1 %2529  ;;  %v2928_v41 = vsel %vm1453_vm8, %v2896_v7, %v2624_v45 }
 0x2b0   : > { %v2866_v48 = vsel %vm1387_vm6, %v2834_v63, %v2530_v51 }
 0x2b1   : > { %2733 = vrot.lane.b32.xlu1 %v2350_v5, %s3721_s22 }
 0x2b2   : > { %v2672_v37 = vpop.permute.xlu0 %2671 }
 0x2b3   : > { %v2960_v35 = vsel %vm1486_vm9, %v2928_v41, %v2672_v37  ;;  %v2578_v53 = vpop.permute.xlu1 %2577 }
 0x2b4   : > { %v2898_v23 = vsel %vm1420_vm7, %v2866_v48, %v2578_v53 }
 0x2b6   : > { %v2720_v43 = vpop.permute.xlu0 %2719 }
 0x2b7   : > { %v2992_v49 = vsel %vm1519_vm10, %v2960_v35, %v2720_v43 }
 0x2b8   : > { %3658 = vmatprep.mubr.msk.bf16.mxu1 %vm1579_vm11, %v2992_v49 }
 0x2ba   : > { %v2722_v62 = vpop.permute.xlu0 %2721 }
 0x2bb   : > { %v2626_v33 = vpop.permute.xlu1 %2625 }
 0x2bc   : > { %v2930_v4 = vsel %vm1453_vm8, %v2898_v23, %v2626_v33 }
 0x2be   : > { %v2436_v26 = vpop.permute.xlu0 %2435 }
 0x2bf   : > { %v2674_v1 = vpop.permute.xlu1 %2673 }
 0x2c0   : > { %v2962_v10 = vsel %vm1486_vm9, %v2930_v4, %v2674_v1 }
 0x2c1   : > { %v2994_v15 = vsel %vm1519_vm10, %v2962_v10, %v2722_v62 }
 0x2c2   : > { %3659 = vmatmul.mubr.msk.bf16.gmra.mxu1 %vm1579_vm11, %v2994_v15  ;;  %v2484_v32 = vpop.permute.xlu0 %2483 }
 0x2c3   : > { %v2388_v55 = vpop.permute.xlu1 %2387 }
 0x2c4   : > { %v2767_v9 = vsel %vm280_vm0, %v4596_v22, %v2388_v55 }
 0x2c5   : > { %v2804_v11 = vsel %vm1321_vm4, %v2767_v9, %v2436_v26 }
 0x2c6   : > { %v2532_v2 = vpop.permute.xlu0 %2531  ;;  %v2836_v6 = vsel %vm1354_vm5, %v2804_v11, %v2484_v32 }
 0x2c7   : > { %v2390_v42 = vpop.permute.xlu1 %2389  ;;  %v2868_v36 = vsel %vm1387_vm6, %v2836_v6, %v2532_v2  ;;  %v4913_v6 = vld [vmem:[%s5112_s5] ss:$0 sm:$0xff] }
 0x2c8   : > { %v2770_v20 = vsel %vm280_vm0, %v4635_v3, %v2390_v42 }
 0x2ca   : > { %v2580_v0 = vpop.permute.xlu0 %2579 }
 0x2cb   : > { %v2438_v40 = vpop.permute.xlu1 %2437  ;;  %v2900_v24 = vsel %vm1420_vm7, %v2868_v36, %v2580_v0 }
 0x2cc   : > { %v2806_v21 = vsel %vm1321_vm4, %v2770_v20, %v2438_v40 }
 0x2ce   : > { %v2628_v59 = vpop.permute.xlu0 %2627 }
 0x2cf   : > { %v2486_v16 = vpop.permute.xlu1 %2485  ;;  %v2932_v19 = vsel %vm1453_vm8, %v2900_v24, %v2628_v59  ;;  %v4919_v24 = vld [vmem:[%s5113_s6] ss:$0 sm:$0xff] }
 0x2d0   : > { %v2838_v50 = vsel %vm1354_vm5, %v2806_v21, %v2486_v16 }
 0x2d2   : > { %v2676_v17 = vpop.permute.xlu0 %2675 }
 0x2d3   : > { %v2534_v44 = vpop.permute.xlu1 %2533  ;;  %v2964_v56 = vsel %vm1486_vm9, %v2932_v19, %v2676_v17 }
 0x2d4   : > { %v2870_v27 = vsel %vm1387_vm6, %v2838_v50, %v2534_v44  ;;  %v3230_v50 = vld [vmem:[%s3950_s29] sm:$0xff] }
 0x2d6   : > { %v2724_v58 = vpop.permute.xlu0 %2723 }
 0x2d7   : > { %v2582_v22 = vpop.permute.xlu1 %2581  ;;  %v2996_v30 = vsel %vm1519_vm10, %v2964_v56, %v2724_v58  ;;  %v3232_v56 = vld [vmem:[%s3950_s29 + $0x10] sm:$0xff] }
 0x2d8   : > { %3662 = vmatprep.mubr.msk.bf16.mxu1 %vm1579_vm11, %v2996_v30  ;;  %v2902_v46 = vsel %vm1420_vm7, %v2870_v27, %v2582_v22 }
 0x2da   : > { %v2726_v18 = vpop.permute.xlu0 %2725 }
 0x2db   : > { %v2630_v25 = vpop.permute.xlu1 %2629 }
 0x2dc   : > { %v2934_v28 = vsel %vm1453_vm8, %v2902_v46, %v2630_v25 }
 0x2de   : > { %v2440_v29 = vpop.permute.xlu0 %2439 }
 0x2df   : > { %v2678_v52 = vpop.permute.xlu1 %2677 }
 0x2e0   : > { %v2966_v47 = vsel %vm1486_vm9, %v2934_v28, %v2678_v52 }
 0x2e1   : > { %v2998_v5 = vsel %vm1519_vm10, %v2966_v47, %v2726_v18 }
 0x2e2   : > { %3663 = vmatmul.mubr.msk.bf16.gmra.mxu1 %vm1579_vm11, %v2998_v5  ;;  %v2488_v31 = vpop.permute.xlu0 %2487  ;;  %v3233_v5 = vld [vmem:[%s3950_s29 + $0x18] sm:$0xff] }
 0x2e3   : > { %v2392_v3 = vpop.permute.xlu1 %2391 }
 0x2e4   : > { %v2773_v38 = vsel %vm280_vm0, %v4686_v61, %v2392_v3 }
 0x2e5   : > { %v2808_v39 = vsel %vm1321_vm4, %v2773_v38, %v2440_v29 }
 0x2e6   : > { %v2536_v34 = vpop.permute.xlu0 %2535  ;;  %v2840_v7 = vsel %vm1354_vm5, %v2808_v39, %v2488_v31  ;;  %v3231_v39 = vld [vmem:[%s3950_s29 + $0x8] sm:$0xff] }
 0x2e7   : > { %v2394_v45 = vpop.permute.xlu1 %2393  ;;  %v2872_v53 = vsel %vm1387_vm6, %v2840_v7, %v2536_v34 }
 0x2e8   : > { %v2776_v33 = vsel %vm280_vm0, %v4715_v8, %v2394_v45 }
 0x2ea   : > { %v2584_v51 = vpop.permute.xlu0 %2583 }
 0x2eb   : > { %v2442_v60 = vpop.permute.xlu1 %2441  ;;  %v2904_v43 = vsel %vm1420_vm7, %v2872_v53, %v2584_v51 }
 0x2ec   : > { %v2810_v63 = vsel %vm1321_vm4, %v2776_v33, %v2442_v60 }
 0x2ee   : > { %v2632_v37 = vpop.permute.xlu0 %2631 }
 0x2ef   : > { %v2490_v12 = vpop.permute.xlu1 %2489  ;;  %v2936_v49 = vsel %vm1453_vm8, %v2904_v43, %v2632_v37 }
 0x2f0   : > { %v2842_v4 = vsel %vm1354_vm5, %v2810_v63, %v2490_v12 }
 0x2f2   : > { %v2680_v41 = vpop.permute.xlu0 %2679 }
 0x2f3   : > { %v2538_v35 = vpop.permute.xlu1 %2537  ;;  %v2968_v54 = vsel %vm1486_vm9, %v2936_v49, %v2680_v41 }
 0x2f4   : > { %v2874_v26 = vsel %vm1387_vm6, %v2842_v4, %v2538_v35 }
 0x2f6   : > { %v2728_v57 = vpop.permute.xlu0 %2727 }
 0x2f7   : > { %v2586_v61 = vpop.permute.xlu1 %2585  ;;  %v3000_v62 = vsel %vm1519_vm10, %v2968_v54, %v2728_v57 }
 0x2f8   : > { %3666 = vmatprep.mubr.msk.bf16.mxu1 %vm1579_vm11, %v3000_v62  ;;  %v2906_v1 = vsel %vm1420_vm7, %v2874_v26, %v2586_v61 }
 0x2fa   : > { %v2730_v48 = vpop.permute.xlu0 %2729 }
 0x2fb   : > { %v2634_v23 = vpop.permute.xlu1 %2633 }
 0x2fc   : > { %v2938_v10 = vsel %vm1453_vm8, %v2906_v1, %v2634_v23 }
 0x2fe   : > { %v2444_v15 = vpop.permute.xlu0 %2443 }
 0x2ff   : > { %v2682_v55 = vpop.permute.xlu1 %2681 }
 0x300   : > { %v2970_v32 = vsel %vm1486_vm9, %v2938_v10, %v2682_v55  ;;  %v3236_v10 = vld [vmem:[%s3950_s29 + $0x30] sm:$0xff] }
 0x301   : > { %v3002_v2 = vsel %vm1519_vm10, %v2970_v32, %v2730_v48 }
 0x302   : > { %3667 = vmatmul.mubr.msk.bf16.gmra.mxu1 %vm1579_vm11, %v3002_v2  ;;  %v2492_v42 = vpop.permute.xlu0 %2491  ;;  %v3234_v2 = vld [vmem:[%s3950_s29 + $0x20] sm:$0xff] }
 0x303   : > { %v2396_v8 = vpop.permute.xlu1 %2395 }
 0x304   : > { %v2779_v40 = vsel %vm280_vm0, %v4771_v14, %v2396_v8 }
 0x305   : > { %v2812_v16 = vsel %vm1321_vm4, %v2779_v40, %v2444_v15  ;;  %v3237_v40 = vld [vmem:[%s3950_s29 + $0x38] sm:$0xff] }
 0x306   : > { %v2540_v9 = vpop.permute.xlu0 %2539  ;;  %v2844_v36 = vsel %vm1354_vm5, %v2812_v16, %v2492_v42 }
 0x307   : > { %v2398_v0 = vpop.permute.xlu1 %2397  ;;  %v2876_v22 = vsel %vm1387_vm6, %v2844_v36, %v2540_v9  ;;  %v3235_v36 = vld [vmem:[%s3950_s29 + $0x28] sm:$0xff] }
 0x308   : > { %v2782_v49 = vsel %vm280_vm0, %v4793_v13, %v2398_v0 }
 0x30a   : > { %v2588_v11 = vpop.permute.xlu0 %2587 }
 0x30b   : > { %v2446_v59 = vpop.permute.xlu1 %2445  ;;  %v2908_v25 = vsel %vm1420_vm7, %v2876_v22, %v2588_v11 }
 0x30c   : > { %v2814_v57 = vsel %vm1321_vm4, %v2782_v49, %v2446_v59 }
 0x30e   : > { %v2636_v17 = vpop.permute.xlu0 %2635 }
 0x30f   : > { %v2494_v44 = vpop.permute.xlu1 %2493  ;;  %v3644_v14 = vpop.f32.mrf.mxu1  ;;  %v2940_v46 = vsel %vm1453_vm8, %v2908_v25, %v2636_v17 }
 0x310   : > { %v3270_v19 = vmul.f32 %v3644_v14, %v4913_v6  ;;  %v2846_v61 = vsel %vm1354_vm5, %v2814_v57, %v2494_v44 }
 0x311   : > { %v3103_v58 = vpop.f32.mrf.mxu1 }
 0x312   : > { %v3308_v30 = vadd.f32 %v4919_v24, %v3270_v19  ;;  %v3268_v20 = vmul.f32 %v4913_v6, %v3103_v58  ;;  %v2684_v21 = vpop.permute.xlu0 %2683 }
 0x313   : > { %v2542_v18 = vpop.permute.xlu1 %2541  ;;  %v3645_v27 = vpop.f32.mrf.mxu1  ;;  %v2972_v47 = vsel %vm1486_vm9, %v2940_v46, %v2684_v21  ;;  %v3238_v46 = vld [vmem:[%s3950_s29 + $0x40] sm:$0xff] }
 0x314   : > { %v3340_v28 = vadd.f32 %v3308_v30, %v3232_v56  ;;  %v3306_v29 = vadd.f32 %v4919_v24, %v3268_v20  ;;  %v3271_v52 = vmul.f32 %v3645_v27, %v4913_v6  ;;  %v2878_v33 = vsel %vm1387_vm6, %v2846_v61, %v2542_v18  ;;  %v3240_v18 = vld [vmem:[%s3950_s29 + $0x50] sm:$0xff]  ;;  %v3242_v61 = vld [vmem:[%s3950_s29 + $0x60] sm:$0xff] }
 0x315   : > { %v3106_v3 = vpop.f32.mrf.mxu1 }
 0x316   : > { %v3372_v31 = vmax.f32 %v3340_v28, 0.0  ;;  %v3338_v34 = vadd.f32 %v3306_v29, %v3230_v50  ;;  %v3309_v45 = vadd.f32 %v4919_v24, %v3271_v52  ;;  %v3269_v38 = vmul.f32 %v4913_v6, %v3106_v3  ;;  %v2732_v51 = vpop.permute.xlu0 %2731 }
 0x317   : > { %v2590_v60 = vpop.permute.xlu1 %2589  ;;  %v3004_v37 = vsel %vm1519_vm10, %v2972_v47, %v2732_v51  ;;  %v3239_v51 = vld [vmem:[%s3950_s29 + $0x48] sm:$0xff] }
 0x318   : > { %3404 = vst.msk [vmem:[%s4936_s19 + $0x10] sm:$0xff] %vm280_vm0, %v3372_v31  ;;  %v3370_v12 = vmax.f32 %v3338_v34, 0.0  ;;  %v3341_v7 = vadd.f32 %v3309_v45, %v3233_v5  ;;  %v3307_v41 = vadd.f32 %v4919_v24, %v3269_v38  ;;  %3670 = vmatprep.mubr.msk.bf16.mxu1 %vm1579_vm11, %v3004_v37  ;;  %v2910_v63 = vsel %vm1420_vm7, %v2878_v33, %v2590_v60  ;;  %v3241_v5 = vld [vmem:[%s3950_s29 + $0x58] sm:$0xff] }
 0x31a   : > { %3402 = vst.msk [vmem:[%s4936_s19] sm:$0xff] %vm280_vm0, %v3370_v12  ;;  %v3373_v35 = vmax.f32 %v3341_v7, 0.0  ;;  %v3339_v53 = vadd.f32 %v3307_v41, %v3231_v39 }
 0x31b   : > { %v2638_v43 = vpop.permute.xlu1 %2637 }
 0x31c   : > { %3405 = vst.msk [vmem:[%s4936_s19 + $0x18] sm:$0xff] %vm280_vm0, %v3373_v35  ;;  %v3371_v54 = vmax.f32 %v3339_v53, 0.0  ;;  %v2942_v48 = vsel %vm1453_vm8, %v2910_v63, %v2638_v43  ;;  %v3244_v43 = vld [vmem:[%s3950_s29 + $0x70] sm:$0xff] }
 0x31e   : > { %3403 = vst.msk [vmem:[%s4936_s19 + $0x8] sm:$0xff] %vm280_vm0, %v3371_v54 }
 0x31f   : > { %v2686_v62 = vpop.permute.xlu1 %2685 }
 0x320   : > { %v2974_v13 = vsel %vm1486_vm9, %v2942_v48, %v2686_v62 }
 0x323   : > { %v2734_v23 = vpop.permute.xlu1 %2733 }
 0x324   : > { %v3006_v4 = vsel %vm1519_vm10, %v2974_v13, %v2734_v23  ;;  %v3245_v13 = vld [vmem:[%s3950_s29 + $0x78] sm:$0xff] }
 0x325   : > { %3671 = vmatmul.mubr.msk.bf16.gmra.mxu1 %vm1579_vm11, %v3006_v4 }
 0x32f   : > { %v3648_v26 = vpop.f32.mrf.mxu1 }
 0x330   : > { %v3274_v1 = vmul.f32 %v3648_v26, %v4913_v6 }
 0x331   : > { %v3119_v15 = vpop.f32.mrf.mxu1 }
 0x332   : > { %v3312_v55 = vadd.f32 %v4919_v24, %v3274_v1  ;;  %v3272_v32 = vmul.f32 %v4913_v6, %v3119_v15  ;;  %v3243_v15 = vld [vmem:[%s3950_s29 + $0x68] sm:$0xff] }
 0x333   : > { %v3649_v8 = vpop.f32.mrf.mxu1 }
 0x334   : > { %v3344_v42 = vadd.f32 %v3312_v55, %v3236_v10  ;;  %v3310_v9 = vadd.f32 %v4919_v24, %v3272_v32  ;;  %v3275_v0 = vmul.f32 %v3649_v8, %v4913_v6 }
 0x335   : > { %v3122_v11 = vpop.f32.mrf.mxu1 }
 0x336   : > { %v3376_v59 = vmax.f32 %v3344_v42, 0.0  ;;  %v3342_v16 = vadd.f32 %v3310_v9, %v3234_v2  ;;  %v3313_v17 = vadd.f32 %v4919_v24, %v3275_v0  ;;  %v3273_v44 = vmul.f32 %v4913_v6, %v3122_v11  ;;  %v3248_v11 = vld [vmem:[%s3950_s29 + $0x90] sm:$0xff] }
 0x338   : > { %3408 = vst.msk [vmem:[%s4936_s19 + $0x30] sm:$0xff] %vm280_vm0, %v3376_v59  ;;  %v3374_v14 = vmax.f32 %v3342_v16, 0.0  ;;  %v3345_v19 = vadd.f32 %v3313_v17, %v3237_v40  ;;  %v3311_v56 = vadd.f32 %v4919_v24, %v3273_v44  ;;  %v3246_v44 = vld [vmem:[%s3950_s29 + $0x80] sm:$0xff] }
 0x33a   : > { %3406 = vst.msk [vmem:[%s4936_s19 + $0x20] sm:$0xff] %vm280_vm0, %v3374_v14  ;;  %v3377_v58 = vmax.f32 %v3345_v19, 0.0  ;;  %v3343_v22 = vadd.f32 %v3311_v56, %v3235_v36 }
 0x33c   : > { %3409 = vst.msk [vmem:[%s4936_s19 + $0x38] sm:$0xff] %vm280_vm0, %v3377_v58  ;;  %v3375_v30 = vmax.f32 %v3343_v22, 0.0  ;;  %v3249_v58 = vld [vmem:[%s3950_s29 + $0x98] sm:$0xff] }
 0x33e   : > { %3407 = vst.msk [vmem:[%s4936_s19 + $0x28] sm:$0xff] %vm280_vm0, %v3375_v30 }
 0x34b   : > { %v3652_v20 = vpop.f32.mrf.mxu1 }
 0x34c   : > { %v3278_v21 = vmul.f32 %v3652_v20, %v4913_v6 }
 0x34d   : > { %v3135_v25 = vpop.f32.mrf.mxu1 }
 0x34e   : > { %v3316_v50 = vadd.f32 %v4919_v24, %v3278_v21  ;;  %v3276_v27 = vmul.f32 %v4913_v6, %v3135_v25  ;;  %v3247_v25 = vld [vmem:[%s3950_s29 + $0x88] sm:$0xff] }
 0x34f   : > { %v3653_v28 = vpop.f32.mrf.mxu1 }
 0x350   : > { %v3348_v29 = vadd.f32 %v3316_v50, %v3240_v18  ;;  %v3314_v52 = vadd.f32 %v4919_v24, %v3276_v27  ;;  %v3279_v47 = vmul.f32 %v3653_v28, %v4913_v6 }
 0x351   : > { %v3138_v3 = vpop.f32.mrf.mxu1 }
 0x352   : > { %v3380_v31 = vmax.f32 %v3348_v29, 0.0  ;;  %v3346_v34 = vadd.f32 %v3314_v52, %v3238_v46  ;;  %v3317_v45 = vadd.f32 %v4919_v24, %v3279_v47  ;;  %v3277_v38 = vmul.f32 %v4913_v6, %v3138_v3  ;;  %v3252_v3 = vld [vmem:[%s3950_s29 + $0xb0] sm:$0xff] }
 0x354   : > { %3412 = vst.msk [vmem:[%s4936_s19 + $0x50] sm:$0xff] %vm280_vm0, %v3380_v31  ;;  %v3378_v60 = vmax.f32 %v3346_v34, 0.0  ;;  %v3349_v39 = vadd.f32 %v3317_v45, %v3241_v5  ;;  %v3315_v37 = vadd.f32 %v4919_v24, %v3277_v38  ;;  %v3250_v38 = vld [vmem:[%s3950_s29 + $0xa0] sm:$0xff] }
 0x356   : > { %3410 = vst.msk [vmem:[%s4936_s19 + $0x40] sm:$0xff] %vm280_vm0, %v3378_v60  ;;  %v3381_v12 = vmax.f32 %v3349_v39, 0.0  ;;  %v3347_v7 = vadd.f32 %v3315_v37, %v3239_v51 }
 0x358   : > { %3413 = vst.msk [vmem:[%s4936_s19 + $0x58] sm:$0xff] %vm280_vm0, %v3381_v12  ;;  %v3379_v41 = vmax.f32 %v3347_v7, 0.0  ;;  %v3253_v12 = vld [vmem:[%s3950_s29 + $0xb8] sm:$0xff] }
 0x35a   : > { %3411 = vst.msk [vmem:[%s4936_s19 + $0x48] sm:$0xff] %vm280_vm0, %v3379_v41 }
 0x362   : > { %v3656_v35 = vpop.f32.mrf.mxu1 }
 0x363   : > { %v3282_v53 = vmul.f32 %v3656_v35, %v4913_v6 }
 0x364   : > { %v3151_v49 = vpop.f32.mrf.mxu1 }
 0x365   : > { %v3320_v54 = vadd.f32 %v4919_v24, %v3282_v53  ;;  %v3280_v57 = vmul.f32 %v4913_v6, %v3151_v49  ;;  %v3251_v49 = vld [vmem:[%s3950_s29 + $0xa8] sm:$0xff] }
 0x366   : > { %v3657_v62 = vpop.f32.mrf.mxu1 }
 0x367   : > { %v3352_v33 = vadd.f32 %v3320_v54, %v3244_v43  ;;  %v3318_v63 = vadd.f32 %v4919_v24, %v3280_v57  ;;  %v3283_v48 = vmul.f32 %v3657_v62, %v4913_v6 }
 0x368   : > { %v3154_v23 = vpop.f32.mrf.mxu1 }
 0x369   : > { %v3384_v4 = vmax.f32 %v3352_v33, 0.0  ;;  %v3350_v26 = vadd.f32 %v3318_v63, %v3242_v61  ;;  %v3321_v1 = vadd.f32 %v4919_v24, %v3283_v48  ;;  %v3281_v10 = vmul.f32 %v4913_v6, %v3154_v23  ;;  %v3256_v23 = vld [vmem:[%s3950_s29 + $0xd0] sm:$0xff] }
 0x36b   : > { %3416 = vst.msk [vmem:[%s4936_s19 + $0x70] sm:$0xff] %vm280_vm0, %v3384_v4  ;;  %v3382_v55 = vmax.f32 %v3350_v26, 0.0  ;;  %v3353_v32 = vadd.f32 %v3321_v1, %v3245_v13  ;;  %v3319_v2 = vadd.f32 %v4919_v24, %v3281_v10  ;;  %v3254_v10 = vld [vmem:[%s3950_s29 + $0xc0] sm:$0xff] }
 0x36d   : > { %3414 = vst.msk [vmem:[%s4936_s19 + $0x60] sm:$0xff] %vm280_vm0, %v3382_v55  ;;  %v3385_v8 = vmax.f32 %v3353_v32, 0.0  ;;  %v3351_v42 = vadd.f32 %v3319_v2, %v3243_v15 }
 0x36f   : > { %3417 = vst.msk [vmem:[%s4936_s19 + $0x78] sm:$0xff] %vm280_vm0, %v3385_v8  ;;  %v3383_v9 = vmax.f32 %v3351_v42, 0.0  ;;  %v3257_v8 = vld [vmem:[%s3950_s29 + $0xd8] sm:$0xff] }
 0x371   : > { %3415 = vst.msk [vmem:[%s4936_s19 + $0x68] sm:$0xff] %vm280_vm0, %v3383_v9 }
 0x382   : > { %v3660_v0 = vpop.f32.mrf.mxu1 }
 0x383   : > { %v3286_v40 = vmul.f32 %v3660_v0, %v4913_v6 }
 0x384   : > { %v3167_v59 = vpop.f32.mrf.mxu1 }
 0x385   : > { %v3324_v16 = vadd.f32 %v4919_v24, %v3286_v40  ;;  %v3284_v17 = vmul.f32 %v4913_v6, %v3167_v59  ;;  %v3255_v59 = vld [vmem:[%s3950_s29 + $0xc8] sm:$0xff] }
 0x386   : > { %v3661_v36 = vpop.f32.mrf.mxu1 }
 0x387   : > { %v3356_v14 = vadd.f32 %v3324_v16, %v3248_v11  ;;  %v3322_v19 = vadd.f32 %v4919_v24, %v3284_v17  ;;  %v3287_v56 = vmul.f32 %v3661_v36, %v4913_v6 }
 0x388   : > { %v3170_v22 = vpop.f32.mrf.mxu1 }
 0x389   : > { %v3388_v30 = vmax.f32 %v3356_v14, 0.0  ;;  %v3354_v20 = vadd.f32 %v3322_v19, %v3246_v44  ;;  %v3325_v21 = vadd.f32 %v4919_v24, %v3287_v56  ;;  %v3285_v18 = vmul.f32 %v4913_v6, %v3170_v22  ;;  %v3260_v22 = vld [vmem:[%s3950_s29 + $0xf0] sm:$0xff] }
 0x38b   : > { %3420 = vst.msk [vmem:[%s4936_s19 + $0x90] sm:$0xff] %vm280_vm0, %v3388_v30  ;;  %v3386_v50 = vmax.f32 %v3354_v20, 0.0  ;;  %v3357_v27 = vadd.f32 %v3325_v21, %v3249_v58  ;;  %v3323_v46 = vadd.f32 %v4919_v24, %v3285_v18  ;;  %v3258_v18 = vld [vmem:[%s3950_s29 + $0xe0] sm:$0xff] }
 0x38d   : > { %3418 = vst.msk [vmem:[%s4936_s19 + $0x80] sm:$0xff] %vm280_vm0, %v3386_v50  ;;  %v3389_v28 = vmax.f32 %v3357_v27, 0.0  ;;  %v3355_v29 = vadd.f32 %v3323_v46, %v3247_v25 }
 0x38f   : > { %3421 = vst.msk [vmem:[%s4936_s19 + $0x98] sm:$0xff] %vm280_vm0, %v3389_v28  ;;  %v3387_v52 = vmax.f32 %v3355_v29, 0.0  ;;  %v3261_v28 = vld [vmem:[%s3950_s29 + $0xf8] sm:$0xff] }
 0x391   : > { %3419 = vst.msk [vmem:[%s4936_s19 + $0x88] sm:$0xff] %vm280_vm0, %v3387_v52 }
 0x3a2   : > { %v3664_v47 = vpop.f32.mrf.mxu1 }
 0x3a3   : > { %v3290_v5 = vmul.f32 %v3664_v47, %v4913_v6 }
 0x3a4   : > { %v3183_v31 = vpop.f32.mrf.mxu1 }
 0x3a5   : > { %v3328_v34 = vadd.f32 %v4919_v24, %v3290_v5  ;;  %v3288_v45 = vmul.f32 %v4913_v6, %v3183_v31  ;;  %v3259_v31 = vld [vmem:[%s3950_s29 + $0xe8] sm:$0xff] }
 0x3a6   : > { %v3665_v51 = vpop.f32.mrf.mxu1 }
 0x3a7   : > { %v3360_v60 = vadd.f32 %v3328_v34, %v3252_v3  ;;  %v3326_v39 = vadd.f32 %v4919_v24, %v3288_v45  ;;  %v3291_v37 = vmul.f32 %v3665_v51, %v4913_v6 }
 0x3a8   : > { %v3186_v7 = vpop.f32.mrf.mxu1 }
 0x3a9   : > { %v3392_v41 = vmax.f32 %v3360_v60, 0.0  ;;  %v3358_v35 = vadd.f32 %v3326_v39, %v3250_v38  ;;  %v3329_v53 = vadd.f32 %v4919_v24, %v3291_v37  ;;  %v3289_v43 = vmul.f32 %v4913_v6, %v3186_v7 }
 0x3ab   : > { %3424 = vst.msk [vmem:[%s4936_s19 + $0xb0] sm:$0xff] %vm280_vm0, %v3392_v41  ;;  %v3390_v54 = vmax.f32 %v3358_v35, 0.0  ;;  %v3361_v57 = vadd.f32 %v3329_v53, %v3253_v12  ;;  %v3327_v61 = vadd.f32 %v4919_v24, %v3289_v43 }
 0x3ad   : > { %3422 = vst.msk [vmem:[%s4936_s19 + $0xa0] sm:$0xff] %vm280_vm0, %v3390_v54  ;;  %v3393_v62 = vmax.f32 %v3361_v57, 0.0  ;;  %v3359_v33 = vadd.f32 %v3327_v61, %v3251_v49 }
 0x3af   : > { %3425 = vst.msk [vmem:[%s4936_s19 + $0xb8] sm:$0xff] %vm280_vm0, %v3393_v62  ;;  %v3391_v63 = vmax.f32 %v3359_v33, 0.0 }
 0x3b1   : > { %3423 = vst.msk [vmem:[%s4936_s19 + $0xa8] sm:$0xff] %vm280_vm0, %v3391_v63 }
 0x3c2   : > { %v3668_v48 = vpop.f32.mrf.mxu1 }
 0x3c3   : > { %v3294_v13 = vmul.f32 %v3668_v48, %v4913_v6 }
 0x3c4   : > { %v3199_v4 = vpop.f32.mrf.mxu1 }
 0x3c5   : > { %v3332_v26 = vadd.f32 %v4919_v24, %v3294_v13  ;;  %v3292_v1 = vmul.f32 %v4913_v6, %v3199_v4 }
 0x3c6   : > { %v3669_v15 = vpop.f32.mrf.mxu1 }
 0x3c7   : > { %v3364_v55 = vadd.f32 %v3332_v26, %v3256_v23  ;;  %v3330_v32 = vadd.f32 %v4919_v24, %v3292_v1  ;;  %v3295_v2 = vmul.f32 %v3669_v15, %v4913_v6 }
 0x3c8   : > { %v3202_v42 = vpop.f32.mrf.mxu1 }
 0x3c9   : > { %v3396_v9 = vmax.f32 %v3364_v55, 0.0  ;;  %v3362_v0 = vadd.f32 %v3330_v32, %v3254_v10  ;;  %v3333_v40 = vadd.f32 %v4919_v24, %v3295_v2  ;;  %v3293_v11 = vmul.f32 %v4913_v6, %v3202_v42 }
 0x3cb   : > { %3428 = vst.msk [vmem:[%s4936_s19 + $0xd0] sm:$0xff] %vm280_vm0, %v3396_v9  ;;  %v3394_v16 = vmax.f32 %v3362_v0, 0.0  ;;  %v3365_v17 = vadd.f32 %v3333_v40, %v3257_v8  ;;  %v3331_v44 = vadd.f32 %v4919_v24, %v3293_v11 }
 0x3cd   : > { %3426 = vst.msk [vmem:[%s4936_s19 + $0xc0] sm:$0xff] %vm280_vm0, %v3394_v16  ;;  %v3397_v36 = vmax.f32 %v3365_v17, 0.0  ;;  %v3363_v14 = vadd.f32 %v3331_v44, %v3255_v59 }
 0x3cf   : > { %3429 = vst.msk [vmem:[%s4936_s19 + $0xd8] sm:$0xff] %vm280_vm0, %v3397_v36  ;;  %v3395_v19 = vmax.f32 %v3363_v14, 0.0 }
 0x3d1   : > { %3427 = vst.msk [vmem:[%s4936_s19 + $0xc8] sm:$0xff] %vm280_vm0, %v3395_v19 }
 0x3e5   : > { %v3672_v56 = vpop.f32.mrf.mxu1 }
 0x3e6   : > { %v3298_v58 = vmul.f32 %v3672_v56, %v4913_v6 }
 0x3e7   : > { %v3215_v30 = vpop.f32.mrf.mxu1 }
 0x3e8   : > { %v3336_v20 = vadd.f32 %v4919_v24, %v3298_v58  ;;  %v3296_v21 = vmul.f32 %v4913_v6, %v3215_v30 }
 0x3e9   : > { %v3673_v25 = vpop.f32.mrf.mxu1 }
 0x3ea   : > { %v3368_v50 = vadd.f32 %v3336_v20, %v3260_v22  ;;  %v3334_v27 = vadd.f32 %v4919_v24, %v3296_v21  ;;  %v3299_v46 = vmul.f32 %v3673_v25, %v4913_v6 }
 0x3eb   : > { %v3218_v29 = vpop.f32.mrf.mxu1 }
 0x3ec   : > { %v3400_v52 = vmax.f32 %v3368_v50, 0.0  ;;  %v3366_v47 = vadd.f32 %v3334_v27, %v3258_v18  ;;  %v3337_v5 = vadd.f32 %v4919_v24, %v3299_v46  ;;  %v3297_v3 = vmul.f32 %v4913_v6, %v3218_v29 }
 0x3ee   : > { %3432 = vst.msk [vmem:[%s4936_s19 + $0xf0] sm:$0xff] %vm280_vm0, %v3400_v52  ;;  %v3398_v34 = vmax.f32 %v3366_v47, 0.0  ;;  %v3369_v45 = vadd.f32 %v3337_v5, %v3261_v28  ;;  %v3335_v38 = vadd.f32 %v4919_v24, %v3297_v3 }
 0x3f0   : > { %3430 = vst.msk [vmem:[%s4936_s19 + $0xe0] sm:$0xff] %vm280_vm0, %v3398_v34  ;;  %v3401_v51 = vmax.f32 %v3369_v45, 0.0  ;;  %v3367_v60 = vadd.f32 %v3335_v38, %v3259_v31 }
 0x3f2   : > { %3433 = vst.msk [vmem:[%s4936_s19 + $0xf8] sm:$0xff] %vm280_vm0, %v3401_v51  ;;  %v3399_v39 = vmax.f32 %v3367_v60, 0.0 }
 0x3f4   : > { %3431 = vst.msk [vmem:[%s4936_s19 + $0xe8] sm:$0xff] %vm280_vm0, %v3399_v39 }
 0x3f5 PF: > { %s17_s24 = sadd.s32 1, %s3711_s24  }
 0x3f6   : > { %p14_p4 = scmp.ge.s32.totalorder %s17_s24, 4  }
 0x3f8   :  { %16 = sbr.rel (!%p14_p4) target bundleno = 1 (0x1), region = 84 }

</bundles_post_ra>
